<compile_context>
chip_gen: v6e
topology: v6e:2x2x1
jax: 0.10.0
libtpu: 0.0.40
codegen_flags: <defaults>
</compile_context>

<pallas_src>
import functools

import jax
import jax.numpy as jnp
from jax import lax
from jax.experimental import pallas as pl
from jax.experimental.pallas import tpu as pltpu


def _head_kernel(x_ref, wq_ref, wk_ref, wv_ref, o_ref, *, tq, nq):
    """One (batch, q-tile) step: full projections + causal attention for the tile.

    x_ref : (1, T, C)   compute dtype (bf16 by default) -- full sequence, resident
    wq_ref: (H, C)      1/sqrt(C) already folded in
    wk_ref: (H, C)
    wv_ref: (H, C)
    o_ref : (1, TQ, H)  output dtype
    """
    qi = pl.program_id(1)
    t = x_ref.shape[1]

    x_all = x_ref[0]                                        # (T, C)

    if nq == 1:
        # Reference shapes (T <= block_size): the q-tile is the whole sequence.
        q_start = 0
        xq = x_all
    else:
        # General-T fallback (outside the module's block_size): slice the q rows
        # out of the already-resident full block (no extra DMA stream for x_q).
        q_start = pl.multiple_of(qi * tq, tq)
        xq = x_ref[0, pl.ds(q_start, tq), :]                # (TQ, C)

    # Contract over C directly ((M,C) x (H,C) -> (M,H)); no transposes materialized.
    dims = (((1,), (1,)), ((), ()))

    # Projections: bf16 operands on the MXU, f32 accumulation, results cast back
    # to the compute dtype so the attention matmuls are also bf16-fed.
    q = lax.dot_general(xq, wq_ref[...], dims, preferred_element_type=jnp.float32)
    k = lax.dot_general(x_all, wk_ref[...], dims, preferred_element_type=jnp.float32)
    v = lax.dot_general(x_all, wv_ref[...], dims, preferred_element_type=jnp.float32)
    q = q.astype(x_all.dtype)                               # (TQ, H)
    k = k.astype(x_all.dtype)                               # (T,  H)
    v = v.astype(x_all.dtype)                               # (T,  H)

    # Attention logits: contract q and k over H directly (no k.T materialized).
    s = lax.dot_general(q, k, dims, preferred_element_type=jnp.float32)  # (TQ, T) f32

    # Causal mask (every step touches the diagonal, so the mask is always needed).
    row = q_start + lax.broadcasted_iota(jnp.int32, (tq, t), 0)
    col = lax.broadcasted_iota(jnp.int32, (tq, t), 1)
    s = jnp.where(row >= col, s, -jnp.inf)

    # Single-pass softmax in f32: the whole key range is visible, so no online
    # (running-max) rescale is required.  Row 0 always has >= 1 valid column, so
    # m is finite and exp(-inf - m) = 0 handles the masked entries exactly.
    m = jnp.max(s, axis=-1, keepdims=True)                  # (TQ, 1)
    p = jnp.exp(s - m)                                      # (TQ, T)
    l = jnp.sum(p, axis=-1, keepdims=True)                  # (TQ, 1)

    # Fold the softmax normalization into the (TQ, H) output scaling.  approx=True
    # uses the EUP vrcp slot; one Newton step on a (TQ,1) vector restores f32
    # accuracy at negligible VPU cost.
    r = pl.reciprocal(l, approx=True)
    r = r * (2.0 - l * r)

    out = jnp.dot(p.astype(v.dtype), v, preferred_element_type=jnp.float32)  # (TQ, H)
    o_ref[0] = (out * r).astype(o_ref.dtype)


def head_forward(x, w_key, w_query, w_value, *, q_block=512,
                 compute_dtype=jnp.bfloat16):
    """x: (B, T, C); w_*: (head_size, C) PyTorch-style nn.Linear weights."""
    B, T, C = x.shape
    H = w_key.shape[0]
    scale = float(C) ** -0.5

    # q-tile size.  For the module's shapes (T <= block_size = 256) this collapses
    # to tq = T, i.e. grid = (B, 1): single-pass softmax and K/V projected exactly
    # once per batch element.  For larger T (outside the module's domain) we fall
    # back to q_block-sized q-tiles, each seeing the full key range.
    if T <= q_block or T % q_block != 0:
        tq = T
    else:
        tq = q_block
    nq = T // tq

    # Fold 1/sqrt(C) into Wq (removes the O(T^2) scale multiply from the kernel)
    # and cast all operands to the MXU-native compute dtype (bf16 by default).
    # All in-kernel accumulation is f32.
    wq = (w_query.astype(jnp.float32) * scale).astype(compute_dtype)
    wk = w_key.astype(compute_dtype)
    wv = w_value.astype(compute_dtype)
    x_c = x.astype(compute_dtype)

    kernel = functools.partial(_head_kernel, tq=tq, nq=nq)

    return pl.pallas_call(
        kernel,
        out_shape=jax.ShapeDtypeStruct((B, T, H), x.dtype),
        grid=(B, nq),
        in_specs=[
            # Full sequence of x; constant over qi -> DMA'd once per batch element.
            pl.BlockSpec((1, T, C), lambda b, qi: (b, 0, 0)),
            # Weights: constant index maps -> fetched once, stay resident.
            pl.BlockSpec((H, C), lambda b, qi: (0, 0)),
            pl.BlockSpec((H, C), lambda b, qi: (0, 0)),
            pl.BlockSpec((H, C), lambda b, qi: (0, 0)),
        ],
        out_specs=pl.BlockSpec((1, tq, H), lambda b, qi: (b, qi, 0)),
        compiler_params=pltpu.CompilerParams(
            # B leads: balanced megacore split on v7x.  No cross-step state, so
            # both axes are truly parallel.  VMEM footprint (~2 MB) is far below
            # the scoped default on v5e/v6e/v7x, so no vmem_limit override.
            dimension_semantics=("parallel", "parallel"),
        ),
    )(x_c, wq, wk, wv)


def head_reference(x, w_key, w_query, w_value):
    """Pure-JAX reference matching the PyTorch forward (dropout in eval mode)."""
    B, T, C = x.shape
    k = x @ w_key.T
    q = x @ w_query.T
    v = x @ w_value.T
    wei = (q @ jnp.swapaxes(k, -2, -1)) * (C ** -0.5)
    mask = jnp.tril(jnp.ones((T, T), dtype=bool))
    wei = jnp.where(mask[None, :, :], wei, -jnp.inf)
    wei = jax.nn.softmax(wei, axis=-1)
    return wei @ v


if __name__ == "__main__":
    # Shapes consistent with the module: block_size=256, n_embed=384, and the
    # natural head_size = n_embed // 6 = 64.
    B, T, C, head_size = 2, 256, 384, 64

    key = jax.random.PRNGKey(0)
    k1, k2, k3, k4 = jax.random.split(key, 4)
    x = jax.random.normal(k1, (B, T, C), dtype=jnp.float32)
    # nn.Linear(n_embed, head_size, bias=False) weights: shape (head_size, n_embed)
    w_key = jax.random.normal(k2, (head_size, C), dtype=jnp.float32) * (C ** -0.5)
    w_query = jax.random.normal(k3, (head_size, C), dtype=jnp.float32) * (C ** -0.5)
    w_value = jax.random.normal(k4, (head_size, C), dtype=jnp.float32) * (C ** -0.5)

    ref = head_reference(x, w_key, w_query, w_value)

    # Exact-algorithm check: f32 operands, tight tolerance.
    out_f32 = jax.block_until_ready(
        head_forward(x, w_key, w_query, w_value, compute_dtype=jnp.float32))
    assert out_f32.shape == (B, T, head_size)
    err32 = jnp.max(jnp.abs(out_f32 - ref))
    assert jnp.allclose(out_f32, ref, atol=1e-3, rtol=1e-3), f"f32 max abs err = {err32}"

    # Default fast path: bf16 MXU operands with f32 accumulation (slightly looser
    # tolerance to account for bf16 operand rounding).
    out = jax.block_until_ready(head_forward(x, w_key, w_query, w_value))
    assert out.shape == (B, T, head_size)
    err = jnp.max(jnp.abs(out - ref))
    assert jnp.allclose(out, ref, atol=3e-2, rtol=3e-2), f"bf16 max abs err = {err}"

    print("KERNEL_OK")
</pallas_src>

<mosaic_0001>
module attributes {stable_mosaic.version = 11 : i64} {
  func.func @_head_kernel(%arg0: i32, %arg1: i32, %arg2: memref<1x256x384xf32, #tpu.memory_space<vmem>>, %arg3: memref<64x384xf32, #tpu.memory_space<vmem>>, %arg4: memref<64x384xf32, #tpu.memory_space<vmem>>, %arg5: memref<64x384xf32, #tpu.memory_space<vmem>>, %arg6: memref<1x256x64xf32, #tpu.memory_space<vmem>>) attributes {dimension_semantics = [#tpu.dimension_semantics<parallel>, #tpu.dimension_semantics<parallel>], iteration_bounds = array<i64: 2, 1>, scalar_prefetch = 0 : i64, scratch_operands = 0 : i64, tpu.core_type = #tpu.core_type<tc>, window_params = [{transform_indices = @transform_0, window_bounds = array<i64: 1, 256, 384>}, {pipeline_mode = #tpu.pipeline_mode<synchronous>, transform_indices = @transform_1, window_bounds = array<i64: 64, 384>}, {pipeline_mode = #tpu.pipeline_mode<synchronous>, transform_indices = @transform_2, window_bounds = array<i64: 64, 384>}, {pipeline_mode = #tpu.pipeline_mode<synchronous>, transform_indices = @transform_3, window_bounds = array<i64: 64, 384>}, {transform_indices = @transform_4, window_bounds = array<i64: 1, 256, 64>}]} {
    %c0 = arith.constant 0 : index
    %c0_0 = arith.constant 0 : index
    %c0_1 = arith.constant 0 : index
    %0 = vector.load %arg2[%c0, %c0_0, %c0_1] : memref<1x256x384xf32, #tpu.memory_space<vmem>>, vector<1x256x384xf32>
    %1 = vector.shape_cast %0 : vector<1x256x384xf32> to vector<256x384xf32>
    %c0_2 = arith.constant 0 : index
    %c0_3 = arith.constant 0 : index
    %2 = vector.load %arg3[%c0_2, %c0_3] : memref<64x384xf32, #tpu.memory_space<vmem>>, vector<64x384xf32>
    %cst = arith.constant dense<0.000000e+00> : vector<256x64xf32>
    %3 = tpu.matmul %1, %2, %cst {dimension_numbers = #tpu.dot_dimension_numbers<[1], [1], [0], [0], [0, 0, 1, 0], [], []>} : vector<256x384xf32>, vector<64x384xf32>, vector<256x64xf32> -> vector<256x64xf32>
    %c0_4 = arith.constant 0 : index
    %c0_5 = arith.constant 0 : index
    %4 = vector.load %arg4[%c0_4, %c0_5] : memref<64x384xf32, #tpu.memory_space<vmem>>, vector<64x384xf32>
    %cst_6 = arith.constant dense<0.000000e+00> : vector<256x64xf32>
    %5 = tpu.matmul %1, %4, %cst_6 {dimension_numbers = #tpu.dot_dimension_numbers<[1], [1], [0], [0], [0, 0, 1, 0], [], []>} : vector<256x384xf32>, vector<64x384xf32>, vector<256x64xf32> -> vector<256x64xf32>
    %c0_7 = arith.constant 0 : index
    %c0_8 = arith.constant 0 : index
    %6 = vector.load %arg5[%c0_7, %c0_8] : memref<64x384xf32, #tpu.memory_space<vmem>>, vector<64x384xf32>
    %cst_9 = arith.constant dense<0.000000e+00> : vector<256x64xf32>
    %7 = tpu.matmul %1, %6, %cst_9 {dimension_numbers = #tpu.dot_dimension_numbers<[1], [1], [0], [0], [0, 0, 1, 0], [], []>} : vector<256x384xf32>, vector<64x384xf32>, vector<256x64xf32> -> vector<256x64xf32>
    %cst_10 = arith.constant dense<0.000000e+00> : vector<256x256xf32>
    %8 = tpu.matmul %3, %5, %cst_10 {dimension_numbers = #tpu.dot_dimension_numbers<[1], [1], [0], [0], [0, 0, 1, 0], [], []>} : vector<256x64xf32>, vector<256x64xf32>, vector<256x256xf32> -> vector<256x256xf32>
    %9 = tpu.iota {dimensions = array<i32: 0>} : vector<256x256xi32>
    %c0_i32 = arith.constant 0 : i32
    %10 = vector.broadcast %c0_i32 : i32 to vector<256x256xi32>
    %11 = arith.addi %10, %9 : vector<256x256xi32>
    %12 = tpu.iota {dimensions = array<i32: 1>} : vector<256x256xi32>
    %13 = arith.cmpi sge, %11, %12 : vector<256x256xi32>
    %cst_11 = arith.constant 0xFF800000 : f32
    %14 = vector.broadcast %cst_11 : f32 to vector<256x256xf32>
    %15 = arith.select %13, %8, %14 : vector<256x256xi1>, vector<256x256xf32>
    %cst_12 = arith.constant dense<0xFF800000> : vector<256xf32>
    %16 = vector.multi_reduction <maximumf>, %15, %cst_12 [1] : vector<256x256xf32> to vector<256xf32>
    %17 = vector.shape_cast %16 : vector<256xf32> to vector<256x1xf32>
    %18 = vector.broadcast %17 : vector<256x1xf32> to vector<256x256xf32>
    %19 = arith.subf %15, %18 : vector<256x256xf32>
    %20 = math.exp %19 : vector<256x256xf32>
    %cst_13 = arith.constant dense<0.000000e+00> : vector<256xf32>
    %21 = vector.multi_reduction <add>, %20, %cst_13 [1] : vector<256x256xf32> to vector<256xf32>
    %22 = vector.shape_cast %21 : vector<256xf32> to vector<256x1xf32>
    %23 = tpu.reciprocal %22 {approx = true} : vector<256x1xf32> -> vector<256x1xf32>
    %24 = arith.mulf %22, %23 : vector<256x1xf32>
    %cst_14 = arith.constant 2.000000e+00 : f32
    %25 = vector.broadcast %cst_14 : f32 to vector<256x1xf32>
    %26 = arith.subf %25, %24 : vector<256x1xf32>
    %27 = arith.mulf %23, %26 : vector<256x1xf32>
    %cst_15 = arith.constant dense<0.000000e+00> : vector<256x64xf32>
    %28 = tpu.matmul %20, %7, %cst_15 {dimension_numbers = #tpu.dot_dimension_numbers<[1], [0], [0], [1], [0, 0, 1, 1], [], []>} : vector<256x256xf32>, vector<256x64xf32>, vector<256x64xf32> -> vector<256x64xf32>
    %29 = vector.broadcast %27 : vector<256x1xf32> to vector<256x64xf32>
    %30 = arith.mulf %28, %29 : vector<256x64xf32>
    %c0_16 = arith.constant 0 : index
    %c0_17 = arith.constant 0 : index
    %c0_18 = arith.constant 0 : index
    %31 = vector.load %arg6[%c0_16, %c0_17, %c0_18] : memref<1x256x64xf32, #tpu.memory_space<vmem>>, vector<1x256x64xf32>
    %32 = vector.shape_cast %31 : vector<1x256x64xf32> to vector<256x64xf32>
    %33 = vector.shape_cast %30 : vector<256x64xf32> to vector<1x256x64xf32>
    tpu.vector_store %arg6[%c0_16, %c0_17, %c0_18], %33 {strides = array<i32>} : memref<1x256x64xf32, #tpu.memory_space<vmem>>, vector<1x256x64xf32>,
    return
  }
  func.func @transform_0(%arg0: i32, %arg1: i32) -> (i32, i32, i32) {
    %c0_i32 = arith.constant 0 : i32
    %c0_i32_0 = arith.constant 0 : i32
    %c0_i32_1 = arith.constant 0 : i32
    return %arg0, %c0_i32, %c0_i32_0 : i32, i32, i32
  }
  func.func @transform_1(%arg0: i32, %arg1: i32) -> (i32, i32) {
    %c0_i32 = arith.constant 0 : i32
    %c0_i32_0 = arith.constant 0 : i32
    %c0_i32_1 = arith.constant 0 : i32
    return %c0_i32, %c0_i32_0 : i32, i32
  }
  func.func @transform_2(%arg0: i32, %arg1: i32) -> (i32, i32) {
    %c0_i32 = arith.constant 0 : i32
    %c0_i32_0 = arith.constant 0 : i32
    %c0_i32_1 = arith.constant 0 : i32
    return %c0_i32, %c0_i32_0 : i32, i32
  }
  func.func @transform_3(%arg0: i32, %arg1: i32) -> (i32, i32) {
    %c0_i32 = arith.constant 0 : i32
    %c0_i32_0 = arith.constant 0 : i32
    %c0_i32_1 = arith.constant 0 : i32
    return %c0_i32, %c0_i32_0 : i32, i32
  }
  func.func @transform_4(%arg0: i32, %arg1: i32) -> (i32, i32, i32) {
    %c0_i32 = arith.constant 0 : i32
    %c0_i32_0 = arith.constant 0 : i32
    return %arg0, %arg1, %c0_i32 : i32, i32, i32
  }
}

</mosaic_0001>

<bundles_post_ra>
// kernel: tpu_custom_call.1
= control target key start
LH: loop header
LB: loop body
LE: loop exit
PB: predicated region body
PF: predicated region fallthrough
CT: control target
= control target key end

     0   :  { %9 = vsyncpa [#allocation3], 0  ;;  %s5972_s0 = inlined_call_operand.hbm [shape: f32[2,256,384], index: 0, kind: input, shape index: {}]   ;;  %s5973_s1 = inlined_call_operand.hbm [shape: f32[64,384], index: 1, kind: input, shape index: {}]   ;;  %s5974_s2 = inlined_call_operand.hbm [shape: f32[64,384], index: 2, kind: input, shape index: {}]   ;;  %s5975_s3 = inlined_call_operand.hbm [shape: f32[64,384], index: 3, kind: input, shape index: {}]   ;;  %s5976_s4 = inlined_call_operand.vmem [shape: f32[2,256,64], index: 4, kind: output, shape index: {}]  }
   0x1   :  { %11 = vsyncpa [#allocation3 + $0x1], 0 }
   0x2   :  { %12 = vsyncpa [#allocation5], 0 }
   0x3   :  { %13 = vsyncpa [#allocation8], 0  ;;  %s4342_s15 = smov 0   ;;  %s4344_s16 = smov 0  }
   0x4   :  { %s4346_s17 = smov 0   ;;  %s4348_s18 = smov 0  }
   0x5   :  { %s4350_s19 = smov 0   ;;  %s4352_s20 = smov 0  }
   0x6 LB: > { %s3339_s21 = sadd.s32 4294967295, %s4308_s20   ;;  %p51_p0 = scmp.ne.s32.totalorder %s4292_s16, %s4288_s15  ;;  %s4308_s20 = sphi %s4352_s20, %s19_s20   ;;  %s4304_s19 = sphi %s4350_s19, %s6283_s19   ;;  %s4300_s18 = sphi %s4348_s18, %s6282_s18   ;;  %s4296_s17 = sphi %s4346_s17, %s6281_s17   ;;  %s4292_s16 = sphi %s4344_s16, %s6280_s16   ;;  %s4288_s15 = sphi %s4342_s15, %s6279_s15  }
   0x7   : > { %p4372_p1 = scmp.eq.s32.totalorder %s3339_s21, 0  ;;  %p3341_p2 = scmp.ge.s32.totalorder %s4308_s20, 1 }
   0x8   : > { %p153_p3 = scmp.lt.s32.totalorder %s4308_s20, 3  ;;  %s4310_s25 = smov [#allocation4]  }
   0x9   : > { %p4380_p4 = por %p4372_p1, %p51_p0  ;;  %s165_s26 = sshll.u32 %s4310_s25, 4  ;;  %s166_s26 = int_to_ptr.vmem [resolvable:$true] %s165_s26 }
   0xa   : > { %p4384_p5 = pnand %p3341_p2, %p153_p3  ;;  %s4311_s28 = smov [#allocation6]  }
   0xb   : > { %s178_s29 = sshll.u32 %s4311_s28, 4  ;;  %s4312_s30 = smov [#allocation7]   ;;  %s179_s29 = int_to_ptr.vmem [resolvable:$true] %s178_s29 }
   0xc   : > { %p3861_p6 = pneg %p4384_p5  ;;  %s191_s5 = sshll.u32 %s4312_s30, 4  ;;  %s192_s5 = int_to_ptr.vmem [resolvable:$true] %s191_s5 }
   0xd   : > { %s4155_s6 = scalar_lea.vmem %s166_s26, 3072  ;;  %p4163_p12 = scmp.lt.s32.totalorder %s166_s26, %s166_s26 }
   0xe   : > { %p4392_p7 = pnand %p3861_p6, %p4372_p1  ;;  %p4156_p9 = scmp.ne.s32.totalorder %s166_s26, %s4155_s6 }
   0xf   : > { %p4164_p13 = scmp.lt.s32.totalorder %s4155_s6, %s4155_s6 }
  0x10   : > { %p4146_p8 = pneg %p4392_p7 }
  0x11   : > { %p4165_p0 = por %p4164_p13, %p4163_p12 }
  0x12   : > { %p4158_p10 = pnand %p4156_p9, %p4146_p8 }
  0x14   : > { %p4159_p11 = pneg %p4158_p10 }
  0x16   : > { %p4166_p2 = pnand %p4165_p0, %p4159_p11 }
  0x18   : > { %4169 = shalt.err (!%p4166_p2)
}
  0x19   : > { %s5977_s7 = smov 384   ;;  %s4314_s8 = smov 24  }
  0x1a   : > { %3864 = dma.hbm_to_vmem [thread:$0]  (!%p4392_p7), %s5973_s1, 3072, %s166_s26, [#allocation5], %s5977_s7, %s5977_s7, %s4314_s8  }
  0x1b   : > { %s4181_s11 = scalar_lea.vmem %s179_s29, 3072  ;;  %p4189_p10 = scmp.lt.s32.totalorder %s179_s29, %s179_s29 }
  0x1c   : > { %p4182_p3 = scmp.ne.s32.totalorder %s179_s29, %s4181_s11  ;;  %p4190_p11 = scmp.lt.s32.totalorder %s4181_s11, %s4181_s11 }
  0x1e   : > { %p4184_p6 = pnand %p4182_p3, %p4146_p8  ;;  %p4191_p12 = por %p4190_p11, %p4189_p10 }
  0x20   : > { %p4185_p9 = pneg %p4184_p6 }
  0x22   : > { %p4192_p13 = pnand %p4191_p12, %p4185_p9 }
  0x24   : > { %4195 = shalt.err (!%p4192_p13)
}
  0x25   : > { %3867 = dma.hbm_to_vmem [thread:$0]  (!%p4392_p7), %s5974_s2, 3072, %s179_s29, [#allocation5], %s5977_s7, %s5977_s7, %s4314_s8  }
  0x26   : > { %s4207_s14 = scalar_lea.vmem %s192_s5, 3072  ;;  %p4215_p6 = scmp.lt.s32.totalorder %s192_s5, %s192_s5 }
  0x27   : > { %p4208_p0 = scmp.ne.s32.totalorder %s192_s5, %s4207_s14  ;;  %p4216_p9 = scmp.lt.s32.totalorder %s4207_s14, %s4207_s14 }
  0x29   : > { %p4210_p2 = pnand %p4208_p0, %p4146_p8  ;;  %p4217_p10 = por %p4216_p9, %p4215_p6 }
  0x2b   : > { %p4211_p3 = pneg %p4210_p2 }
  0x2d   : > { %p4218_p11 = pnand %p4217_p10, %p4211_p3 }
  0x2f   : > { %4221 = shalt.err (!%p4218_p11)
}
  0x30   : > { %3870 = dma.hbm_to_vmem [thread:$0]  (!%p4392_p7), %s5975_s3, 3072, %s192_s5, [#allocation8], %s5977_s7, %s5977_s7, %s4314_s8  }
  0x31   : > { %s38_s25 = sadd.s32 1, %s4296_s17  ;;  %s31_s26 = sadd.s32 1, %s4304_s19 }
  0x32   : > { %p45_p8 = scmp.ne.s32.totalorder %s4296_s17, %s4292_s16  ;;  %p33_p12 = scmp.ge.s32.totalorder %s31_s26, 2 }
  0x33   : > { %p46_p13 = scmp.eq.s32.totalorder %s4308_s20, 0  ;;  %p3878_p0 = scmp.lt.s32.totalorder %s4308_s20, 2 }
  0x34   : > { %s205_s27 = sand.u32 1, %s4296_s17   ;;  %s6285_s26 = smov (%p33_p12, %s31_s26), 0 }
  0x35   : > { %p47_p2 = por %p46_p13, %p45_p8  ;;  %s35_s28 = ssub.s32 %s4304_s19, %s6285_s26 }
  0x36   : > { %s3844_s29 = smul.u32 768, %s205_s27  ;;  %p36_p3 = scmp.eq.s32.totalorder %s35_s28, 0 }
  0x37   : > { %s3845_s30 = smul.u32 12288, %s4304_s19  ;;  %p4443_p6 = pnand %p3878_p0, %p47_p2 }
  0x38   : > { %s4448_s5 = scalar_select %p36_p3, %s4296_s17, %s38_s25  }
  0x39   : > { %s215_s11 = scalar_lea.hbm %s5972_s0, %s3845_s30  ;;  %s209_s12 = scalar_lea.vmem [#allocation2], %s3844_s29 }
  0x3a   : > { %s216_s13 = sshll.u32 %s209_s12, 4  ;;  %s206_s14 = scalar_lea.sflag [#allocation3], %s205_s27  ;;  %s217_s13 = int_to_ptr.vmem [resolvable:$true] %s216_s13 }
  0x3b   : > { %p4224_p7 = pneg %p4443_p6  ;;  %s4235_s15 = scalar_lea.vmem %s217_s13, 12288 }
  0x3c   : > { %p4236_p9 = scmp.ne.s32.totalorder %s217_s13, %s4235_s15  ;;  %s4315_s21 = smov [#allocation2]  }
  0x3d   : > { %s4240_s28 = sshll.u32 %s4315_s21, 4  ;;  %s4241_s28 = int_to_ptr.vmem [resolvable:$false] %s4240_s28 }
  0x3e   : > { %p4238_p10 = pnand %p4236_p9, %p4224_p7  ;;  %s4242_s7 = scalar_lea.vmem %s4241_s28, 24576 }
  0x3f   : > { %p4243_p8 = scmp.lt.s32.totalorder %s217_s13, %s4241_s28  ;;  %p4244_p12 = scmp.lt.s32.totalorder %s4242_s7, %s4235_s15 }
  0x40   : > { %p4239_p11 = pneg %p4238_p10 }
  0x41   : > { %p4245_p13 = por %p4244_p12, %p4243_p8 }
  0x43   : > { %p4246_p0 = pnand %p4245_p13, %p4239_p11 }
  0x45   : > { %4249 = shalt.err (!%p4246_p0)
}
  0x46   : > { %s6070_s25 = smov 384   ;;  %228 = sbr.rel (%p4384_p5) target bundleno = 1272 (0x4f8), region = 36 }
  0x47   : > { %3874 = dma.hbm_to_vmem [thread:$0]  (!%p4443_p6), %s215_s11, 12288, %s217_s13, %s206_s14, %s6070_s25, %s6070_s25, %s4314_s8  }
  0x4b   : > { %s230_s27 = sand.u32 1, %s4292_s16  }
  0x4c   : > { %s3846_s29 = smul.u32 768, %s230_s27  ;;  %s231_s30 = scalar_lea.sflag [#allocation3], %s230_s27 }
  0x4e   : > { %s4463_s9 = scalar_lea.vmem [#allocation2], %s3846_s29 }
  0x4f   : > { %4275 = dma.done.wait (%p4380_p4), %s231_s30, 12288  }
  0x50   : > { %4277 = vsyncadd (%p4380_p4), %s231_s30, 4294955008 }
  0x51   : > { %4279 = dma.done.wait (%p4372_p1), [#allocation5], 6144  }
  0x52   : > { %4281 = vsyncadd (%p4372_p1), [#allocation5], 4294961152 }
  0x53   : > { %4283 = dma.done.wait (%p4372_p1), [#allocation8], 3072  }
  0x54   : > { %4285 = vsyncadd (%p4372_p1), [#allocation8], 4294964224  ;;  %v403_v0 = vld [vmem:[#allocation4 + $0xb0] sm:$0xff]  ;;  %v402_v1 = vld [vmem:[#allocation4 + $0xa8] sm:$0xff]  ;;  %vm1803_vm0 = vcmask 523264   ;;  %p276_p1 = scmp.lt.s32.totalorder %s4300_s18, 1 }
  0x55   : > { %v400_v2 = vld [vmem:[#allocation4 + $0x98] sm:$0xff]  ;;  %421 = vmatprep.subr.mxu0 %v403_v0  ;;  %3828 = vmatprep.subr.mxu1 %v403_v0  ;;  %v399_v3 = vld [vmem:[#allocation4 + $0x90] sm:$0xff]  ;;  %v397_v4 = vld [vmem:[#allocation4 + $0x80] sm:$0xff] }
  0x56   : > { %422 = vmatpush1.xpose.msra.mxu0 %v402_v1  ;;  %3836 = vmatpush1.xpose.msra.mxu1 %v402_v1  ;;  %v4478_v5 = vld [vmem:[%s4463_s9 + $0x8] sm:$0xff]  ;;  %v396_v7 = vld [vmem:[#allocation4 + $0x78] sm:$0xff]  ;;  %v393_v9 = vld [vmem:[#allocation4 + $0x60] sm:$0xff]  ;;  %s6287_s18 = smov (!%p276_p1, %s4300_s18), 1 }
  0x57   : > { %423 = vmatprep.subr.mxu0 %v400_v2  ;;  %3829 = vmatprep.subr.mxu1 %v400_v2  ;;  %v4481_v6 = vld [vmem:[%s4463_s9 + $0x248] sm:$0xff]  ;;  %v391_v10 = vld [vmem:[#allocation4 + $0x50] sm:$0xff]  ;;  %v388_v12 = vld [vmem:[#allocation4 + $0x38] sm:$0xff]  ;;  %s3419_s22 = sshll.u32 %s6287_s18, 8 }
  0x58   : > { %6071 = vst [vmem:[#allocation12_spill] sm:$0xff] %v4481_v6  ;;  %v394_v8 = vld [vmem:[#allocation4 + $0x68] sm:$0xff]  ;;  %469 = vmatprep.mubr.f32.mxu0 %v4478_v5  ;;  %589 = vmatprep.mubr.f32.mxu1 %v4481_v6  ;;  %v387_v13 = vld [vmem:[#allocation4 + $0x30] sm:$0xff]  ;;  %v385_v14 = vld [vmem:[#allocation4 + $0x20] sm:$0xff]  ;;  %s5888_s7 = scalar_lea.vmem %s5976_s4, %s3419_s22 }
  0x59   : > { %v390_v11 = vld [vmem:[#allocation4 + $0x48] sm:$0xff]  ;;  %v384_v15 = vld [vmem:[#allocation4 + $0x18] sm:$0xff]  ;;  %v381_v17 = vld [vmem:[#allocation4] sm:$0xff] }
  0x5a   : > { %424 = vmatpush1.xpose.msra.mxu0 %v399_v3  ;;  %3837 = vmatpush1.xpose.msra.mxu1 %v399_v3  ;;  %v382_v16 = vld [vmem:[#allocation4 + $0x8] sm:$0xff]  ;;  %v404_v18 = vld [vmem:[#allocation4 + $0xb8] sm:$0xff]  ;;  %v4486_v19 = vld [vmem:[%s4463_s9] sm:$0xff] }
  0x5b   : > { %425 = vmatprep.subr.mxu0 %v397_v4  ;;  %3830 = vmatprep.subr.mxu1 %v397_v4  ;;  %v4489_v20 = vld [vmem:[%s4463_s9 + $0x240] sm:$0xff]  ;;  %v878_v24 = vld [vmem:[#allocation6 + $0xb8] sm:$0xff]  ;;  %v398_v29 = vld [vmem:[#allocation4 + $0x88] sm:$0xff] }
  0x5c   : > { %6072 = vst [vmem:[#allocation13_spill] sm:$0xff] %v4489_v20  ;;  %v4492_v21 = vld [vmem:[%s4463_s9 + $0x20] sm:$0xff]  ;;  %v4501_v25 = vld [vmem:[%s4463_s9 + $0x18] sm:$0xff]  ;;  %v4517_v30 = vld [vmem:[%s4463_s9 + $0x30] sm:$0xff] }
  0x5d   : > { %v4495_v22 = vld [vmem:[%s4463_s9 + $0x260] sm:$0xff]  ;;  %v4504_v26 = vld [vmem:[%s4463_s9 + $0x258] sm:$0xff]  ;;  %v4520_v31 = vld [vmem:[%s4463_s9 + $0x270] sm:$0xff] }
  0x5e   : > { %426 = vmatpush1.xpose.msra.mxu0 %v396_v7  ;;  %3838 = vmatpush1.xpose.msra.mxu1 %v396_v7  ;;  %6073 = vst [vmem:[#allocation14_spill] sm:$0xff] %v4495_v22  ;;  %v401_v23 = vld [vmem:[#allocation4 + $0xa0] sm:$0xff]  ;;  %6074 = vst [vmem:[#allocation15_spill] sm:$0xff] %v4504_v26  ;;  %v4508_v27 = vld [vmem:[%s4463_s9 + $0x38] sm:$0xff] }
  0x5f   : > { %427 = vmatprep.subr.mxu0 %v394_v8  ;;  %3831 = vmatprep.subr.mxu1 %v394_v8  ;;  %v4511_v28 = vld [vmem:[%s4463_s9 + $0x278] sm:$0xff]  ;;  %6076 = vst [vmem:[#allocation17_spill] sm:$0xff] %v4520_v31  ;;  %v4524_v32 = vld [vmem:[%s4463_s9 + $0x50] sm:$0xff]  ;;  %v875_v35 = vld [vmem:[#allocation6 + $0xa0] sm:$0xff] }
  0x60   : > { %6075 = vst [vmem:[#allocation16_spill] sm:$0xff] %v4511_v28  ;;  %v4527_v33 = vld [vmem:[%s4463_s9 + $0x290] sm:$0xff]  ;;  %v4533_v36 = vld [vmem:[%s4463_s9 + $0x48] sm:$0xff]  ;;  %v392_v40 = vld [vmem:[#allocation4 + $0x58] sm:$0xff] }
  0x61   : > { %6077 = vst [vmem:[#allocation18_spill] sm:$0xff] %v4527_v33  ;;  %v395_v34 = vld [vmem:[#allocation4 + $0x70] sm:$0xff]  ;;  %v4536_v37 = vld [vmem:[%s4463_s9 + $0x288] sm:$0xff]  ;;  %v4549_v41 = vld [vmem:[%s4463_s9 + $0x60] sm:$0xff] }
  0x62   : > { %428 = vmatpush1.xpose.msra.mxu0 %v393_v9  ;;  %3839 = vmatpush1.xpose.msra.mxu1 %v393_v9  ;;  %6078 = vst [vmem:[#allocation19_spill] sm:$0xff] %v4536_v37  ;;  %v4540_v38 = vld [vmem:[%s4463_s9 + $0x68] sm:$0xff]  ;;  %v4552_v42 = vld [vmem:[%s4463_s9 + $0x2a0] sm:$0xff]  ;;  %v4565_v47 = vld [vmem:[%s4463_s9 + $0x78] sm:$0xff] }
  0x63   : > { %429 = vmatprep.subr.mxu0 %v391_v10  ;;  %3832 = vmatprep.subr.mxu1 %v391_v10  ;;  %v4543_v39 = vld [vmem:[%s4463_s9 + $0x2a8] sm:$0xff]  ;;  %6080 = vst [vmem:[#allocation21_spill] sm:$0xff] %v4552_v42  ;;  %v4556_v43 = vld [vmem:[%s4463_s9 + $0x80] sm:$0xff]  ;;  %v4568_v48 = vld [vmem:[%s4463_s9 + $0x2b8] sm:$0xff] }
  0x64   : > { %6079 = vst [vmem:[#allocation20_spill] sm:$0xff] %v4543_v39  ;;  %v4559_v44 = vld [vmem:[%s4463_s9 + $0x2c0] sm:$0xff]  ;;  %v872_v46 = vld [vmem:[#allocation6 + $0x88] sm:$0xff]  ;;  %6082 = vst [vmem:[#allocation23_spill] sm:$0xff] %v4568_v48 }
  0x65   : > { %6081 = vst [vmem:[#allocation22_spill] sm:$0xff] %v4559_v44  ;;  %v389_v45 = vld [vmem:[#allocation4 + $0x40] sm:$0xff]  ;;  %v4572_v49 = vld [vmem:[%s4463_s9 + $0x98] sm:$0xff]  ;;  %v386_v51 = vld [vmem:[#allocation4 + $0x28] sm:$0xff] }
  0x66   : > { %430 = vmatpush1.xpose.msra.mxu0 %v390_v11  ;;  %3840 = vmatpush1.xpose.msra.mxu1 %v390_v11  ;;  %v4575_v50 = vld [vmem:[%s4463_s9 + $0x2d8] sm:$0xff]  ;;  %v4581_v52 = vld [vmem:[%s4463_s9 + $0x90] sm:$0xff]  ;;  %v4597_v58 = vld [vmem:[%s4463_s9 + $0xa8] sm:$0xff] }
  0x67   : > { %431 = vmatprep.subr.mxu0 %v388_v12  ;;  %3833 = vmatprep.subr.mxu1 %v388_v12  ;;  %6083 = vst [vmem:[#allocation24_spill] sm:$0xff] %v4575_v50  ;;  %v4584_v53 = vld [vmem:[%s4463_s9 + $0x2d0] sm:$0xff]  ;;  %v4600_v59 = vld [vmem:[%s4463_s9 + $0x2e8] sm:$0xff]  ;;  %v4613_v63 = vld [vmem:[%s4463_s9 + $0xc0] sm:$0xff] }
  0x68   : > { %6084 = vst [vmem:[#allocation25_spill] sm:$0xff] %v4584_v53  ;;  %v4588_v54 = vld [vmem:[%s4463_s9 + $0xb0] sm:$0xff]  ;;  %6086 = vst [vmem:[#allocation27_spill] sm:$0xff] %v4600_v59  ;;  %v4604_v60 = vld [vmem:[%s4463_s9 + $0xc8] sm:$0xff] }
  0x69   : > { %v4591_v55 = vld [vmem:[%s4463_s9 + $0x2f0] sm:$0xff]  ;;  %v4616_v0 = vld [vmem:[%s4463_s9 + $0x28] sm:$0xff]  ;;  %v4620_v2 = vld [vmem:[%s4463_s9 + $0xe0] sm:$0xff] }
  0x6a   : > { %432 = vmatpush1.xpose.msra.mxu0 %v387_v13  ;;  %3841 = vmatpush1.xpose.msra.mxu1 %v387_v13  ;;  %6085 = vst [vmem:[#allocation26_spill] sm:$0xff] %v4591_v55  ;;  %v383_v56 = vld [vmem:[#allocation4 + $0x10] sm:$0xff]  ;;  %6087 = vst [vmem:[#allocation28_spill] sm:$0xff] %v4616_v0  ;;  %v876_v1 = vld [vmem:[#allocation6 + $0xa8] sm:$0xff] }
  0x6b   : > { %433 = vmatprep.subr.mxu0 %v385_v14  ;;  %3834 = vmatprep.subr.mxu1 %v385_v14  ;;  %v869_v57 = vld [vmem:[#allocation6 + $0x70] sm:$0xff]  ;;  %v4623_v3 = vld [vmem:[%s4463_s9 + $0x40] sm:$0xff]  ;;  %v874_v4 = vld [vmem:[#allocation6 + $0x98] sm:$0xff] }
  0x6c   : > { %v4607_v61 = vld [vmem:[%s4463_s9 + $0x10] sm:$0xff]  ;;  %v866_v7 = vld [vmem:[#allocation6 + $0x58] sm:$0xff]  ;;  %v871_v13 = vld [vmem:[#allocation6 + $0x80] sm:$0xff] }
  0x6d   : > { %v877_v62 = vld [vmem:[#allocation6 + $0xb0] sm:$0xff]  ;;  %v4629_v8 = vld [vmem:[%s4463_s9 + $0xd8] sm:$0xff]  ;;  %v863_v14 = vld [vmem:[#allocation6 + $0x40] sm:$0xff] }
  0x6e   : > { %434 = vmatpush1.xpose.msra.mxu0 %v384_v15  ;;  %3842 = vmatpush1.xpose.msra.mxu1 %v384_v15  ;;  %v4632_v9 = vld [vmem:[%s4463_s9 + $0x58] sm:$0xff]  ;;  %v4639_v11 = vld [vmem:[%s4463_s9 + $0x70] sm:$0xff]  ;;  %v4793_v6 = vld [vmem:[%s4463_s9 + $0x1c8] sm:$0xff] }
  0x6f   : > { %435 = vmatprep.subr.mxu0 %v382_v16  ;;  %3835 = vmatprep.subr.mxu1 %v382_v16  ;;  %v4636_v10 = vld [vmem:[%s4463_s9 + $0xf8] sm:$0xff]  ;;  %v873_v12 = vld [vmem:[#allocation6 + $0x90] sm:$0xff]  ;;  %v4649_v16 = vld [vmem:[%s4463_s9 + $0x88] sm:$0xff]  ;;  %6101 = vst [vmem:[#allocation42_spill] sm:$0xff] %v4793_v6 }
  0x70   : > { %v4646_v15 = vld [vmem:[%s4463_s9 + $0xf0] sm:$0xff] }
  0x72   : > { %436 = vmatpush1.xpose.msra.mxu0 %v381_v17  ;;  %3843 = vmatpush1.xpose.msra.mxu1 %v381_v17  ;;  %v4652_v17 = vld [vmem:[%s4463_s9 + $0x110] sm:$0xff] }
  0x73   : > { %3636 = vmatprep.subr.mxu1 %v404_v18  ;;  %3700 = vmatprep.subr.mxu0 %v878_v24 }
  0x75   : > { %470 = vmatmul.mubr.f32.vlgmr.msra.gmra.mxu0 %v4486_v19  ;;  %590 = vmatmul.mubr.f32.vlgmr.msra.gmra.mxu1 %v4489_v20  ;;  %v4786_v20 = vld [vmem:[%s4463_s9 + $0x220] sm:$0xff] }
  0x76   : > { %3637 = vmatpush3.xpose.msra.mxu1 %v404_v18  ;;  %474 = vmatprep.mubr.f32.mxu0 %v4492_v21  ;;  %v4655_v18 = vld [vmem:[%s4463_s9 + $0xa0] sm:$0xff]  ;;  %6100 = vst [vmem:[#allocation41_spill] sm:$0xff] %v4786_v20 }
  0x77   : > { %594 = vmatprep.mubr.f32.mxu1 %v4495_v22  ;;  %3638 = vmatprep.subr.mxu1 %v401_v23  ;;  %v4783_v22 = vld [vmem:[%s4463_s9 + $0x1d0] sm:$0xff] }
  0x78   : > { %3701 = vmatpush3.xpose.msra.mxu0 %v878_v24  ;;  %v868_v24 = vld [vmem:[#allocation6 + $0x68] sm:$0xff]  ;;  %6099 = vst [vmem:[#allocation40_spill] sm:$0xff] %v4783_v22 }
  0x79   : > { %475 = vmatmul.mubr.f32.gmra.mxu0 %v4501_v25  ;;  %595 = vmatmul.mubr.f32.gmra.mxu1 %v4504_v26  ;;  %v4780_v26 = vld [vmem:[%s4463_s9 + $0x208] sm:$0xff] }
  0x7a   : > { %3639 = vmatpush3.xpose.msra.mxu1 %v401_v23  ;;  %479 = vmatprep.mubr.f32.mxu0 %v4508_v27  ;;  %v870_v23 = vld [vmem:[#allocation6 + $0x78] sm:$0xff] }
  0x7b   : > { %599 = vmatprep.mubr.f32.mxu1 %v4511_v28  ;;  %3640 = vmatprep.subr.mxu1 %v398_v29  ;;  %v4777_v28 = vld [vmem:[%s4463_s9 + $0x1b0] sm:$0xff] }
  0x7c   : > { %3702 = vmatprep.subr.mxu0 %v875_v35  ;;  %6098 = vst [vmem:[#allocation39_spill] sm:$0xff] %v4777_v28 }
  0x7d   : > { %480 = vmatmul.mubr.f32.gmra.mxu0 %v4517_v30  ;;  %600 = vmatmul.mubr.f32.gmra.mxu1 %v4520_v31  ;;  %v4766_v31 = vld [vmem:[%s4463_s9 + $0x1b8] sm:$0xff] }
  0x7e   : > { %3641 = vmatpush3.xpose.msra.mxu1 %v398_v29  ;;  %484 = vmatprep.mubr.f32.mxu0 %v4524_v32  ;;  %v860_v29 = vld [vmem:[#allocation6 + $0x28] sm:$0xff]  ;;  %6096 = vst [vmem:[#allocation37_spill] sm:$0xff] %v4766_v31 }
  0x7f   : > { %604 = vmatprep.mubr.f32.mxu1 %v4527_v33  ;;  %3642 = vmatprep.subr.mxu1 %v395_v34  ;;  %v4763_v33 = vld [vmem:[%s4463_s9 + $0x1d8] sm:$0xff] }
  0x80   : > { %3703 = vmatpush3.xpose.msra.mxu0 %v875_v35  ;;  %v4665_v35 = vld [vmem:[%s4463_s9 + $0xb8] sm:$0xff] }
  0x81   : > { %485 = vmatmul.mubr.f32.gmra.mxu0 %v4533_v36  ;;  %605 = vmatmul.mubr.f32.gmra.mxu1 %v4536_v37  ;;  %v4760_v37 = vld [vmem:[%s4463_s9 + $0x198] sm:$0xff] }
  0x82   : > { %3643 = vmatpush3.xpose.msra.mxu1 %v395_v34  ;;  %489 = vmatprep.mubr.f32.mxu0 %v4540_v38  ;;  %v4662_v34 = vld [vmem:[%s4463_s9 + $0x108] sm:$0xff]  ;;  %6095 = vst [vmem:[#allocation36_spill] sm:$0xff] %v4760_v37 }
  0x83   : > { %609 = vmatprep.mubr.f32.mxu1 %v4543_v39  ;;  %3644 = vmatprep.subr.mxu1 %v392_v40  ;;  %v4748_v39 = vld [vmem:[%s4463_s9 + $0x1a0] sm:$0xff] }
  0x84   : > { %3704 = vmatprep.subr.mxu0 %v872_v46  ;;  %6094 = vst [vmem:[#allocation35_spill] sm:$0xff] %v4748_v39 }
  0x85   : > { %490 = vmatmul.mubr.f32.gmra.mxu0 %v4549_v41  ;;  %610 = vmatmul.mubr.f32.gmra.mxu1 %v4552_v42  ;;  %v4745_v42 = vld [vmem:[%s4463_s9 + $0x1a8] sm:$0xff] }
  0x86   : > { %3645 = vmatpush3.xpose.msra.mxu1 %v392_v40  ;;  %494 = vmatprep.mubr.f32.mxu0 %v4556_v43  ;;  %v4668_v40 = vld [vmem:[%s4463_s9 + $0x128] sm:$0xff] }
  0x87   : > { %614 = vmatprep.mubr.f32.mxu1 %v4559_v44  ;;  %3646 = vmatprep.subr.mxu1 %v389_v45  ;;  %v4742_v44 = vld [vmem:[%s4463_s9 + $0x180] sm:$0xff] }
  0x88   : > { %3705 = vmatpush3.xpose.msra.mxu0 %v872_v46  ;;  %v867_v46 = vld [vmem:[#allocation6 + $0x60] sm:$0xff]  ;;  %6093 = vst [vmem:[#allocation34_spill] sm:$0xff] %v4742_v44 }
  0x89   : > { %495 = vmatmul.mubr.f32.gmra.mxu0 %v4565_v47  ;;  %615 = vmatmul.mubr.f32.gmra.mxu1 %v4568_v48  ;;  %v855_v48 = vld [vmem:[#allocation6] sm:$0xff] }
  0x8a   : > { %3647 = vmatpush3.xpose.msra.mxu1 %v389_v45  ;;  %499 = vmatprep.mubr.f32.mxu0 %v4572_v49  ;;  %v4671_v45 = vld [vmem:[%s4463_s9 + $0xd0] sm:$0xff] }
  0x8b   : > { %619 = vmatprep.mubr.f32.mxu1 %v4575_v50  ;;  %3648 = vmatprep.subr.mxu1 %v386_v51  ;;  %v4729_v50 = vld [vmem:[%s4463_s9 + $0x178] sm:$0xff] }
  0x8c   : > { %3706 = vmatprep.subr.mxu0 %v869_v57 }
  0x8d   : > { %500 = vmatmul.mubr.f32.gmra.mxu0 %v4581_v52  ;;  %620 = vmatmul.mubr.f32.gmra.mxu1 %v4584_v53  ;;  %v4726_v53 = vld [vmem:[%s4463_s9 + $0x168] sm:$0xff] }
  0x8e   : > { %3649 = vmatpush3.xpose.msra.mxu1 %v386_v51  ;;  %504 = vmatprep.mubr.f32.mxu0 %v4588_v54  ;;  %v865_v51 = vld [vmem:[#allocation6 + $0x50] sm:$0xff]  ;;  %6091 = vst [vmem:[#allocation32_spill] sm:$0xff] %v4726_v53 }
  0x8f   : > { %624 = vmatprep.mubr.f32.mxu1 %v4591_v55  ;;  %3650 = vmatprep.subr.mxu1 %v383_v56  ;;  %v856_v55 = vld [vmem:[#allocation6 + $0x8] sm:$0xff] }
  0x90   : > { %3707 = vmatpush3.xpose.msra.mxu0 %v869_v57  ;;  %v4678_v57 = vld [vmem:[%s4463_s9 + $0x120] sm:$0xff] }
  0x91   : > { %505 = vmatmul.mubr.f32.gmra.mxu0 %v4597_v58  ;;  %625 = vmatmul.mubr.f32.gmra.mxu1 %v4600_v59  ;;  %v4713_v59 = vld [vmem:[%s4463_s9 + $0x148] sm:$0xff] }
  0x92   : > { %3651 = vmatpush3.xpose.msra.mxu1 %v383_v56  ;;  %509 = vmatprep.mubr.f32.mxu0 %v4604_v60  ;;  %v857_v56 = vld [vmem:[#allocation6 + $0x10] sm:$0xff] }
  0x93   : > { %3652 = vmatprep.mubr.f32.mxu1 %v4607_v61  ;;  %895 = vmatprep.subr.mxu1 %v877_v62  ;;  %v4681_v62 = vld [vmem:[%s4463_s9 + $0xe8] sm:$0xff] }
  0x94   : > { %3708 = vmatprep.subr.mxu0 %v866_v7 }
  0x95   : > { %510 = vmatmul.mubr.f32.gmra.mxu0 %v4613_v63  ;;  %3653 = vmatmul.mubr.f32.vlgmr.msra.gmra.mxu1 %v4616_v0 }
  0x96   : > { %896 = vmatpush1.xpose.msra.mxu1 %v876_v1  ;;  %514 = vmatprep.mubr.f32.mxu0 %v4620_v2  ;;  %v4684_v1 = vld [vmem:[%s4463_s9 + $0x140] sm:$0xff] }
  0x97   : > { %3655 = vmatprep.mubr.f32.mxu1 %v4623_v3  ;;  %897 = vmatprep.subr.mxu1 %v874_v4  ;;  %v4687_v4 = vld [vmem:[%s4463_s9 + $0x100] sm:$0xff] }
  0x98   : > { %3709 = vmatpush3.xpose.msra.mxu0 %v866_v7  ;;  %v864_v7 = vld [vmem:[#allocation6 + $0x48] sm:$0xff] }
  0x99   : > { %515 = vmatmul.mubr.f32.gmra.mxu0 %v4629_v8  ;;  %3656 = vmatmul.mubr.f32.gmra.mxu1 %v4632_v9 }
  0x9a   : > { %519 = vmatprep.mubr.f32.mxu0 %v4636_v10  ;;  %3658 = vmatprep.mubr.f32.mxu1 %v4639_v11 }
  0x9b   : > { %898 = vmatpush1.xpose.msra.mxu1 %v873_v12  ;;  %3710 = vmatprep.subr.mxu0 %v863_v14  ;;  %v862_v12 = vld [vmem:[#allocation6 + $0x38] sm:$0xff] }
  0x9c   : > { %899 = vmatprep.subr.mxu1 %v871_v13  ;;  %3711 = vmatpush3.xpose.msra.mxu0 %v863_v14  ;;  %v4694_v13 = vld [vmem:[%s4463_s9 + $0x138] sm:$0xff] }
  0x9d   : > { %520 = vmatmul.mubr.f32.gmra.mxu0 %v4646_v15  ;;  %3659 = vmatmul.mubr.f32.gmra.mxu1 %v4649_v16  ;;  %v4697_v14 = vld [vmem:[%s4463_s9 + $0x118] sm:$0xff] }
  0x9e   : > { %524 = vmatprep.mubr.f32.mxu0 %v4652_v17  ;;  %3661 = vmatprep.mubr.f32.mxu1 %v4655_v18 }
  0x9f   : > { %900 = vmatpush1.xpose.msra.mxu1 %v870_v23  ;;  %3712 = vmatprep.subr.mxu0 %v860_v29  ;;  %v4700_v23 = vld [vmem:[%s4463_s9 + $0x158] sm:$0xff] }
  0xa0   : > { %901 = vmatprep.subr.mxu1 %v868_v24  ;;  %3713 = vmatpush3.xpose.msra.mxu0 %v860_v29  ;;  %6088 = vst [vmem:[#allocation29_spill] sm:$0xff] %v4700_v23  ;;  %v4703_v24 = vld [vmem:[%s4463_s9 + $0x130] sm:$0xff] }
  0xa1   : > { %525 = vmatmul.mubr.f32.gmra.mxu0 %v4662_v34  ;;  %3662 = vmatmul.mubr.f32.gmra.mxu1 %v4665_v35  ;;  %v861_v29 = vld [vmem:[#allocation6 + $0x30] sm:$0xff] }
  0xa2   : > { %529 = vmatprep.mubr.f32.mxu0 %v4668_v40  ;;  %3664 = vmatprep.mubr.f32.mxu1 %v4671_v45 }
  0xa3   : > { %902 = vmatpush1.xpose.msra.mxu1 %v867_v46  ;;  %3714 = vmatprep.subr.mxu0 %v857_v56  ;;  %v859_v46 = vld [vmem:[#allocation6 + $0x20] sm:$0xff] }
  0xa4   : > { %903 = vmatprep.subr.mxu1 %v865_v51  ;;  %3715 = vmatpush3.xpose.msra.mxu0 %v857_v56  ;;  %v4710_v51 = vld [vmem:[%s4463_s9 + $0x150] sm:$0xff] }
  0xa5   : > { %530 = vmatmul.mubr.f32.gmra.mxu0 %v4678_v57  ;;  %3665 = vmatmul.mubr.f32.gmra.mxu1 %v4681_v62  ;;  %6089 = vst [vmem:[#allocation30_spill] sm:$0xff] %v4710_v51  ;;  %v4716_v56 = vld [vmem:[%s4463_s9 + $0x170] sm:$0xff] }
  0xa6   : > { %534 = vmatprep.mubr.f32.mxu0 %v4684_v1  ;;  %3667 = vmatprep.mubr.f32.mxu1 %v4687_v4  ;;  %6090 = vst [vmem:[#allocation31_spill] sm:$0xff] %v4716_v56 }
  0xa7   : > { %904 = vmatpush1.xpose.msra.mxu1 %v864_v7  ;;  %v4719_v7 = vld [vmem:[%s4463_s9 + $0x160] sm:$0xff] }
  0xa8   : > { %905 = vmatprep.subr.mxu1 %v862_v12  ;;  %v858_v12 = vld [vmem:[#allocation6 + $0x18] sm:$0xff] }
  0xa9   : > { %535 = vmatmul.mubr.f32.gmra.mxu0 %v4694_v13  ;;  %3668 = vmatmul.mubr.f32.gmra.mxu1 %v4697_v14 }
  0xaa   : > { %539 = vmatprep.mubr.f32.mxu0 %v4700_v23  ;;  %3670 = vmatprep.mubr.f32.mxu1 %v4703_v24  ;;  %v4850_v23 = vld [vmem:[%s4463_s9 + $0x2e0] sm:$0xff] }
  0xab   : > { %906 = vmatpush1.xpose.msra.mxu1 %v861_v29  ;;  %v4732_v29 = vld [vmem:[%s4463_s9 + $0x188] sm:$0xff]  ;;  %6115 = vst [vmem:[#allocation56_spill] sm:$0xff] %v4850_v23 }
  0xac   : > { %907 = vmatprep.subr.mxu1 %v859_v46  ;;  %6092 = vst [vmem:[#allocation33_spill] sm:$0xff] %v4732_v29  ;;  %v4735_v46 = vld [vmem:[%s4463_s9 + $0x190] sm:$0xff] }
  0xad   : > { %540 = vmatmul.mubr.f32.gmra.mxu0 %v4710_v51  ;;  %3671 = vmatmul.mubr.f32.gmra.mxu1 %v4713_v59  ;;  %v4847_v51 = vld [vmem:[%s4463_s9 + $0x230] sm:$0xff] }
  0xae   : > { %544 = vmatprep.mubr.f32.mxu0 %v4716_v56  ;;  %3673 = vmatprep.mubr.f32.mxu1 %v4719_v7  ;;  %v4834_v56 = vld [vmem:[%s4463_s9 + $0x2b0] sm:$0xff] }
  0xaf   : > { %908 = vmatpush1.xpose.msra.mxu1 %v858_v12  ;;  %v4753_v12 = vld [vmem:[#allocation7 + $0xb8] sm:$0xff]  ;;  %6112 = vst [vmem:[#allocation53_spill] sm:$0xff] %v4834_v56 }
  0xb0   : > { %909 = vmatprep.subr.mxu1 %v856_v55  ;;  %v4751_v55 = vld [vmem:[%s4463_s9 + $0x1c0] sm:$0xff] }
  0xb1   : > { %545 = vmatmul.mubr.f32.gmra.mxu0 %v4726_v53  ;;  %3674 = vmatmul.mubr.f32.gmra.mxu1 %v4729_v50  ;;  %v4831_v53 = vld [vmem:[%s4463_s9 + $0x218] sm:$0xff] }
  0xb2   : > { %549 = vmatprep.mubr.f32.mxu0 %v4732_v29  ;;  %3676 = vmatprep.mubr.f32.mxu1 %v4735_v46  ;;  %v4818_v29 = vld [vmem:[%s4463_s9 + $0x280] sm:$0xff]  ;;  %6111 = vst [vmem:[#allocation52_spill] sm:$0xff] %v4831_v53 }
  0xb3   : > { %910 = vmatpush1.xpose.msra.mxu1 %v855_v48  ;;  %v4769_v48 = vld [vmem:[%s4463_s9 + $0x1f0] sm:$0xff]  ;;  %6108 = vst [vmem:[#allocation49_spill] sm:$0xff] %v4818_v29 }
  0xb4   : > { %6097 = vst [vmem:[#allocation38_spill] sm:$0xff] %v4769_v48  ;;  %3764 = vmatprep.subr.mxu1 %v4753_v12 }
  0xb5   : > { %550 = vmatmul.mubr.f32.gmra.mxu0 %v4742_v44  ;;  %3677 = vmatmul.mubr.f32.gmra.mxu1 %v4745_v42  ;;  %v4815_v44 = vld [vmem:[%s4463_s9 + $0x200] sm:$0xff] }
  0xb6   : > { %554 = vmatprep.mubr.f32.mxu0 %v4748_v39  ;;  %3679 = vmatprep.mubr.f32.mxu1 %v4751_v55  ;;  %v4802_v39 = vld [vmem:[%s4463_s9 + $0x250] sm:$0xff]  ;;  %6107 = vst [vmem:[#allocation48_spill] sm:$0xff] %v4815_v44 }
  0xb7   : > { %6104 = vst [vmem:[#allocation45_spill] sm:$0xff] %v4802_v39 }
  0xb9   : > { %555 = vmatmul.mubr.f32.gmra.mxu0 %v4760_v37  ;;  %3680 = vmatmul.mubr.f32.gmra.mxu1 %v4763_v33  ;;  %v4799_v37 = vld [vmem:[%s4463_s9 + $0x1e8] sm:$0xff] }
  0xba   : > { %559 = vmatprep.mubr.f32.mxu0 %v4766_v31  ;;  %3682 = vmatprep.mubr.f32.mxu1 %v4769_v48  ;;  %v4796_v31 = vld [vmem:[%s4463_s9 + $0x238] sm:$0xff]  ;;  %6103 = vst [vmem:[#allocation44_spill] sm:$0xff] %v4799_v37 }
  0xbb   : > { %6102 = vst [vmem:[#allocation43_spill] sm:$0xff] %v4796_v31 }
  0xbd   : > { %560 = vmatmul.mubr.f32.gmra.mxu0 %v4777_v28  ;;  %3683 = vmatmul.mubr.f32.gmra.mxu1 %v4780_v26  ;;  %v4812_v28 = vld [vmem:[%s4463_s9 + $0x268] sm:$0xff] }
  0xbe   : > { %564 = vmatprep.mubr.f32.mxu0 %v4783_v22  ;;  %3685 = vmatprep.mubr.f32.mxu1 %v4786_v20  ;;  %v4809_v22 = vld [vmem:[%s4463_s9 + $0x1e0] sm:$0xff]  ;;  %6106 = vst [vmem:[#allocation47_spill] sm:$0xff] %v4812_v28 }
  0xbf   : > { %6105 = vst [vmem:[#allocation46_spill] sm:$0xff] %v4809_v22 }
  0xc1   : > { %565 = vmatmul.mubr.f32.gmra.mxu0 %v4793_v6  ;;  %3686 = vmatmul.mubr.f32.gmra.mxu1 %v4796_v31  ;;  %v4828_v6 = vld [vmem:[%s4463_s9 + $0x298] sm:$0xff] }
  0xc2   : > { %569 = vmatprep.mubr.f32.mxu0 %v4799_v37  ;;  %3688 = vmatprep.mubr.f32.mxu1 %v4802_v39  ;;  %v4825_v37 = vld [vmem:[%s4463_s9 + $0x1f8] sm:$0xff]  ;;  %6110 = vst [vmem:[#allocation51_spill] sm:$0xff] %v4828_v6 }
  0xc3   : > { %6109 = vst [vmem:[#allocation50_spill] sm:$0xff] %v4825_v37 }
  0xc5   : > { %570 = vmatmul.mubr.f32.gmra.mxu0 %v4809_v22  ;;  %3689 = vmatmul.mubr.f32.gmra.mxu1 %v4812_v28  ;;  %v4844_v22 = vld [vmem:[%s4463_s9 + $0x2c8] sm:$0xff] }
  0xc6   : > { %574 = vmatprep.mubr.f32.mxu0 %v4815_v44  ;;  %3691 = vmatprep.mubr.f32.mxu1 %v4818_v29  ;;  %v4841_v44 = vld [vmem:[%s4463_s9 + $0x210] sm:$0xff]  ;;  %6114 = vst [vmem:[#allocation55_spill] sm:$0xff] %v4844_v22 }
  0xc7   : > { %6113 = vst [vmem:[#allocation54_spill] sm:$0xff] %v4841_v44 }
  0xc9   : > { %575 = vmatmul.mubr.f32.gmra.mxu0 %v4825_v37  ;;  %3692 = vmatmul.mubr.f32.gmra.mxu1 %v4828_v6  ;;  %v4857_v37 = vld [vmem:[%s4463_s9 + $0x228] sm:$0xff] }
  0xca   : > { %579 = vmatprep.mubr.f32.mxu0 %v4831_v53  ;;  %3694 = vmatprep.mubr.f32.mxu1 %v4834_v56  ;;  %6116 = vst [vmem:[#allocation57_spill] sm:$0xff] %v4857_v37  ;;  %v4860_v53 = vld [vmem:[%s4463_s9 + $0x2f8] sm:$0xff] }
  0xcb   : > { %6117 = vst [vmem:[#allocation58_spill] sm:$0xff] %v4860_v53 }
  0xcd   : > { %580 = vmatmul.mubr.f32.gmra.mxu0 %v4841_v44  ;;  %3695 = vmatmul.mubr.f32.gmra.mxu1 %v4844_v22  ;;  %v1349_v44 = vld [vmem:[#allocation7 + $0xa0] sm:$0xff] }
  0xce   : > { %584 = vmatprep.mubr.f32.mxu0 %v4847_v51  ;;  %3697 = vmatprep.mubr.f32.mxu1 %v4850_v23 }
  0xd1   : > { %585 = vmatmul.mubr.f32.gmra.mxu0 %v4857_v37  ;;  %3698 = vmatmul.mubr.f32.gmra.mxu1 %v4860_v53  ;;  %v1346_v37 = vld [vmem:[#allocation7 + $0x88] sm:$0xff] }
  0xd2   : > { %943 = vmatprep.mubr.f32.mxu1 %v4478_v5  ;;  %3716 = vmatprep.mubr.f32.mxu0 %v4607_v61 }
  0xd5   : > { %944 = vmatmul.mubr.f32.vlgmr.msra.gmra.mxu1 %v4486_v19  ;;  %3717 = vmatmul.mubr.f32.vlgmr.msra.gmra.mxu0 %v4616_v0  ;;  %v1343_v0 = vld [vmem:[#allocation7 + $0x70] sm:$0xff] }
  0xd6   : > { %948 = vmatprep.mubr.f32.mxu1 %v4492_v21  ;;  %3719 = vmatprep.mubr.f32.mxu0 %v4623_v3 }
  0xd7   : > { %3765 = vmatpush3.xpose.msra.mxu1 %v4753_v12  ;;  %v1340_v12 = vld [vmem:[#allocation7 + $0x58] sm:$0xff] }
  0xd8   : > { %3766 = vmatprep.subr.mxu1 %v1349_v44 }
  0xd9   : > { %949 = vmatmul.mubr.f32.gmra.mxu1 %v4501_v25  ;;  %3720 = vmatmul.mubr.f32.gmra.mxu0 %v4632_v9 }
  0xda   : > { %953 = vmatprep.mubr.f32.mxu1 %v4508_v27  ;;  %3722 = vmatprep.mubr.f32.mxu0 %v4639_v11 }
  0xdb   : > { %3767 = vmatpush3.xpose.msra.mxu1 %v1349_v44  ;;  %v1337_v44 = vld [vmem:[#allocation7 + $0x40] sm:$0xff] }
  0xdc   : > { %3768 = vmatprep.subr.mxu1 %v1346_v37 }
  0xdd   : > { %954 = vmatmul.mubr.f32.gmra.mxu1 %v4517_v30  ;;  %3723 = vmatmul.mubr.f32.gmra.mxu0 %v4649_v16 }
  0xde   : > { %958 = vmatprep.mubr.f32.mxu1 %v4524_v32  ;;  %3725 = vmatprep.mubr.f32.mxu0 %v4655_v18 }
  0xdf   : > { %3769 = vmatpush3.xpose.msra.mxu1 %v1346_v37  ;;  %v1334_v37 = vld [vmem:[#allocation7 + $0x28] sm:$0xff] }
  0xe0   : > { %3770 = vmatprep.subr.mxu1 %v1343_v0 }
  0xe1   : > { %959 = vmatmul.mubr.f32.gmra.mxu1 %v4533_v36  ;;  %3726 = vmatmul.mubr.f32.gmra.mxu0 %v4665_v35 }
  0xe2   : > { %963 = vmatprep.mubr.f32.mxu1 %v4540_v38  ;;  %3728 = vmatprep.mubr.f32.mxu0 %v4671_v45 }
  0xe3   : > { %3771 = vmatpush3.xpose.msra.mxu1 %v1343_v0  ;;  %v1331_v0 = vld [vmem:[#allocation7 + $0x10] sm:$0xff] }
  0xe4   : > { %3772 = vmatprep.subr.mxu1 %v1340_v12 }
  0xe5   : > { %964 = vmatmul.mubr.f32.gmra.mxu1 %v4549_v41  ;;  %3729 = vmatmul.mubr.f32.gmra.mxu0 %v4681_v62 }
  0xe6   : > { %968 = vmatprep.mubr.f32.mxu1 %v4556_v43  ;;  %3731 = vmatprep.mubr.f32.mxu0 %v4687_v4 }
  0xe7   : > { %3773 = vmatpush3.xpose.msra.mxu1 %v1340_v12  ;;  %v1351_v12 = vld [vmem:[#allocation7 + $0xb0] sm:$0xff] }
  0xe8   : > { %3774 = vmatprep.subr.mxu1 %v1337_v44  ;;  %1369 = vmatprep.subr.mxu0 %v1351_v12  ;;  %v1344_v12 = vld [vmem:[#allocation7 + $0x78] sm:$0xff] }
  0xe9   : > { %969 = vmatmul.mubr.f32.gmra.mxu1 %v4565_v47  ;;  %3732 = vmatmul.mubr.f32.gmra.mxu0 %v4697_v14 }
  0xea   : > { %973 = vmatprep.mubr.f32.mxu1 %v4572_v49  ;;  %3734 = vmatprep.mubr.f32.mxu0 %v4703_v24 }
  0xeb   : > { %3775 = vmatpush3.xpose.msra.mxu1 %v1337_v44  ;;  %v1350_v44 = vld [vmem:[#allocation7 + $0xa8] sm:$0xff] }
  0xec   : > { %3776 = vmatprep.subr.mxu1 %v1334_v37  ;;  %1370 = vmatpush1.xpose.msra.mxu0 %v1350_v44  ;;  %v1342_v44 = vld [vmem:[#allocation7 + $0x68] sm:$0xff] }
  0xed   : > { %974 = vmatmul.mubr.f32.gmra.mxu1 %v4581_v52  ;;  %3735 = vmatmul.mubr.f32.gmra.mxu0 %v4713_v59 }
  0xee   : > { %978 = vmatprep.mubr.f32.mxu1 %v4588_v54  ;;  %3737 = vmatprep.mubr.f32.mxu0 %v4719_v7 }
  0xef   : > { %3777 = vmatpush3.xpose.msra.mxu1 %v1334_v37  ;;  %v1348_v37 = vld [vmem:[#allocation7 + $0x98] sm:$0xff] }
  0xf0   : > { %3778 = vmatprep.subr.mxu1 %v1331_v0  ;;  %1371 = vmatprep.subr.mxu0 %v1348_v37  ;;  %v1341_v37 = vld [vmem:[#allocation7 + $0x60] sm:$0xff] }
  0xf1   : > { %979 = vmatmul.mubr.f32.gmra.mxu1 %v4597_v58  ;;  %3738 = vmatmul.mubr.f32.gmra.mxu0 %v4729_v50 }
  0xf2   : > { %983 = vmatprep.mubr.f32.mxu1 %v4604_v60  ;;  %3740 = vmatprep.mubr.f32.mxu0 %v4735_v46 }
  0xf3   : > { %3779 = vmatpush3.xpose.msra.mxu1 %v1331_v0  ;;  %v1347_v0 = vld [vmem:[#allocation7 + $0x90] sm:$0xff] }
  0xf4   : > { %1372 = vmatpush1.xpose.msra.mxu0 %v1347_v0  ;;  %v1339_v0 = vld [vmem:[#allocation7 + $0x50] sm:$0xff] }
  0xf5   : > { %984 = vmatmul.mubr.f32.gmra.mxu1 %v4613_v63  ;;  %3741 = vmatmul.mubr.f32.gmra.mxu0 %v4745_v42 }
  0xf6   : > { %988 = vmatprep.mubr.f32.mxu1 %v4620_v2  ;;  %3743 = vmatprep.mubr.f32.mxu0 %v4751_v55 }
  0xf9   : > { %989 = vmatmul.mubr.f32.gmra.mxu1 %v4629_v8  ;;  %3744 = vmatmul.mubr.f32.gmra.mxu0 %v4763_v33 }
  0xfa   : > { %993 = vmatprep.mubr.f32.mxu1 %v4636_v10  ;;  %3746 = vmatprep.mubr.f32.mxu0 %v4769_v48  ;;  %v1345_v48 = vld [vmem:[#allocation7 + $0x80] sm:$0xff] }
  0xfb   : > { %1373 = vmatprep.subr.mxu0 %v1345_v48  ;;  %v1338_v48 = vld [vmem:[#allocation7 + $0x48] sm:$0xff] }
  0xfc   : > { %1374 = vmatpush1.xpose.msra.mxu0 %v1344_v12  ;;  %v6119_v12 = vld [vmem:[#allocation30_spill] sm:$0xff] }
  0xfd   : > { %994 = vmatmul.mubr.f32.gmra.mxu1 %v4646_v15  ;;  %3747 = vmatmul.mubr.f32.gmra.mxu0 %v4780_v26 }
  0xfe   : > { %998 = vmatprep.mubr.f32.mxu1 %v4652_v17  ;;  %3749 = vmatprep.mubr.f32.mxu0 %v4786_v20 }
  0xff   : > { %1375 = vmatprep.subr.mxu0 %v1342_v44  ;;  %v1335_v44 = vld [vmem:[#allocation7 + $0x30] sm:$0xff] }
 0x100   : > { %1376 = vmatpush1.xpose.msra.mxu0 %v1341_v37  ;;  %v6121_v37 = vld [vmem:[#allocation32_spill] sm:$0xff] }
 0x101   : > { %999 = vmatmul.mubr.f32.gmra.mxu1 %v4662_v34  ;;  %3750 = vmatmul.mubr.f32.gmra.mxu0 %v4796_v31  ;;  %v6124_v31 = vld [vmem:[#allocation35_spill] sm:$0xff] }
 0x102   : > { %1003 = vmatprep.mubr.f32.mxu1 %v4668_v40  ;;  %3752 = vmatprep.mubr.f32.mxu0 %v4802_v39  ;;  %v6118_v39 = vld [vmem:[#allocation29_spill] sm:$0xff] }
 0x103   : > { %1377 = vmatprep.subr.mxu0 %v1339_v0  ;;  %v1332_v0 = vld [vmem:[#allocation7 + $0x18] sm:$0xff] }
 0x104   : > { %1378 = vmatpush1.xpose.msra.mxu0 %v1338_v48  ;;  %v6123_v48 = vld [vmem:[#allocation34_spill] sm:$0xff] }
 0x105   : > { %1004 = vmatmul.mubr.f32.gmra.mxu1 %v4678_v57  ;;  %3753 = vmatmul.mubr.f32.gmra.mxu0 %v4812_v28  ;;  %v6120_v28 = vld [vmem:[#allocation31_spill] sm:$0xff] }
 0x106   : > { %1008 = vmatprep.mubr.f32.mxu1 %v4684_v1  ;;  %3755 = vmatprep.mubr.f32.mxu0 %v4818_v29  ;;  %v1336_v29 = vld [vmem:[#allocation7 + $0x38] sm:$0xff] }
 0x107   : > { %1379 = vmatprep.subr.mxu0 %v1336_v29  ;;  %v1329_v29 = vld [vmem:[#allocation7] sm:$0xff] }
 0x108   : > { %1380 = vmatpush1.xpose.msra.mxu0 %v1335_v44  ;;  %v6125_v44 = vld [vmem:[#allocation36_spill] sm:$0xff] }
 0x109   : > { %1009 = vmatmul.mubr.f32.gmra.mxu1 %v4694_v13  ;;  %3756 = vmatmul.mubr.f32.gmra.mxu0 %v4828_v6  ;;  %v6122_v6 = vld [vmem:[#allocation33_spill] sm:$0xff] }
 0x10a   : > { %1013 = vmatprep.mubr.f32.mxu1 %v6118_v39  ;;  %3758 = vmatprep.mubr.f32.mxu0 %v4834_v56  ;;  %v1333_v56 = vld [vmem:[#allocation7 + $0x20] sm:$0xff] }
 0x10b   : > { %1381 = vmatprep.subr.mxu0 %v1333_v56  ;;  %v6127_v56 = vld [vmem:[#allocation39_spill] sm:$0xff] }
 0x10c   : > { %1382 = vmatpush1.xpose.msra.mxu0 %v1332_v0  ;;  %v6129_v0 = vld [vmem:[#allocation42_spill] sm:$0xff] }
 0x10d   : > { %1014 = vmatmul.mubr.f32.gmra.mxu1 %v6119_v12  ;;  %3759 = vmatmul.mubr.f32.gmra.mxu0 %v4844_v22  ;;  %v1330_v22 = vld [vmem:[#allocation7 + $0x8] sm:$0xff] }
 0x10e   : > { %1018 = vmatprep.mubr.f32.mxu1 %v6120_v28  ;;  %3761 = vmatprep.mubr.f32.mxu0 %v4850_v23  ;;  %v6126_v23 = vld [vmem:[#allocation37_spill] sm:$0xff] }
 0x10f   : > { %1383 = vmatprep.subr.mxu0 %v1330_v22  ;;  %v6130_v22 = vld [vmem:[#allocation44_spill] sm:$0xff] }
 0x110   : > { %1384 = vmatpush1.xpose.msra.mxu0 %v1329_v29  ;;  %v6131_v29 = vld [vmem:[#allocation46_spill] sm:$0xff] }
 0x111   : > { %1019 = vmatmul.mubr.f32.gmra.mxu1 %v6121_v37  ;;  %3762 = vmatmul.mubr.f32.gmra.mxu0 %v4860_v53 }
 0x112   : > { %1023 = vmatprep.mubr.f32.mxu1 %v6122_v6  ;;  %1417 = vmatprep.mubr.f32.mxu0 %v4478_v5  ;;  %v6128_v5 = vld [vmem:[#allocation40_spill] sm:$0xff] }
 0x115   : > { %1024 = vmatmul.mubr.f32.gmra.mxu1 %v6123_v48  ;;  %1418 = vmatmul.mubr.f32.vlgmr.msra.gmra.mxu0 %v4486_v19  ;;  %v6132_v19 = vld [vmem:[#allocation48_spill] sm:$0xff] }
 0x116   : > { %1028 = vmatprep.mubr.f32.mxu1 %v6124_v31  ;;  %1422 = vmatprep.mubr.f32.mxu0 %v4492_v21  ;;  %v6133_v21 = vld [vmem:[#allocation50_spill] sm:$0xff] }
 0x119   : > { %1029 = vmatmul.mubr.f32.gmra.mxu1 %v6125_v44  ;;  %1423 = vmatmul.mubr.f32.gmra.mxu0 %v4501_v25  ;;  %v6134_v25 = vld [vmem:[#allocation52_spill] sm:$0xff] }
 0x11a   : > { %1033 = vmatprep.mubr.f32.mxu1 %v6126_v23  ;;  %1427 = vmatprep.mubr.f32.mxu0 %v4508_v27  ;;  %v6135_v27 = vld [vmem:[#allocation54_spill] sm:$0xff] }
 0x11d   : > { %1034 = vmatmul.mubr.f32.gmra.mxu1 %v6127_v56  ;;  %1428 = vmatmul.mubr.f32.gmra.mxu0 %v4517_v30  ;;  %v6136_v30 = vld [vmem:[#allocation57_spill] sm:$0xff] }
 0x11e   : > { %1038 = vmatprep.mubr.f32.mxu1 %v6128_v5  ;;  %1432 = vmatprep.mubr.f32.mxu0 %v4524_v32  ;;  %v6137_v32 = vld [vmem:[#allocation12_spill] sm:$0xff] }
 0x121   : > { %1039 = vmatmul.mubr.f32.gmra.mxu1 %v6129_v0  ;;  %1433 = vmatmul.mubr.f32.gmra.mxu0 %v4533_v36 }
 0x122   : > { %1043 = vmatprep.mubr.f32.mxu1 %v6130_v22  ;;  %1437 = vmatprep.mubr.f32.mxu0 %v4540_v38 }
 0x125   : > { %1044 = vmatmul.mubr.f32.gmra.mxu1 %v6131_v29  ;;  %1438 = vmatmul.mubr.f32.gmra.mxu0 %v4549_v41  ;;  %v6140_v41 = vld [vmem:[#allocation13_spill] sm:$0xff] }
 0x126   : > { %1048 = vmatprep.mubr.f32.mxu1 %v6132_v19  ;;  %1442 = vmatprep.mubr.f32.mxu0 %v4556_v43  ;;  %v6141_v43 = vld [vmem:[#allocation14_spill] sm:$0xff] }
 0x129   : > { %1049 = vmatmul.mubr.f32.gmra.mxu1 %v6133_v21  ;;  %1443 = vmatmul.mubr.f32.gmra.mxu0 %v4565_v47 }
 0x12a   : > { %1053 = vmatprep.mubr.f32.mxu1 %v6134_v25  ;;  %1447 = vmatprep.mubr.f32.mxu0 %v4572_v49 }
 0x12d   : > { %1054 = vmatmul.mubr.f32.gmra.mxu1 %v6135_v27  ;;  %1448 = vmatmul.mubr.f32.gmra.mxu0 %v4581_v52  ;;  %v6143_v52 = vld [vmem:[#allocation15_spill] sm:$0xff] }
 0x12e   : > { %1058 = vmatprep.mubr.f32.mxu1 %v4847_v51  ;;  %1452 = vmatprep.mubr.f32.mxu0 %v4588_v54  ;;  %v6144_v54 = vld [vmem:[#allocation16_spill] sm:$0xff] }
 0x131   : > { %1059 = vmatmul.mubr.f32.gmra.mxu1 %v6136_v30  ;;  %1453 = vmatmul.mubr.f32.gmra.mxu0 %v4597_v58  ;;  %v6146_v58 = vld [vmem:[#allocation17_spill] sm:$0xff] }
 0x132   : > { %1063 = vmatprep.mubr.f32.mxu1 %v6137_v32  ;;  %1457 = vmatprep.mubr.f32.mxu0 %v4604_v60  ;;  %v6147_v60 = vld [vmem:[#allocation18_spill] sm:$0xff] }
 0x135   : > { %v4961_v36 = vpop.f32.mrf.mxu0  ;;  %v4963_v38 = vpop.f32.mrf.mxu1  ;;  %1064 = vmatmul.mubr.f32.gmra.mxu1 %v6140_v41  ;;  %1458 = vmatmul.mubr.f32.gmra.mxu0 %v4613_v63  ;;  %v6149_v63 = vld [vmem:[#allocation19_spill] sm:$0xff] }
 0x136   : > { %6138 = vst [vmem:[#allocation29_spill] sm:$0xff] %v4961_v36  ;;  %6139 = vst [vmem:[#allocation30_spill] sm:$0xff] %v4963_v38  ;;  %1068 = vmatprep.mubr.f32.mxu1 %v6141_v43  ;;  %1462 = vmatprep.mubr.f32.mxu0 %v4620_v2  ;;  %v6150_v2 = vld [vmem:[#allocation20_spill] sm:$0xff] }
 0x137   : > { %v473_v53 = vpop.f32.mrf.mxu0  ;;  %v593_v47 = vpop.f32.mrf.mxu1 }
 0x139   : > { %v476_v49 = vpop.f32.mrf.mxu0  ;;  %v4969_v32 = vpop.f32.mrf.mxu1  ;;  %1069 = vmatmul.mubr.f32.gmra.mxu1 %v6143_v52  ;;  %1463 = vmatmul.mubr.f32.gmra.mxu0 %v4629_v8  ;;  %v6153_v8 = vld [vmem:[#allocation22_spill] sm:$0xff] }
 0x13a   : > { %6142 = vst [vmem:[#allocation31_spill] sm:$0xff] %v4969_v32  ;;  %1073 = vmatprep.mubr.f32.mxu1 %v6144_v54  ;;  %1467 = vmatprep.mubr.f32.mxu0 %v4636_v10 }
 0x13b   : > { %v478_v36 = vpop.f32.mrf.mxu0  ;;  %v598_v20 = vpop.f32.mrf.mxu1 }
 0x13d   : > { %v4975_v41 = vpop.f32.mrf.mxu0  ;;  %v4977_v53 = vpop.f32.mrf.mxu1  ;;  %1074 = vmatmul.mubr.f32.gmra.mxu1 %v6146_v58  ;;  %1468 = vmatmul.mubr.f32.gmra.mxu0 %v4646_v15  ;;  %v6156_v15 = vld [vmem:[#allocation24_spill] sm:$0xff] }
 0x13e   : > { %6145 = vst [vmem:[#allocation32_spill] sm:$0xff] %v4977_v53  ;;  %1078 = vmatprep.mubr.f32.mxu1 %v6147_v60  ;;  %1472 = vmatprep.mubr.f32.mxu0 %v4652_v17 }
 0x13f   : > { %v483_v43 = vpop.f32.mrf.mxu0  ;;  %v603_v47 = vpop.f32.mrf.mxu1 }
 0x140   : > { %v6152_v43 = vld [vmem:[#allocation21_spill] sm:$0xff] }
 0x141   : > { %v486_v36 = vpop.f32.mrf.mxu0  ;;  %v4983_v20 = vpop.f32.mrf.mxu1  ;;  %1079 = vmatmul.mubr.f32.gmra.mxu1 %v6149_v63  ;;  %1473 = vmatmul.mubr.f32.gmra.mxu0 %v4662_v34  ;;  %v6159_v34 = vld [vmem:[#allocation26_spill] sm:$0xff] }
 0x142   : > { %6148 = vst [vmem:[#allocation33_spill] sm:$0xff] %v4983_v20  ;;  %1083 = vmatprep.mubr.f32.mxu1 %v6150_v2  ;;  %1477 = vmatprep.mubr.f32.mxu0 %v4668_v40 }
 0x143   : > { %v488_v52 = vpop.f32.mrf.mxu0  ;;  %v608_v54 = vpop.f32.mrf.mxu1 }
 0x144   : > { %v6155_v52 = vld [vmem:[#allocation23_spill] sm:$0xff] }
 0x145   : > { %v491_v58 = vpop.f32.mrf.mxu0  ;;  %v4989_v60 = vpop.f32.mrf.mxu1  ;;  %1084 = vmatmul.mubr.f32.gmra.mxu1 %v6152_v43  ;;  %1478 = vmatmul.mubr.f32.gmra.mxu0 %v4678_v57 }
 0x146   : > { %6151 = vst [vmem:[#allocation34_spill] sm:$0xff] %v4989_v60  ;;  %1088 = vmatprep.mubr.f32.mxu1 %v6153_v8  ;;  %1482 = vmatprep.mubr.f32.mxu0 %v4684_v1 }
 0x147   : > { %v493_v10 = vpop.f32.mrf.mxu0  ;;  %v613_v47 = vpop.f32.mrf.mxu1 }
 0x148   : > { %v6158_v10 = vld [vmem:[#allocation25_spill] sm:$0xff] }
 0x149   : > { %v496_v63 = vpop.f32.mrf.mxu0  ;;  %v4995_v2 = vpop.f32.mrf.mxu1  ;;  %1089 = vmatmul.mubr.f32.gmra.mxu1 %v6155_v52  ;;  %1483 = vmatmul.mubr.f32.gmra.mxu0 %v4694_v13 }
 0x14a   : > { %6154 = vst [vmem:[#allocation35_spill] sm:$0xff] %v4995_v2  ;;  %1093 = vmatprep.mubr.f32.mxu1 %v6156_v15  ;;  %1487 = vmatprep.mubr.f32.mxu0 %v6118_v39 }
 0x14b   : > { %v498_v17 = vpop.f32.mrf.mxu0  ;;  %v618_v54 = vpop.f32.mrf.mxu1 }
 0x14c   : > { %v6160_v17 = vld [vmem:[#allocation27_spill] sm:$0xff] }
 0x14d   : > { %v501_v43 = vpop.f32.mrf.mxu0  ;;  %v5001_v8 = vpop.f32.mrf.mxu1  ;;  %1094 = vmatmul.mubr.f32.gmra.mxu1 %v6158_v10  ;;  %1488 = vmatmul.mubr.f32.gmra.mxu0 %v6119_v12 }
 0x14e   : > { %6157 = vst [vmem:[#allocation36_spill] sm:$0xff] %v5001_v8  ;;  %1098 = vmatprep.mubr.f32.mxu1 %v6159_v34  ;;  %1492 = vmatprep.mubr.f32.mxu0 %v6120_v28  ;;  %v6161_v34 = vld [vmem:[#allocation28_spill] sm:$0xff] }
 0x14f   : > { %v503_v40 = vpop.f32.mrf.mxu0  ;;  %v623_v47 = vpop.f32.mrf.mxu1 }
 0x151   : > { %v506_v52 = vpop.f32.mrf.mxu0  ;;  %v5007_v15 = vpop.f32.mrf.mxu1  ;;  %1099 = vmatmul.mubr.f32.gmra.mxu1 %v6160_v17  ;;  %1493 = vmatmul.mubr.f32.gmra.mxu0 %v6121_v37 }
 0x152   : > { %3780 = vmatprep.mubr.f32.mxu1 %v4607_v61  ;;  %1497 = vmatprep.mubr.f32.mxu0 %v6122_v6 }
 0x153   : > { %v508_v57 = vpop.f32.mrf.mxu0  ;;  %v628_v1 = vpop.f32.mrf.mxu1 }
 0x155   : > { %v511_v54 = vpop.f32.mrf.mxu0  ;;  %v3654_v10 = vpop.f32.mrf.mxu1  ;;  %3781 = vmatmul.mubr.f32.vlgmr.msra.gmra.mxu1 %v6161_v34  ;;  %1498 = vmatmul.mubr.f32.gmra.mxu0 %v6123_v48 }
 0x156   : > { %v5014_v13 = vadd.f32 %v3654_v10, %v476_v49  ;;  %3783 = vmatprep.mubr.f32.mxu1 %v4623_v3  ;;  %1502 = vmatprep.mubr.f32.mxu0 %v6124_v31 }
 0x157   : > { %v513_v39 = vpop.f32.mrf.mxu0  ;;  %v5017_v40 = vpop.f32.mrf.mxu1 }
 0x158   : > { %6162 = vst [vmem:[#allocation37_spill] sm:$0xff] %v5014_v13 }
 0x159   : > { %v516_v61 = vpop.f32.mrf.mxu0  ;;  %v3657_v47 = vpop.f32.mrf.mxu1  ;;  %3784 = vmatmul.mubr.f32.gmra.mxu1 %v4632_v9  ;;  %1503 = vmatmul.mubr.f32.gmra.mxu0 %v6125_v44 }
 0x15a   : > { %v5022_v28 = vadd.f32 %v3657_v47, %v486_v36  ;;  %3786 = vmatprep.mubr.f32.mxu1 %v4639_v11  ;;  %1507 = vmatprep.mubr.f32.mxu0 %v6126_v23  ;;  %v6180_v47 = vld [vmem:[#allocation38_spill] sm:$0xff] }
 0x15b   : > { %v518_v12 = vpop.f32.mrf.mxu0  ;;  %v706_v49 = vpop.f32.mrf.mxu1 }
 0x15c   : > { %6163 = vst [vmem:[#allocation39_spill] sm:$0xff] %v5022_v28  ;;  %v5027_v3 = vadd.f32 %v706_v49, %v4975_v41  ;;  %v4130_v49 = vld [vmem:[%s4463_s9 + $0x260] sm:$0xff] }
 0x15d   : > { %v521_v37 = vpop.f32.mrf.mxu0  ;;  %v3660_v17 = vpop.f32.mrf.mxu1  ;;  %3787 = vmatmul.mubr.f32.gmra.mxu1 %v4649_v16  ;;  %1508 = vmatmul.mubr.f32.gmra.mxu0 %v6127_v56 }
 0x15e   : > { %6164 = vst [vmem:[#allocation40_spill] sm:$0xff] %v5027_v3  ;;  %v5031_v6 = vadd.f32 %v3660_v17, %v496_v63  ;;  %3789 = vmatprep.mubr.f32.mxu1 %v4655_v18  ;;  %1512 = vmatprep.mubr.f32.mxu0 %v6128_v5  ;;  %v6183_v17 = vld [vmem:[#allocation41_spill] sm:$0xff] }
 0x15f   : > { %v523_v9 = vpop.f32.mrf.mxu0  ;;  %v716_v36 = vpop.f32.mrf.mxu1 }
 0x160   : > { %6165 = vst [vmem:[#allocation42_spill] sm:$0xff] %v5031_v6  ;;  %v5035_v11 = vadd.f32 %v716_v36, %v491_v58  ;;  %v4131_v36 = vld [vmem:[%s4463_s9 + $0x258] sm:$0xff] }
 0x161   : > { %v526_v48 = vpop.f32.mrf.mxu0  ;;  %v3663_v41 = vpop.f32.mrf.mxu1  ;;  %3790 = vmatmul.mubr.f32.gmra.mxu1 %v4665_v35  ;;  %1513 = vmatmul.mubr.f32.gmra.mxu0 %v6129_v0 }
 0x162   : > { %6166 = vst [vmem:[#allocation44_spill] sm:$0xff] %v5035_v11  ;;  %v5039_v31 = vadd.f32 %v3663_v41, %v506_v52  ;;  %3792 = vmatprep.mubr.f32.mxu1 %v4671_v45  ;;  %1517 = vmatprep.mubr.f32.mxu0 %v6130_v22 }
 0x163   : > { %v528_v16 = vpop.f32.mrf.mxu0  ;;  %v726_v63 = vpop.f32.mrf.mxu1 }
 0x164   : > { %6167 = vst [vmem:[#allocation46_spill] sm:$0xff] %v5039_v31  ;;  %v5043_v18 = vadd.f32 %v726_v63, %v501_v43  ;;  %v6185_v63 = vld [vmem:[#allocation43_spill] sm:$0xff] }
 0x165   : > { %v531_v44 = vpop.f32.mrf.mxu0  ;;  %v3666_v58 = vpop.f32.mrf.mxu1  ;;  %3793 = vmatmul.mubr.f32.gmra.mxu1 %v4681_v62  ;;  %1518 = vmatmul.mubr.f32.gmra.mxu0 %v6131_v29 }
 0x166   : > { %6168 = vst [vmem:[#allocation48_spill] sm:$0xff] %v5043_v18  ;;  %v5047_v23 = vadd.f32 %v3666_v58, %v516_v61  ;;  %3795 = vmatprep.mubr.f32.mxu1 %v4687_v4  ;;  %1522 = vmatprep.mubr.f32.mxu0 %v6132_v19  ;;  %v6187_v58 = vld [vmem:[#allocation45_spill] sm:$0xff] }
 0x167   : > { %v533_v35 = vpop.f32.mrf.mxu0  ;;  %v736_v52 = vpop.f32.mrf.mxu1 }
 0x168   : > { %6169 = vst [vmem:[#allocation50_spill] sm:$0xff] %v5047_v23  ;;  %v5051_v45 = vadd.f32 %v736_v52, %v511_v54  ;;  %v4133_v52 = vld [vmem:[%s4463_s9 + $0x270] sm:$0xff] }
 0x169   : > { %v536_v56 = vpop.f32.mrf.mxu0  ;;  %v3669_v43 = vpop.f32.mrf.mxu1  ;;  %3796 = vmatmul.mubr.f32.gmra.mxu1 %v4697_v14  ;;  %1523 = vmatmul.mubr.f32.gmra.mxu0 %v6133_v21 }
 0x16a   : > { %6170 = vst [vmem:[#allocation52_spill] sm:$0xff] %v5051_v45  ;;  %v5055_v5 = vadd.f32 %v3669_v43, %v526_v48  ;;  %3798 = vmatprep.mubr.f32.mxu1 %v4703_v24  ;;  %1527 = vmatprep.mubr.f32.mxu0 %v6134_v25  ;;  %v4132_v48 = vld [vmem:[%s4463_s9 + $0x278] sm:$0xff] }
 0x16b   : > { %v538_v62 = vpop.f32.mrf.mxu0  ;;  %v746_v57 = vpop.f32.mrf.mxu1 }
 0x16c   : > { %6171 = vst [vmem:[#allocation54_spill] sm:$0xff] %v5055_v5  ;;  %v5059_v4 = vadd.f32 %v746_v57, %v521_v37  ;;  %v6191_v57 = vld [vmem:[#allocation47_spill] sm:$0xff] }
 0x16d   : > { %v541_v0 = vpop.f32.mrf.mxu0  ;;  %v3672_v1 = vpop.f32.mrf.mxu1  ;;  %3799 = vmatmul.mubr.f32.gmra.mxu1 %v4713_v59  ;;  %1528 = vmatmul.mubr.f32.gmra.mxu0 %v6135_v27 }
 0x16e   : > { %6172 = vst [vmem:[#allocation57_spill] sm:$0xff] %v5059_v4  ;;  %v5063_v22 = vadd.f32 %v3672_v1, %v536_v56  ;;  %3801 = vmatprep.mubr.f32.mxu1 %v4719_v7  ;;  %1532 = vmatprep.mubr.f32.mxu0 %v4847_v51  ;;  %v4134_v56 = vld [vmem:[%s4463_s9 + $0x290] sm:$0xff] }
 0x16f   : > { %v543_v14 = vpop.f32.mrf.mxu0  ;;  %v756_v54 = vpop.f32.mrf.mxu1 }
 0x170   : > { %6173 = vst [vmem:[#allocation12_spill] sm:$0xff] %v5063_v22  ;;  %v5067_v24 = vadd.f32 %v756_v54, %v531_v44  ;;  %v4135_v54 = vld [vmem:[%s4463_s9 + $0x288] sm:$0xff] }
 0x171   : > { %v546_v29 = vpop.f32.mrf.mxu0  ;;  %v3675_v10 = vpop.f32.mrf.mxu1  ;;  %3802 = vmatmul.mubr.f32.gmra.mxu1 %v4729_v50  ;;  %1533 = vmatmul.mubr.f32.gmra.mxu0 %v6136_v30 }
 0x172   : > { %6174 = vst [vmem:[#allocation13_spill] sm:$0xff] %v5067_v24  ;;  %v5071_v19 = vadd.f32 %v3675_v10, %v546_v29  ;;  %3804 = vmatprep.mubr.f32.mxu1 %v4735_v46  ;;  %v4128_v46 = vld [vmem:[%s4463_s9 + $0x248] sm:$0xff] }
 0x173   : > { %v548_v59 = vpop.f32.mrf.mxu0  ;;  %v766_v34 = vpop.f32.mrf.mxu1  ;;  %1537 = vmatprep.mubr.f32.mxu0 %v4128_v46  ;;  %v4136_v29 = vld [vmem:[%s4463_s9 + $0x2a8] sm:$0xff] }
 0x174   : > { %6175 = vst [vmem:[#allocation14_spill] sm:$0xff] %v5071_v19  ;;  %v5075_v7 = vadd.f32 %v766_v34, %v541_v0  ;;  %v6192_v0 = vld [vmem:[#allocation49_spill] sm:$0xff]  ;;  %v6195_v34 = vld [vmem:[#allocation51_spill] sm:$0xff] }
 0x175   : > { %v5078_v21 = vpop.f32.mrf.mxu0  ;;  %v3678_v25 = vpop.f32.mrf.mxu1  ;;  %3805 = vmatmul.mubr.f32.gmra.mxu1 %v4745_v42 }
 0x176   : > { %6176 = vst [vmem:[#allocation15_spill] sm:$0xff] %v5075_v7  ;;  %6177 = vst [vmem:[#allocation16_spill] sm:$0xff] %v5078_v21  ;;  %3807 = vmatprep.mubr.f32.mxu1 %v4751_v55  ;;  %v4129_v55 = vld [vmem:[%s4463_s9 + $0x240] sm:$0xff] }
 0x177   : > { %v553_v50 = vpop.f32.mrf.mxu0  ;;  %v5082_v39 = vpop.f32.mrf.mxu1  ;;  %1538 = vmatmul.mubr.f32.gmra.mxu0 %v4129_v55 }
 0x178   : > { %6178 = vst [vmem:[#allocation17_spill] sm:$0xff] %v5082_v39  ;;  %1542 = vmatprep.mubr.f32.mxu0 %v4130_v49  ;;  %v6197_v50 = vld [vmem:[#allocation53_spill] sm:$0xff]  ;;  %v6201_v49 = vld [vmem:[#allocation55_spill] sm:$0xff] }
 0x179   : > { %v556_v27 = vpop.f32.mrf.mxu0  ;;  %v3681_v61 = vpop.f32.mrf.mxu1  ;;  %3808 = vmatmul.mubr.f32.gmra.mxu1 %v4763_v33 }
 0x17a   : > { %v5087_v51 = vadd.f32 %v3678_v25, %v556_v27  ;;  %3810 = vmatprep.mubr.f32.mxu1 %v6180_v47  ;;  %v4138_v47 = vld [vmem:[%s4463_s9 + $0x2c0] sm:$0xff] }
 0x17b   : > { %v558_v42 = vpop.f32.mrf.mxu0  ;;  %v5090_v12 = vpop.f32.mrf.mxu1  ;;  %1543 = vmatmul.mubr.f32.gmra.mxu0 %v4131_v36  ;;  %v4139_v36 = vld [vmem:[%s4463_s9 + $0x2b8] sm:$0xff] }
 0x17c   : > { %6179 = vst [vmem:[#allocation18_spill] sm:$0xff] %v5087_v51  ;;  %6181 = vst [vmem:[#allocation19_spill] sm:$0xff] %v5090_v12  ;;  %1547 = vmatprep.mubr.f32.mxu0 %v4132_v48  ;;  %v6204_v48 = vld [vmem:[#allocation29_spill] sm:$0xff] }
 0x17d   : > { %v5094_v30 = vpop.f32.mrf.mxu0  ;;  %v3684_v37 = vpop.f32.mrf.mxu1  ;;  %3811 = vmatmul.mubr.f32.gmra.mxu1 %v4780_v26 }
 0x17e   : > { %6182 = vst [vmem:[#allocation20_spill] sm:$0xff] %v5094_v30  ;;  %3813 = vmatprep.mubr.f32.mxu1 %v6183_v17  ;;  %v6202_v17 = vld [vmem:[#allocation56_spill] sm:$0xff] }
 0x17f   : > { %v563_v33 = vpop.f32.mrf.mxu0  ;;  %v5098_v9 = vpop.f32.mrf.mxu1  ;;  %1548 = vmatmul.mubr.f32.gmra.mxu0 %v4133_v52  ;;  %v6206_v52 = vld [vmem:[#allocation58_spill] sm:$0xff] }
 0x180   : > { %6184 = vst [vmem:[#allocation21_spill] sm:$0xff] %v5098_v9  ;;  %1552 = vmatprep.mubr.f32.mxu0 %v4134_v56 }
 0x181   : > { %v566_v41 = vpop.f32.mrf.mxu0  ;;  %v3687_v16 = vpop.f32.mrf.mxu1  ;;  %3814 = vmatmul.mubr.f32.gmra.mxu1 %v6185_v63  ;;  %v4140_v63 = vld [vmem:[%s4463_s9 + $0x2d8] sm:$0xff] }
 0x182   : > { %v5103_v44 = vadd.f32 %v3681_v61, %v566_v41  ;;  %3816 = vmatprep.mubr.f32.mxu1 %v6187_v58  ;;  %v4137_v61 = vld [vmem:[%s4463_s9 + $0x2a0] sm:$0xff]  ;;  %v5141_v41 = vadd.f32 %v5017_v40, %v6204_v48  ;;  %v4141_v40 = vld [vmem:[%s4463_s9 + $0x2d0] sm:$0xff] }
 0x183   : > { %v568_v26 = vpop.f32.mrf.mxu0  ;;  %v5106_v35 = vpop.f32.mrf.mxu1  ;;  %1553 = vmatmul.mubr.f32.gmra.mxu0 %v4135_v54  ;;  %v4142_v54 = vld [vmem:[%s4463_s9 + $0x2f0] sm:$0xff] }
 0x184   : > { %6186 = vst [vmem:[#allocation22_spill] sm:$0xff] %v5103_v44  ;;  %6188 = vst [vmem:[#allocation23_spill] sm:$0xff] %v5106_v35  ;;  %1557 = vmatprep.mubr.f32.mxu0 %v4136_v29 }
 0x185   : > { %v5110_v43 = vpop.f32.mrf.mxu0  ;;  %v5112_v62 = vpop.f32.mrf.mxu1  ;;  %3817 = vmatmul.mubr.f32.gmra.mxu1 %v6191_v57  ;;  %6205 = vst [vmem:[#allocation47_spill] sm:$0xff] %v5141_v41 }
 0x186   : > { %6189 = vst [vmem:[#allocation24_spill] sm:$0xff] %v5110_v43  ;;  %6190 = vst [vmem:[#allocation25_spill] sm:$0xff] %v5112_v62  ;;  %3819 = vmatprep.mubr.f32.mxu1 %v6192_v0 }
 0x187   : > { %v573_v1 = vpop.f32.mrf.mxu0  ;;  %v5116_v14 = vpop.f32.mrf.mxu1  ;;  %1558 = vmatmul.mubr.f32.gmra.mxu0 %v4137_v61 }
 0x188   : > { %6193 = vst [vmem:[#allocation26_spill] sm:$0xff] %v5116_v14  ;;  %1562 = vmatprep.mubr.f32.mxu0 %v4138_v47 }
 0x189   : > { %v576_v10 = vpop.f32.mrf.mxu0  ;;  %v5120_v59 = vpop.f32.mrf.mxu1  ;;  %3820 = vmatmul.mubr.f32.gmra.mxu1 %v6195_v34 }
 0x18a   : > { %6194 = vst [vmem:[#allocation27_spill] sm:$0xff] %v5120_v59  ;;  %v5123_v25 = vadd.f32 %v3684_v37, %v576_v10  ;;  %3822 = vmatprep.mubr.f32.mxu1 %v6197_v50 }
 0x18b   : > { %v578_v46 = vpop.f32.mrf.mxu0  ;;  %v5126_v27 = vpop.f32.mrf.mxu1  ;;  %1563 = vmatmul.mubr.f32.gmra.mxu0 %v4139_v36 }
 0x18c   : > { %6196 = vst [vmem:[#allocation28_spill] sm:$0xff] %v5123_v25  ;;  %6198 = vst [vmem:[#allocation38_spill] sm:$0xff] %v5126_v27  ;;  %1567 = vmatprep.mubr.f32.mxu0 %v4140_v63 }
 0x18d   : > { %v5130_v42 = vpop.f32.mrf.mxu0  ;;  %v5132_v55 = vpop.f32.mrf.mxu1  ;;  %3823 = vmatmul.mubr.f32.gmra.mxu1 %v6201_v49 }
 0x18e   : > { %6199 = vst [vmem:[#allocation41_spill] sm:$0xff] %v5130_v42  ;;  %6200 = vst [vmem:[#allocation43_spill] sm:$0xff] %v5132_v55  ;;  %3825 = vmatprep.mubr.f32.mxu1 %v6202_v17 }
 0x18f   : > { %v583_v37 = vpop.f32.mrf.mxu0  ;;  %v5136_v33 = vpop.f32.mrf.mxu1  ;;  %1568 = vmatmul.mubr.f32.gmra.mxu0 %v4141_v40 }
 0x190   : > { %6203 = vst [vmem:[#allocation45_spill] sm:$0xff] %v5136_v33  ;;  %1572 = vmatprep.mubr.f32.mxu0 %v4142_v54 }
 0x191   : > { %v586_v58 = vpop.f32.mrf.mxu0  ;;  %v3699_v26 = vpop.f32.mrf.mxu1  ;;  %3826 = vmatmul.mubr.f32.gmra.mxu1 %v6206_v52 }
 0x192   : > { %v5145_v56 = vadd.f32 %v3687_v16, %v586_v58  ;;  %v5148_v57 = vadd.f32 %v3699_v26, %v5007_v15  ;;  %3572 = vmatprep.mubr.msk.f32.mxu1 %vm1803_vm0, %v5141_v41  ;;  %v4143_v16 = vld [vmem:[%s4463_s9 + $0x2e8] sm:$0xff] }
 0x193   : > { %v588_v0 = vpop.f32.mrf.mxu0  ;;  %v5152_v1 = vpop.f32.mrf.mxu1  ;;  %1573 = vmatmul.mubr.f32.gmra.mxu0 %v4143_v16 }
 0x194   : > { %6207 = vst [vmem:[#allocation49_spill] sm:$0xff] %v5145_v56  ;;  %6208 = vst [vmem:[#allocation51_spill] sm:$0xff] %v5148_v57 }
 0x195   : > { %6209 = vst [vmem:[#allocation53_spill] sm:$0xff] %v5152_v1  ;;  %v5156_v29 = vpop.f32.mrf.mxu1  ;;  %v3718_v10 = vpop.f32.mrf.mxu0 }
 0x196   : > { %6210 = vst [vmem:[#allocation55_spill] sm:$0xff] %v5156_v29 }
 0x197   : > { %v947_v34 = vpop.f32.mrf.mxu1  ;;  %v5158_v50 = vpop.f32.mrf.mxu0 }
 0x198   : > { %6211 = vst [vmem:[#allocation56_spill] sm:$0xff] %v5158_v50 }
 0x199   : > { %v950_v15 = vpop.f32.mrf.mxu1  ;;  %v3721_v46 = vpop.f32.mrf.mxu0 }
 0x19a   : > { %v5161_v61 = vadd.f32 %v3718_v10, %v950_v15 }
 0x19b   : > { %v952_v47 = vpop.f32.mrf.mxu1  ;;  %v5163_v49 = vpop.f32.mrf.mxu0 }
 0x19c   : > { %6212 = vst [vmem:[#allocation29_spill] sm:$0xff] %v5161_v61 }
 0x19d   : > { %v5165_v17 = vpop.f32.mrf.mxu1  ;;  %v3724_v37 = vpop.f32.mrf.mxu0 }
 0x19f   : > { %v957_v36 = vpop.f32.mrf.mxu1  ;;  %v5167_v48 = vpop.f32.mrf.mxu0 }
 0x1a1   : > { %v960_v63 = vpop.f32.mrf.mxu1  ;;  %v3727_v58 = vpop.f32.mrf.mxu0 }
 0x1a2   : > { %v5169_v26 = vadd.f32 %v3721_v46, %v960_v63 }
 0x1a3   : > { %v962_v52 = vpop.f32.mrf.mxu1  ;;  %v5171_v0 = vpop.f32.mrf.mxu0 }
 0x1a5   : > { %v5173_v40 = vpop.f32.mrf.mxu1  ;;  %v3730_v54 = vpop.f32.mrf.mxu0 }
 0x1a7   : > { %v967_v10 = vpop.f32.mrf.mxu1  ;;  %v5175_v34 = vpop.f32.mrf.mxu0 }
 0x1a9   : > { %v970_v16 = vpop.f32.mrf.mxu1  ;;  %v3733_v15 = vpop.f32.mrf.mxu0 }
 0x1aa   : > { %v5177_v47 = vadd.f32 %v3724_v37, %v970_v16 }
 0x1ab   : > { %v972_v36 = vpop.f32.mrf.mxu1  ;;  %v5179_v57 = vpop.f32.mrf.mxu0 }
 0x1ad   : > { %v5181_v1 = vpop.f32.mrf.mxu1  ;;  %v3736_v46 = vpop.f32.mrf.mxu0 }
 0x1af   : > { %v977_v63 = vpop.f32.mrf.mxu1  ;;  %v5183_v52 = vpop.f32.mrf.mxu0 }
 0x1b1   : > { %v980_v8 = vpop.f32.mrf.mxu1  ;;  %v3739_v55 = vpop.f32.mrf.mxu0 }
 0x1b2   : > { %v5185_v2 = vadd.f32 %v3727_v58, %v980_v8 }
 0x1b3   : > { %v982_v10 = vpop.f32.mrf.mxu1  ;;  %v5187_v33 = vpop.f32.mrf.mxu0 }
 0x1b5   : > { %v5189_v60 = vpop.f32.mrf.mxu1  ;;  %v3742_v37 = vpop.f32.mrf.mxu0 }
 0x1b7   : > { %v987_v16 = vpop.f32.mrf.mxu1  ;;  %v5191_v36 = vpop.f32.mrf.mxu0 }
 0x1b8   : > { %6213 = vst [vmem:[#allocation58_spill] sm:$0xff] %v5191_v36 }
 0x1b9   : > { %v990_v59 = vpop.f32.mrf.mxu1  ;;  %v3745_v20 = vpop.f32.mrf.mxu0 }
 0x1ba   : > { %v5193_v27 = vadd.f32 %v3730_v54, %v990_v59 }
 0x1bb   : > { %v992_v63 = vpop.f32.mrf.mxu1  ;;  %v5195_v53 = vpop.f32.mrf.mxu0 }
 0x1bd   : > { %v5197_v62 = vpop.f32.mrf.mxu1  ;;  %v3748_v8 = vpop.f32.mrf.mxu0 }
 0x1bf   : > { %v997_v58 = vpop.f32.mrf.mxu1  ;;  %v5199_v10 = vpop.f32.mrf.mxu0 }
 0x1c1   : > { %v1000_v32 = vpop.f32.mrf.mxu1  ;;  %v5201_v14 = vpop.f32.mrf.mxu0 }
 0x1c2   : > { %v5203_v38 = vadd.f32 %v3733_v15, %v1000_v32 }
 0x1c3   : > { %v1002_v16 = vpop.f32.mrf.mxu1  ;;  %v5205_v56 = vpop.f32.mrf.mxu0 }
 0x1c5   : > { %v5207_v35 = vpop.f32.mrf.mxu1  ;;  %v5209_v59 = vpop.f32.mrf.mxu0 }
 0x1c7   : > { %v1007_v54 = vpop.f32.mrf.mxu1  ;;  %v5211_v63 = vpop.f32.mrf.mxu0 }
 0x1c9   : > { %v1010_v42 = vpop.f32.mrf.mxu1  ;;  %v5213_v25 = vpop.f32.mrf.mxu0 }
 0x1ca   : > { %v5215_v58 = vadd.f32 %v3736_v46, %v1010_v42 }
 0x1cb   : > { %v1012_v9 = vpop.f32.mrf.mxu1  ;;  %v5219_v32 = vpop.f32.mrf.mxu0 }
 0x1cd   : > { %v5217_v43 = vpop.f32.mrf.mxu1  ;;  %v5221_v16 = vpop.f32.mrf.mxu0 }
 0x1cf   : > { %v1017_v15 = vpop.f32.mrf.mxu1  ;;  %v5225_v54 = vpop.f32.mrf.mxu0 }
 0x1d1   : > { %v1020_v44 = vpop.f32.mrf.mxu1  ;;  %v5229_v39 = vpop.f32.mrf.mxu0 }
 0x1d2   : > { %v5223_v12 = vadd.f32 %v3739_v55, %v1020_v44 }
 0x1d3   : > { %v1022_v30 = vpop.f32.mrf.mxu1  ;;  %v5231_v9 = vpop.f32.mrf.mxu0 }
 0x1d5   : > { %v5227_v51 = vpop.f32.mrf.mxu1  ;;  %v5235_v15 = vpop.f32.mrf.mxu0 }
 0x1d6   : > { %6214 = vst [vmem:[#allocation59_spill] sm:$0xff] %v5227_v51  ;;  %6216 = vst [vmem:[#allocation61_spill] sm:$0xff] %v5235_v15 }
 0x1d7   : > { %v1027_v42 = vpop.f32.mrf.mxu1  ;;  %v1421_v44 = vpop.f32.mrf.mxu0 }
 0x1d9   : > { %v1030_v46 = vpop.f32.mrf.mxu1  ;;  %v5239_v30 = vpop.f32.mrf.mxu0 }
 0x1da   : > { %v5233_v21 = vadd.f32 %v3742_v37, %v1030_v46  ;;  %6217 = vst [vmem:[#allocation62_spill] sm:$0xff] %v5239_v30 }
 0x1db   : > { %v1032_v19 = vpop.f32.mrf.mxu1  ;;  %v1426_v24 = vpop.f32.mrf.mxu0 }
 0x1dc   : > { %6215 = vst [vmem:[#allocation60_spill] sm:$0xff] %v5233_v21 }
 0x1dd   : > { %v5237_v7 = vpop.f32.mrf.mxu1  ;;  %v5243_v42 = vpop.f32.mrf.mxu0 }
 0x1de   : > { %6218 = vst [vmem:[#allocation63_spill] sm:$0xff] %v5243_v42 }
 0x1df   : > { %v1037_v55 = vpop.f32.mrf.mxu1  ;;  %v1431_v37 = vpop.f32.mrf.mxu0 }
 0x1e1   : > { %v1040_v22 = vpop.f32.mrf.mxu1  ;;  %v5247_v19 = vpop.f32.mrf.mxu0 }
 0x1e2   : > { %v5241_v5 = vadd.f32 %v3745_v20, %v1040_v22  ;;  %6219 = vst [vmem:[#allocation64_spill] sm:$0xff] %v5247_v19 }
 0x1e3   : > { %v1042_v4 = vpop.f32.mrf.mxu1  ;;  %v1436_v31 = vpop.f32.mrf.mxu0 }
 0x1e5   : > { %v5245_v23 = vpop.f32.mrf.mxu1  ;;  %v5251_v55 = vpop.f32.mrf.mxu0 }
 0x1e6   : > { %6220 = vst [vmem:[#allocation65_spill] sm:$0xff] %v5251_v55 }
 0x1e7   : > { %v1047_v46 = vpop.f32.mrf.mxu1  ;;  %v1441_v20 = vpop.f32.mrf.mxu0 }
 0x1e9   : > { %v1050_v45 = vpop.f32.mrf.mxu1  ;;  %v5255_v4 = vpop.f32.mrf.mxu0 }
 0x1ea   : > { %v5249_v18 = vadd.f32 %v3748_v8, %v1050_v45  ;;  %6221 = vst [vmem:[#allocation66_spill] sm:$0xff] %v5255_v4 }
 0x1eb   : > { %v1052_v44 = vpop.f32.mrf.mxu1  ;;  %v1446_v11 = vpop.f32.mrf.mxu0 }
 0x1ed   : > { %v5253_v6 = vpop.f32.mrf.mxu1  ;;  %v5259_v46 = vpop.f32.mrf.mxu0 }
 0x1ee   : > { %6222 = vst [vmem:[#allocation67_spill] sm:$0xff] %v5259_v46 }
 0x1ef   : > { %v1057_v22 = vpop.f32.mrf.mxu1  ;;  %v1451_v31 = vpop.f32.mrf.mxu0 }
 0x1f1   : > { %v5257_v24 = vpop.f32.mrf.mxu1  ;;  %v5263_v8 = vpop.f32.mrf.mxu0 }
 0x1f3   : > { %v1062_v37 = vpop.f32.mrf.mxu1  ;;  %v1456_v3 = vpop.f32.mrf.mxu0 }
 0x1f5   : > { %v5261_v28 = vpop.f32.mrf.mxu1  ;;  %v5267_v20 = vpop.f32.mrf.mxu0 }
 0x1f7   : > { %v1067_v45 = vpop.f32.mrf.mxu1  ;;  %v1461_v41 = vpop.f32.mrf.mxu0 }
 0x1f9   : > { %v5265_v44 = vpop.f32.mrf.mxu1  ;;  %v5269_v30 = vpop.f32.mrf.mxu0 }
 0x1fb   : > { %v1072_v13 = vpop.f32.mrf.mxu1  ;;  %v1466_v37 = vpop.f32.mrf.mxu0 }
 0x1fd   : > { %v1075_v22 = vpop.f32.mrf.mxu1  ;;  %v5271_v50 = vpop.f32.mrf.mxu0 }
 0x1ff   : > { %v1077_v15 = vpop.f32.mrf.mxu1  ;;  %v1471_v45 = vpop.f32.mrf.mxu0 }
 0x201   : > { %v1080_v11 = vpop.f32.mrf.mxu1  ;;  %v5273_v19 = vpop.f32.mrf.mxu0 }
 0x203   : > { %v1082_v42 = vpop.f32.mrf.mxu1  ;;  %v1476_v3 = vpop.f32.mrf.mxu0 }
 0x204   : > { %v1241_v3 = vadd.f32 %v5187_v33, %v5217_v43 }
 0x205   : > { %v1085_v31 = vpop.f32.mrf.mxu1  ;;  %v5275_v36 = vpop.f32.mrf.mxu0 }
 0x207   : > { %v1087_v29 = vpop.f32.mrf.mxu1  ;;  %v1481_v41 = vpop.f32.mrf.mxu0 }
 0x209   : > { %v1090_v61 = vpop.f32.mrf.mxu1  ;;  %v5277_v55 = vpop.f32.mrf.mxu0 }
 0x20a   : > { %v1316_v41 = vadd.f32 %v5221_v16, %v1090_v61  ;;  %v1231_v61 = vadd.f32 %v5183_v52, %v5207_v35  ;;  %v1221_v52 = vadd.f32 %v5179_v57, %v5197_v62 }
 0x20b   : > { %v1092_v13 = vpop.f32.mrf.mxu1  ;;  %v1486_v37 = vpop.f32.mrf.mxu0 }
 0x20c   : > { %v1301_v37 = vadd.f32 %v5219_v32, %v1075_v22 }
 0x20d   : > { %v1095_v51 = vpop.f32.mrf.mxu1  ;;  %v5280_v46 = vpop.f32.mrf.mxu0 }
 0x20e   : > { %v1321_v29 = vadd.f32 %v5231_v9, %v1095_v51 }
 0x20f   : > { %v1097_v15 = vpop.f32.mrf.mxu1  ;;  %v1491_v45 = vpop.f32.mrf.mxu0 }
 0x211   : > { %v1100_v21 = vpop.f32.mrf.mxu1  ;;  %v1494_v13 = vpop.f32.mrf.mxu0 }
 0x212   : > { %v1326_v42 = vadd.f32 %v5229_v39, %v1100_v21 }
 0x213   : > { %v1102_v4 = vpop.f32.mrf.mxu1  ;;  %v1496_v21 = vpop.f32.mrf.mxu0 }
 0x214   : > { %3540 = vmatprep.subr.msk.mxu1 %vm1803_vm0, %v1326_v42  ;;  %v1306_v4 = vadd.f32 %v5213_v25, %v1080_v11  ;;  %v1286_v21 = vadd.f32 %v5201_v14, %v5257_v24 }
 0x215   : > { %3541 = vmatpush3.xpose.msk.msra.mxu1 %vm1803_vm0, %v5223_v12  ;;  %v5291_v39 = vpop.f32.mrf.mxu1  ;;  %v5294_v51 = vpop.f32.mrf.mxu0  ;;  %v1311_v12 = vadd.f32 %v5225_v54, %v1085_v31 }
 0x216   : > { %3542 = vmatprep.subr.msk.mxu1 %vm1803_vm0, %v1321_v29  ;;  %v1296_v29 = vadd.f32 %v5209_v59, %v5265_v44  ;;  %v1211_v59 = vadd.f32 %v5175_v34, %v5189_v60  ;;  %v1201_v34 = vadd.f32 %v5171_v0, %v5181_v1 }
 0x217   : > { %v5297_v9 = vpop.f32.mrf.mxu1  ;;  %v1501_v43 = vpop.f32.mrf.mxu0 }
 0x218   : > { %v1281_v43 = vadd.f32 %v5205_v56, %v5253_v6 }
 0x219   : > { %3543 = vmatpush3.xpose.msk.msra.mxu1 %vm1803_vm0, %v1241_v3  ;;  %v5302_v33 = vpop.f32.mrf.mxu1  ;;  %v5306_v16 = vpop.f32.mrf.mxu0  ;;  %v1291_v3 = vadd.f32 %v5211_v63, %v5261_v28 }
 0x21a   : > { %3544 = vmatprep.subr.msk.mxu1 %vm1803_vm0, %v1316_v41 }
 0x21b   : > { %v5309_v15 = vpop.f32.mrf.mxu1  ;;  %v1506_v54 = vpop.f32.mrf.mxu0 }
 0x21d   : > { %3545 = vmatpush3.xpose.msk.msra.mxu1 %vm1803_vm0, %v5215_v58  ;;  %v5313_v58 = vpop.f32.mrf.mxu1  ;;  %v5315_v31 = vpop.f32.mrf.mxu0 }
 0x21e   : > { %3546 = vmatprep.subr.msk.mxu1 %vm1803_vm0, %v1311_v12 }
 0x21f   : > { %v5318_v42 = vpop.f32.mrf.mxu1  ;;  %v1511_v35 = vpop.f32.mrf.mxu0 }
 0x221   : > { %3547 = vmatpush3.xpose.msk.msra.mxu1 %vm1803_vm0, %v1231_v61  ;;  %v5323_v25 = vpop.f32.mrf.mxu1  ;;  %v5327_v11 = vpop.f32.mrf.mxu0 }
 0x222   : > { %3548 = vmatprep.subr.msk.mxu1 %vm1803_vm0, %v1306_v4 }
 0x223   : > { %v5331_v45 = vpop.f32.mrf.mxu1  ;;  %v1516_v32 = vpop.f32.mrf.mxu0 }
 0x225   : > { %3549 = vmatpush3.xpose.msk.msra.mxu1 %vm1803_vm0, %v5203_v38  ;;  %v3794_v38 = vpop.f32.mrf.mxu1  ;;  %v5335_v22 = vpop.f32.mrf.mxu0 }
 0x226   : > { %3550 = vmatprep.subr.msk.mxu1 %vm1803_vm0, %v1301_v37  ;;  %v4316_v37 = vmov 0.0  }
 0x227   : > { %v1684_v41 = vpop.f32.mrf.mxu1  ;;  %v1521_v62 = vpop.f32.mrf.mxu0  ;;  %2929 = vmatprep.subr.mxu0 %v4316_v37 }
 0x229   : > { %3551 = vmatpush3.xpose.msk.msra.mxu1 %vm1803_vm0, %v1221_v52  ;;  %v3797_v57 = vpop.f32.mrf.mxu1  ;;  %v5344_v44 = vpop.f32.mrf.mxu0 }
 0x22a   : > { %3552 = vmatprep.subr.msk.mxu1 %vm1803_vm0, %v1296_v29 }
 0x22b   : > { %v1694_v12 = vpop.f32.mrf.mxu1  ;;  %v1526_v28 = vpop.f32.mrf.mxu0 }
 0x22d   : > { %3553 = vmatpush3.xpose.msk.msra.mxu1 %vm1803_vm0, %v5193_v27  ;;  %v3800_v63 = vpop.f32.mrf.mxu1  ;;  %v5350_v27 = vpop.f32.mrf.mxu0 }
 0x22e   : > { %3554 = vmatprep.subr.msk.mxu1 %vm1803_vm0, %v1291_v3  ;;  %v1710_v6 = vadd.f32 %v3800_v63, %v5277_v55 }
 0x22f   : > { %v1704_v61 = vpop.f32.mrf.mxu1  ;;  %v1531_v60 = vpop.f32.mrf.mxu0 }
 0x230   : > { %v1705_v1 = vadd.f32 %v1704_v61, %v5275_v36 }
 0x231   : > { %3555 = vmatpush3.xpose.msk.msra.mxu1 %vm1803_vm0, %v1211_v59  ;;  %v3803_v14 = vpop.f32.mrf.mxu1  ;;  %v5359_v24 = vpop.f32.mrf.mxu0 }
 0x232   : > { %3556 = vmatprep.subr.msk.mxu1 %vm1803_vm0, %v1286_v21  ;;  %v1720_v4 = vadd.f32 %v3803_v14, %v1494_v13  ;;  %v1271_v13 = vadd.f32 %v5199_v10, %v5245_v23  ;;  %v1191_v23 = vadd.f32 %v5167_v48, %v5173_v40  ;;  %v1695_v10 = vadd.f32 %v1694_v12, %v5271_v50  ;;  %v6227_v21 = vld [vmem:[#allocation59_spill] sm:$0xff]  ;;  %v6228_v12 = vld [vmem:[#allocation58_spill] sm:$0xff] }
 0x233   : > { %v1714_v54 = vpop.f32.mrf.mxu1  ;;  %v1536_v56 = vpop.f32.mrf.mxu0  ;;  %v1685_v50 = vadd.f32 %v1684_v41, %v5267_v20  ;;  %v1261_v40 = vadd.f32 %v5195_v53, %v5237_v7  ;;  %v1181_v53 = vadd.f32 %v5163_v49, %v5165_v17  ;;  %v6223_v7 = vld [vmem:[#allocation67_spill] sm:$0xff]  ;;  %v6226_v17 = vld [vmem:[#allocation65_spill] sm:$0xff]  ;;  %v1251_v28 = vadd.f32 %v6228_v12, %v6227_v21  ;;  %v6254_v21 = vld [vmem:[#allocation18_spill] sm:$0xff] }
 0x234   : > { %2930 = vmatpush1.msra.mxu0 %v1720_v4  ;;  %v6255_v12 = vld [vmem:[#allocation20_spill] sm:$0xff] }
 0x235   : > { %3557 = vmatpush3.xpose.msk.msra.mxu1 %vm1803_vm0, %v5185_v2  ;;  %v1715_v2 = vadd.f32 %v1714_v54, %v5280_v46  ;;  %v5367_v35 = vpop.f32.mrf.mxu1  ;;  %2931 = vmatprep.subr.mxu0 %v4316_v37  ;;  %v6233_v54 = vld [vmem:[#allocation63_spill] sm:$0xff] }
 0x236   : > { %3558 = vmatprep.subr.msk.mxu1 %vm1803_vm0, %v1281_v43  ;;  %v6230_v43 = vld [vmem:[#allocation64_spill] sm:$0xff] }
 0x237   : > { %v5371_v0 = vpop.f32.mrf.mxu0  ;;  %2932 = vmatpush1.msra.mxu0 %v1715_v2  ;;  %v5375_v55 = vpop.f32.mrf.mxu1  ;;  %v1660_v61 = vadd.f32 %v5302_v33, %v6230_v43  ;;  %v6234_v33 = vld [vmem:[#allocation62_spill] sm:$0xff]  ;;  %v6258_v43 = vld [vmem:[#allocation24_spill] sm:$0xff] }
 0x238   : > { %2933 = vmatprep.subr.mxu0 %v4316_v37 }
 0x239   : > { %3559 = vmatpush3.xpose.msk.msra.mxu1 %vm1803_vm0, %v1201_v34  ;;  %v1541_v46 = vpop.f32.mrf.mxu0  ;;  %2934 = vmatpush1.msra.mxu0 %v1710_v6  ;;  %v5382_v36 = vpop.f32.mrf.mxu1  ;;  %v6232_v34 = vld [vmem:[#allocation56_spill] sm:$0xff]  ;;  %v1655_v6 = vadd.f32 %v5309_v15, %v6233_v54  ;;  %v6236_v15 = vld [vmem:[#allocation47_spill] sm:$0xff]  ;;  %v6263_v54 = vld [vmem:[#allocation49_spill] sm:$0xff] }
 0x23a   : > { %3560 = vmatprep.subr.msk.mxu1 %vm1803_vm0, %v5249_v18  ;;  %v1700_v18 = vadd.f32 %v3797_v57, %v5273_v19  ;;  %2935 = vmatprep.subr.mxu0 %v4316_v37  ;;  %v6225_v57 = vld [vmem:[#allocation60_spill] sm:$0xff]  ;;  %v6235_v46 = vld [vmem:[#allocation61_spill] sm:$0xff] }
 0x23b   : > { %v5388_v52 = vpop.f32.mrf.mxu0  ;;  %2936 = vmatpush1.msra.mxu0 %v1705_v1  ;;  %v5390_v29 = vpop.f32.mrf.mxu1  ;;  %v1650_v1 = vadd.f32 %v5291_v39, %v6234_v33  ;;  %v6266_v33 = vld [vmem:[#allocation31_spill] sm:$0xff] }
 0x23c   : > { %2937 = vmatprep.subr.mxu0 %v4316_v37 }
 0x23d   : > { %3561 = vmatpush3.xpose.msk.msra.mxu1 %vm1803_vm0, %v5177_v47  ;;  %v1690_v47 = vadd.f32 %v3794_v38, %v5269_v30  ;;  %v1546_v19 = vpop.f32.mrf.mxu0  ;;  %2938 = vmatpush1.msra.mxu0 %v1700_v18  ;;  %v5397_v32 = vpop.f32.mrf.mxu1  ;;  %v1675_v38 = vadd.f32 %v5331_v45, %v6223_v7  ;;  %v1665_v45 = vadd.f32 %v5318_v42, %v6226_v17  ;;  %v6231_v42 = vld [vmem:[#allocation55_spill] sm:$0xff]  ;;  %v6240_v17 = vld [vmem:[#allocation44_spill] sm:$0xff] }
 0x23e   : > { %3562 = vmatprep.subr.msk.mxu1 %vm1803_vm0, %v1271_v13  ;;  %2939 = vmatprep.subr.mxu0 %v4316_v37  ;;  %v1171_v4 = vadd.f32 %v6232_v34, %v6231_v42  ;;  %v6237_v19 = vld [vmem:[#allocation37_spill] sm:$0xff]  ;;  %v6262_v34 = vld [vmem:[#allocation23_spill] sm:$0xff] }
 0x23f   : > { %v5401_v48 = vpop.f32.mrf.mxu0  ;;  %2940 = vmatpush1.msra.mxu0 %v1695_v10  ;;  %v5405_v3 = vpop.f32.mrf.mxu1  ;;  %v6261_v42 = vld [vmem:[#allocation41_spill] sm:$0xff] }
 0x240   : > { %2941 = vmatprep.subr.mxu0 %v4316_v37 }
 0x241   : > { %3563 = vmatpush3.xpose.msk.msra.mxu1 %vm1803_vm0, %v1191_v23  ;;  %v1551_v30 = vpop.f32.mrf.mxu0  ;;  %2942 = vmatpush1.msra.mxu0 %v1690_v47  ;;  %v5413_v20 = vpop.f32.mrf.mxu1  ;;  %v1645_v23 = vadd.f32 %v5297_v9, %v6235_v46  ;;  %v6269_v46 = vld [vmem:[#allocation38_spill] sm:$0xff] }
 0x242   : > { %3564 = vmatprep.subr.msk.mxu1 %vm1803_vm0, %v5241_v5  ;;  %v1680_v5 = vadd.f32 %v5323_v25, %v5263_v8  ;;  %2943 = vmatprep.subr.mxu0 %v4316_v37  ;;  %v6224_v8 = vld [vmem:[#allocation66_spill] sm:$0xff]  ;;  %v6238_v30 = vld [vmem:[#allocation40_spill] sm:$0xff] }
 0x243   : > { %v5420_v41 = vpop.f32.mrf.mxu0  ;;  %2944 = vmatpush1.msra.mxu0 %v1685_v50  ;;  %v1670_v25 = vadd.f32 %v5313_v58, %v6224_v8  ;;  %v6229_v58 = vld [vmem:[#allocation29_spill] sm:$0xff] }
 0x244   : > { %2945 = vmatprep.subr.mxu0 %v4316_v37 }
 0x245   : > { %3565 = vmatpush3.xpose.msk.msra.mxu1 %vm1803_vm0, %v5169_v26  ;;  %v5422_v26 = vpop.f32.mrf.mxu1  ;;  %v1556_v62 = vpop.f32.mrf.mxu0  ;;  %2946 = vmatpush1.msra.mxu0 %v1680_v5 }
 0x246   : > { %3566 = vmatprep.subr.msk.mxu1 %vm1803_vm0, %v1261_v40  ;;  %2947 = vmatprep.subr.mxu0 %v4316_v37 }
 0x247   : > { %v5430_v49 = vpop.f32.mrf.mxu1  ;;  %v1559_v59 = vpop.f32.mrf.mxu0  ;;  %2948 = vmatpush1.msra.mxu0 %v1675_v38 }
 0x248   : > { %2949 = vmatprep.subr.mxu0 %v4316_v37 }
 0x249   : > { %3567 = vmatpush3.xpose.msk.msra.mxu1 %vm1803_vm0, %v1181_v53  ;;  %v1764_v63 = vpop.f32.mrf.mxu1  ;;  %v1561_v60 = vpop.f32.mrf.mxu0  ;;  %2950 = vmatpush1.msra.mxu0 %v1670_v25  ;;  %v6239_v25 = vld [vmem:[#allocation39_spill] sm:$0xff] }
 0x24a   : > { %3568 = vmatprep.subr.msk.mxu1 %vm1803_vm0, %v6225_v57  ;;  %2951 = vmatprep.subr.mxu0 %v4316_v37 }
 0x24b   : > { %v3821_v14 = vpop.f32.mrf.mxu1  ;;  %v1564_v56 = vpop.f32.mrf.mxu0  ;;  %2952 = vmatpush1.msra.mxu0 %v1665_v45  ;;  %v1770_v45 = vadd.f32 %v5430_v49, %v5388_v52  ;;  %v1755_v52 = vadd.f32 %v5422_v26, %v5350_v27  ;;  %v1750_v49 = vadd.f32 %v5397_v32, %v5344_v44  ;;  %v6243_v27 = vld [vmem:[#allocation46_spill] sm:$0xff]  ;;  %v1735_v44 = vadd.f32 %v5390_v29, %v5315_v31  ;;  %v6252_v29 = vld [vmem:[#allocation16_spill] sm:$0xff] }
 0x24c   : > { %2953 = vmatprep.subr.mxu0 %v4316_v37  ;;  %v1780_v62 = vadd.f32 %v3821_v14, %v5420_v41  ;;  %v1765_v41 = vadd.f32 %v1764_v63, %v5371_v0  ;;  %v6242_v0 = vld [vmem:[#allocation48_spill] sm:$0xff]  ;;  %v1730_v32 = vadd.f32 %v5367_v35, %v5306_v16  ;;  %v6245_v31 = vld [vmem:[#allocation50_spill] sm:$0xff]  ;;  %v6246_v16 = vld [vmem:[#allocation57_spill] sm:$0xff] }
 0x24d   : > { %3569 = vmatpush3.xpose.msk.msra.mxu1 %vm1803_vm0, %v6229_v58  ;;  %v1774_v2 = vpop.f32.mrf.mxu1  ;;  %v1566_v13 = vpop.f32.mrf.mxu0  ;;  %2954 = vmatpush1.msra.mxu0 %v1660_v61  ;;  %v6248_v35 = vld [vmem:[#allocation13_spill] sm:$0xff]  ;;  %v6257_v58 = vld [vmem:[#allocation22_spill] sm:$0xff]  ;;  %v6260_v14 = vld [vmem:[#allocation28_spill] sm:$0xff] }
 0x24e   : > { %3570 = vmatprep.subr.msk.mxu1 %vm1803_vm0, %v1251_v28  ;;  %2955 = vmatprep.subr.mxu0 %v4316_v37  ;;  %v1775_v57 = vadd.f32 %v1774_v2, %v5401_v48  ;;  %v1760_v48 = vadd.f32 %v5413_v20, %v5359_v24  ;;  %v1745_v24 = vadd.f32 %v5405_v3, %v5335_v22  ;;  %v6244_v22 = vld [vmem:[#allocation52_spill] sm:$0xff]  ;;  %v6253_v3 = vld [vmem:[#allocation17_spill] sm:$0xff]  ;;  %v6256_v28 = vld [vmem:[#allocation19_spill] sm:$0xff] }
 0x24f   : > { %v3824_v18 = vpop.f32.mrf.mxu1  ;;  %v1569_v10 = vpop.f32.mrf.mxu0  ;;  %2956 = vmatpush1.msra.mxu0 %v1655_v6  ;;  %v1740_v20 = vadd.f32 %v5382_v36, %v5327_v11  ;;  %v1725_v11 = vadd.f32 %v5375_v55, %v5294_v51  ;;  %v6247_v51 = vld [vmem:[#allocation54_spill] sm:$0xff]  ;;  %v6250_v55 = vld [vmem:[#allocation15_spill] sm:$0xff]  ;;  %v777_v26 = vadd.f32 %v6253_v3, %v6252_v29  ;;  %v787_v63 = vadd.f32 %v6256_v28, %v6255_v12  ;;  %v6259_v61 = vld [vmem:[#allocation21_spill] sm:$0xff] }
 0x250   : > { %2957 = vmatprep.subr.mxu0 %v4316_v37  ;;  %v1790_v38 = vadd.f32 %v3824_v18, %v1564_v56  ;;  %v6251_v36 = vld [vmem:[#allocation14_spill] sm:$0xff]  ;;  %v797_v60 = vadd.f32 %v6259_v61, %v6258_v43  ;;  %v6268_v18 = vld [vmem:[#allocation32_spill] sm:$0xff] }
 0x251   : > { %3571 = vmatpush3.xpose.msk.msra.mxu1 %vm1803_vm0, %v1171_v4  ;;  %v1784_v47 = vpop.f32.mrf.mxu1  ;;  %v1571_v39 = vpop.f32.mrf.mxu0  ;;  %2958 = vmatpush1.msra.mxu0 %v1650_v1  ;;  %v807_v4 = vadd.f32 %v6262_v34, %v6261_v42  ;;  %v6264_v6 = vld [vmem:[#allocation30_spill] sm:$0xff]  ;;  %v6267_v1 = vld [vmem:[#allocation25_spill] sm:$0xff] }
 0x252   : > { %2959 = vmatprep.subr.mxu0 %v4316_v37  ;;  %v1785_v8 = vadd.f32 %v1784_v47, %v1559_v59  ;;  %v6241_v59 = vld [vmem:[#allocation42_spill] sm:$0xff]  ;;  %v822_v13 = vadd.f32 %v6267_v1, %v6266_v33  ;;  %v6273_v39 = vld [vmem:[#allocation45_spill] sm:$0xff] }
 0x253   : > { %v3827_v50 = vpop.f32.mrf.mxu1  ;;  %v1574_v40 = vpop.f32.mrf.mxu0  ;;  %2960 = vmatpush1.msra.mxu0 %v1645_v23  ;;  %v6265_v56 = vld [vmem:[#allocation26_spill] sm:$0xff]  ;;  %v827_v23 = vadd.f32 %v6269_v46, %v6268_v18 }
 0x254   : > { %3573 = vmatmul.mubr.msk.f32.vlgmr.msra.gmra.mxu1 %vm1803_vm0, %v6236_v15  ;;  %v1800_v9 = vadd.f32 %v3827_v50, %v1574_v40  ;;  %2961 = vmatprep.subr.mxu0 %v4316_v37  ;;  %v817_v2 = vadd.f32 %v6265_v56, %v6264_v6  ;;  %v6271_v15 = vld [vmem:[#allocation27_spill] sm:$0xff] }
 0x255   : > { %3574 = vmatprep.mubr.msk.f32.mxu1 %vm1803_vm0, %v6237_v19  ;;  %v1794_v5 = vpop.f32.mrf.mxu1  ;;  %v1576_v7 = vpop.f32.mrf.mxu0  ;;  %v6274_v40 = vld [vmem:[#allocation35_spill] sm:$0xff] }
 0x256   : > { %v1795_v53 = vadd.f32 %v1794_v5, %v1569_v10  ;;  %2962 = vmatpush2.msra.mxu0 %v1800_v9  ;;  %v6270_v10 = vld [vmem:[#allocation33_spill] sm:$0xff]  ;;  %v6275_v9 = vld [vmem:[#allocation43_spill] sm:$0xff] }
 0x257   : > { %2963 = vmatprep.subr.mxu0 %v4316_v37  ;;  %v832_v47 = vadd.f32 %v6271_v15, %v6270_v10  ;;  %v842_v5 = vadd.f32 %v6275_v9, %v6274_v40 }
 0x258   : > { %3575 = vmatmul.mubr.msk.f32.gmra.mxu1 %vm1803_vm0, %v6237_v19  ;;  %2964 = vmatpush2.msra.mxu0 %v1795_v53  ;;  %v6272_v19 = vld [vmem:[#allocation34_spill] sm:$0xff]  ;;  %v6277_v53 = vld [vmem:[#allocation53_spill] sm:$0xff] }
 0x259   : > { %3576 = vmatprep.mubr.msk.f32.mxu1 %vm1803_vm0, %v6238_v30  ;;  %2965 = vmatprep.subr.mxu0 %v4316_v37  ;;  %v837_v50 = vadd.f32 %v6273_v39, %v6272_v19 }
 0x25a   : > { %2966 = vmatpush2.msra.mxu0 %v1790_v38  ;;  %v6278_v38 = vld [vmem:[#allocation51_spill] sm:$0xff] }
 0x25b   : > { %2967 = vmatprep.subr.mxu0 %v4316_v37 }
 0x25c   : > { %3577 = vmatmul.mubr.msk.f32.gmra.mxu1 %vm1803_vm0, %v6238_v30  ;;  %2968 = vmatpush2.msra.mxu0 %v1785_v8  ;;  %v6276_v30 = vld [vmem:[#allocation36_spill] sm:$0xff]  ;;  %v2253_v8 = vlaneseq }
 0x25d   : > { %3578 = vmatprep.mubr.msk.f32.mxu1 %vm1803_vm0, %v6239_v25  ;;  %2969 = vmatprep.subr.mxu0 %v4316_v37  ;;  %v847_v7 = vadd.f32 %v6277_v53, %v6276_v30 }
 0x25e   : > { %2970 = vmatpush2.msra.mxu0 %v1780_v62  ;;  %v5622_v62 = vand.u32 127, %v2253_v8 }
 0x25f   : > { %2971 = vmatprep.subr.mxu0 %v4316_v37 }
 0x260   : > { %3579 = vmatmul.mubr.msk.f32.gmra.mxu1 %vm1803_vm0, %v6239_v25  ;;  %2972 = vmatpush2.msra.mxu0 %v1775_v57  ;;  %v5620_v25 = vshrl.u32 %v2253_v8, 7 }
 0x261   : > { %3580 = vmatprep.mubr.msk.f32.mxu1 %vm1803_vm0, %v6240_v17  ;;  %2973 = vmatprep.subr.mxu0 %v4316_v37 }
 0x262   : > { %2974 = vmatpush2.msra.mxu0 %v1770_v45  ;;  %vm2289_vm1 = vcmp.ge.s32.totalorder %v5620_v25, %v5622_v62  ;;  %v2255_v57 = vadd.s32 8, %v5620_v25  ;;  %v2261_v3 = vadd.s32 56, %v5620_v25  ;;  %v2262_v28 = vadd.s32 64, %v5620_v25 }
 0x263   : > { %2975 = vmatprep.subr.mxu0 %v4316_v37  ;;  %v2263_v61 = vadd.s32 72, %v5620_v25  ;;  %v2264_v34 = vadd.s32 80, %v5620_v25  ;;  %v2265_v56 = vadd.s32 88, %v5620_v25  ;;  %v2267_v10 = vadd.s32 104, %v5620_v25 }
 0x264   : > { %3581 = vmatmul.mubr.msk.f32.gmra.mxu1 %vm1803_vm0, %v6240_v17  ;;  %2976 = vmatpush2.msra.mxu0 %v1765_v41  ;;  %vm2291_vm2 = vcmp.ge.s32.totalorder %v2255_v57, %v5622_v62  ;;  %vm2303_vm8 = vcmp.ge.s32.totalorder %v2261_v3, %v5622_v62  ;;  %vm2305_vm9 = vcmp.ge.s32.totalorder %v2262_v28, %v5622_v62  ;;  %v2268_v39 = vadd.s32 112, %v5620_v25 }
 0x265   : > { %3582 = vmatprep.mubr.msk.f32.mxu1 %vm1803_vm0, %v6241_v59  ;;  %2977 = vmatprep.subr.mxu0 %v4316_v37  ;;  %vm2307_vm10 = vcmp.ge.s32.totalorder %v2263_v61, %v5622_v62  ;;  %vm2309_vm11 = vcmp.ge.s32.totalorder %v2264_v34, %v5622_v62  ;;  %vm2311_vm12 = vcmp.ge.s32.totalorder %v2265_v56, %v5622_v62  ;;  %v2270_v8 = vadd.s32 128, %v5620_v25 }
 0x266   : > { %2978 = vmatpush2.msra.mxu0 %v1760_v48  ;;  %vm2315_vm14 = vcmp.ge.s32.totalorder %v2267_v10, %v5622_v62  ;;  %vm2317_vm15 = vcmp.ge.s32.totalorder %v2268_v39, %v5622_v62  ;;  %v5703_v57 = vadd.s32 128, %v5622_v62  ;;  %v2274_v3 = vadd.s32 160, %v5620_v25 }
 0x267   : > { %2979 = vmatprep.subr.mxu0 %v4316_v37 }
 0x268   : > { %3583 = vmatmul.mubr.msk.f32.gmra.mxu1 %vm1803_vm0, %v6241_v59  ;;  %2980 = vmatpush2.msra.mxu0 %v1755_v52  ;;  %v2256_v59 = vadd.s32 16, %v5620_v25 }
 0x269   : > { %3584 = vmatprep.mubr.msk.f32.mxu1 %vm1803_vm0, %v6242_v0  ;;  %2981 = vmatprep.subr.mxu0 %v4316_v37 }
 0x26a   : > { %2982 = vmatpush2.msra.mxu0 %v1750_v49  ;;  %vm2293_vm3 = vcmp.ge.s32.totalorder %v2256_v59, %v5622_v62  ;;  %v2257_v49 = vadd.s32 24, %v5620_v25 }
 0x26b   : > { %2983 = vmatprep.subr.mxu0 %v4316_v37 }
 0x26c   : > { %3585 = vmatmul.mubr.msk.f32.gmra.mxu1 %vm1803_vm0, %v6242_v0  ;;  %2984 = vmatpush2.msra.mxu0 %v1745_v24  ;;  %vm2295_vm4 = vcmp.ge.s32.totalorder %v2257_v49, %v5622_v62 }
 0x26d   : > { %3586 = vmatprep.mubr.msk.f32.mxu1 %vm1803_vm0, %v6243_v27  ;;  %2985 = vmatprep.subr.mxu0 %v4316_v37 }
 0x26e   : > { %2986 = vmatpush2.msra.mxu0 %v1740_v20 }
 0x26f   : > { %2987 = vmatprep.subr.mxu0 %v4316_v37 }
 0x270   : > { %3587 = vmatmul.mubr.msk.f32.gmra.mxu1 %vm1803_vm0, %v6243_v27  ;;  %2988 = vmatpush2.msra.mxu0 %v1735_v44  ;;  %v2258_v44 = vadd.s32 32, %v5620_v25 }
 0x271   : > { %3588 = vmatprep.mubr.msk.f32.mxu1 %vm1803_vm0, %v6244_v22  ;;  %2989 = vmatprep.subr.mxu0 %v4316_v37 }
 0x272   : > { %2990 = vmatpush2.msra.mxu0 %v1730_v32  ;;  %vm2297_vm5 = vcmp.ge.s32.totalorder %v2258_v44, %v5622_v62 }
 0x273   : > { %2991 = vmatprep.subr.mxu0 %v4316_v37  ;;  %v6249_v37 = vld [vmem:[#allocation12_spill] sm:$0xff] }
 0x274   : > { %3589 = vmatmul.mubr.msk.f32.gmra.mxu1 %vm1803_vm0, %v6244_v22  ;;  %2992 = vmatpush2.msra.mxu0 %v1725_v11 }
 0x275   : > { %3590 = vmatprep.mubr.msk.f32.mxu1 %vm1803_vm0, %v6245_v31 }
 0x278   : > { %3591 = vmatmul.mubr.msk.f32.gmra.mxu1 %vm1803_vm0, %v6245_v31  ;;  %v2259_v31 = vadd.s32 40, %v5620_v25 }
 0x279   : > { %3592 = vmatprep.mubr.msk.f32.mxu1 %vm1803_vm0, %v6246_v16 }
 0x27a   : > { %vm2299_vm6 = vcmp.ge.s32.totalorder %v2259_v31, %v5622_v62 }
 0x27c   : > { %3593 = vmatmul.mubr.msk.f32.gmra.mxu1 %vm1803_vm0, %v6246_v16 }
 0x27d   : > { %3594 = vmatprep.mubr.msk.f32.mxu1 %vm1803_vm0, %v6247_v51 }
 0x280   : > { %3595 = vmatmul.mubr.msk.f32.gmra.mxu1 %vm1803_vm0, %v6247_v51 }
 0x281   : > { %3596 = vmatprep.mubr.msk.f32.mxu1 %vm1803_vm0, %v6248_v35 }
 0x284   : > { %3597 = vmatmul.mubr.msk.f32.gmra.mxu1 %vm1803_vm0, %v6248_v35 }
 0x285   : > { %3598 = vmatprep.mubr.msk.f32.mxu1 %vm1803_vm0, %v6249_v37 }
 0x288   : > { %3599 = vmatmul.mubr.msk.f32.gmra.mxu1 %vm1803_vm0, %v6249_v37  ;;  %v2260_v37 = vadd.s32 48, %v5620_v25 }
 0x289   : > { %3600 = vmatprep.mubr.msk.f32.mxu1 %vm1803_vm0, %v6250_v55 }
 0x28a   : > { %vm2301_vm7 = vcmp.ge.s32.totalorder %v2260_v37, %v5622_v62 }
 0x28c   : > { %3601 = vmatmul.mubr.msk.f32.gmra.mxu1 %vm1803_vm0, %v6250_v55 }
 0x28d   : > { %3602 = vmatprep.mubr.msk.f32.mxu1 %vm1803_vm0, %v6251_v36 }
 0x290   : > { %3603 = vmatmul.mubr.msk.f32.gmra.mxu1 %vm1803_vm0, %v6251_v36 }
 0x291   : > { %3604 = vmatprep.mubr.msk.f32.mxu1 %vm1803_vm0, %v777_v26 }
 0x294   : > { %3605 = vmatmul.mubr.msk.f32.gmra.mxu1 %vm1803_vm0, %v777_v26 }
 0x295   : > { %3606 = vmatprep.mubr.msk.f32.mxu1 %vm1803_vm0, %v6254_v21 }
 0x298   : > { %3607 = vmatmul.mubr.msk.f32.gmra.mxu1 %vm1803_vm0, %v6254_v21 }
 0x299   : > { %3608 = vmatprep.mubr.msk.f32.mxu1 %vm1803_vm0, %v787_v63 }
 0x29c   : > { %3609 = vmatmul.mubr.msk.f32.gmra.mxu1 %vm1803_vm0, %v787_v63 }
 0x29d   : > { %3610 = vmatprep.mubr.msk.f32.mxu1 %vm1803_vm0, %v6257_v58 }
 0x2a0   : > { %3611 = vmatmul.mubr.msk.f32.gmra.mxu1 %vm1803_vm0, %v6257_v58 }
 0x2a1   : > { %3612 = vmatprep.mubr.msk.f32.mxu1 %vm1803_vm0, %v797_v60 }
 0x2a4   : > { %3613 = vmatmul.mubr.msk.f32.gmra.mxu1 %vm1803_vm0, %v797_v60 }
 0x2a5   : > { %3614 = vmatprep.mubr.msk.f32.mxu1 %vm1803_vm0, %v6260_v14 }
 0x2a8   : > { %3615 = vmatmul.mubr.msk.f32.gmra.mxu1 %vm1803_vm0, %v6260_v14 }
 0x2a9   : > { %3616 = vmatprep.mubr.msk.f32.mxu1 %vm1803_vm0, %v807_v4 }
 0x2ac   : > { %3617 = vmatmul.mubr.msk.f32.gmra.mxu1 %vm1803_vm0, %v807_v4 }
 0x2ad   : > { %3618 = vmatprep.mubr.msk.f32.mxu1 %vm1803_vm0, %v6263_v54 }
 0x2b0   : > { %3619 = vmatmul.mubr.msk.f32.gmra.mxu1 %vm1803_vm0, %v6263_v54 }
 0x2b1   : > { %3620 = vmatprep.mubr.msk.f32.mxu1 %vm1803_vm0, %v817_v2 }
 0x2b4   : > { %3621 = vmatmul.mubr.msk.f32.gmra.mxu1 %vm1803_vm0, %v817_v2 }
 0x2b5   : > { %3622 = vmatprep.mubr.msk.f32.mxu1 %vm1803_vm0, %v822_v13 }
 0x2b8   : > { %3623 = vmatmul.mubr.msk.f32.gmra.mxu1 %vm1803_vm0, %v822_v13  ;;  %v2266_v13 = vadd.s32 96, %v5620_v25 }
 0x2b9   : > { %3624 = vmatprep.mubr.msk.f32.mxu1 %vm1803_vm0, %v827_v23 }
 0x2ba   : > { %vm2313_vm13 = vcmp.ge.s32.totalorder %v2266_v13, %v5622_v62  ;;  %v2277_v13 = vadd.s32 184, %v5620_v25 }
 0x2bc   : > { %3625 = vmatmul.mubr.msk.f32.gmra.mxu1 %vm1803_vm0, %v827_v23 }
 0x2bd   : > { %3626 = vmatprep.mubr.msk.f32.mxu1 %vm1803_vm0, %v832_v47 }
 0x2c0   : > { %3627 = vmatmul.mubr.msk.f32.gmra.mxu1 %vm1803_vm0, %v832_v47 }
 0x2c1   : > { %3628 = vmatprep.mubr.msk.f32.mxu1 %vm1803_vm0, %v837_v50 }
 0x2c4   : > { %3629 = vmatmul.mubr.msk.f32.gmra.mxu1 %vm1803_vm0, %v837_v50 }
 0x2c5   : > { %3630 = vmatprep.mubr.msk.f32.mxu1 %vm1803_vm0, %v842_v5 }
 0x2c8   : > { %3631 = vmatmul.mubr.msk.f32.gmra.mxu1 %vm1803_vm0, %v842_v5  ;;  %v2269_v5 = vadd.s32 120, %v5620_v25 }
 0x2c9   : > { %3632 = vmatprep.mubr.msk.f32.mxu1 %vm1803_vm0, %v847_v7 }
 0x2cc   : > { %3633 = vmatmul.mubr.msk.f32.gmra.mxu1 %vm1803_vm0, %v847_v7 }
 0x2cd   : > { %3634 = vmatprep.mubr.msk.f32.mxu1 %vm1803_vm0, %v6278_v38 }
 0x2d0   : > { %3635 = vmatmul.mubr.msk.f32.gmra.mxu1 %vm1803_vm0, %v6278_v38 }
 0x314   : > { %v2062_v17 = vpop.f32.mrf.mxu1 }
 0x315   : > { %v5627_v45 = vsel %vm2289_vm1, %v2062_v17, -inf  ;;  %vm2319_vm1 = vcmp.ge.s32.totalorder %v2269_v5, %v5622_v62 }
 0x316   : > { %2418 = vmax.xlane.f32.xlu0 %v5627_v45  ;;  %v2064_v41 = vpop.f32.mrf.mxu1 }
 0x318   : > { %v2068_v48 = vpop.f32.mrf.mxu1 }
 0x319   : > { %v5632_v52 = vsel %vm2291_vm2, %v2068_v48, -inf  ;;  %vm2322_vm2 = vcmp.ge.s32.totalorder %v2270_v8, %v5703_v57  ;;  %v2271_v48 = vadd.s32 136, %v5620_v25 }
 0x31a   : > { %2421 = vmax.xlane.f32.xlu0 %v5632_v52  ;;  %v2070_v0 = vpop.f32.mrf.mxu1 }
 0x31c   : > { %v2074_v24 = vpop.f32.mrf.mxu1 }
 0x31d   : > { %v5637_v27 = vsel %vm2293_vm3, %v2074_v24, -inf  ;;  %vm2324_vm3 = vcmp.ge.s32.totalorder %v2271_v48, %v5703_v57  ;;  %v2280_v48 = vadd.s32 208, %v5620_v25 }
 0x31e   : > { %2424 = vmax.xlane.f32.xlu1 %v5637_v27  ;;  %v2076_v20 = vpop.f32.mrf.mxu1 }
 0x31f   : > { %v2272_v20 = vadd.s32 144, %v5620_v25 }
 0x320   : > { %v2080_v22 = vpop.f32.mrf.mxu1 }
 0x321   : > { %v5642_v32 = vsel %vm2295_vm4, %v2080_v22, -inf  ;;  %vm2326_vm4 = vcmp.ge.s32.totalorder %v2272_v20, %v5703_v57 }
 0x322   : > { %2427 = vmax.xlane.f32.xlu1 %v5642_v32  ;;  %v2082_v11 = vpop.f32.mrf.mxu1 }
 0x324   : > { %v2086_v16 = vpop.f32.mrf.mxu1 }
 0x325   : > { %v5647_v51 = vsel %vm2297_vm5, %v2086_v16, -inf  ;;  %v2273_v16 = vadd.s32 152, %v5620_v25 }
 0x326   : > { %2430 = vmax.xlane.f32.xlu0 %v5647_v51  ;;  %v2088_v35 = vpop.f32.mrf.mxu1 }
 0x327   : > { %vm2328_vm5 = vcmp.ge.s32.totalorder %v2273_v16, %v5703_v57 }
 0x328   : > { %v2092_v55 = vpop.f32.mrf.mxu1 }
 0x329   : > { %v5652_v36 = vsel %vm2299_vm6, %v2092_v55, -inf  ;;  %vm2330_vm6 = vcmp.ge.s32.totalorder %v2274_v3, %v5703_v57 }
 0x32a   : > { %2433 = vmax.xlane.f32.xlu1 %v5652_v36  ;;  %v2094_v29 = vpop.f32.mrf.mxu1 }
 0x32c   : > { %v2098_v26 = vpop.f32.mrf.mxu1 }
 0x32d   : > { %v5657_v21 = vsel %vm2301_vm7, %v2098_v26, -inf }
 0x32e   : > { %2436 = vmax.xlane.f32.xlu0 %v5657_v21  ;;  %v2100_v12 = vpop.f32.mrf.mxu1 }
 0x330   : > { %v2104_v63 = vpop.f32.mrf.mxu1 }
 0x331   : > { %v5662_v58 = vsel %vm2303_vm8, %v2104_v63, -inf }
 0x332   : > { %2439 = vmax.xlane.f32.xlu1 %v5662_v58  ;;  %v2106_v43 = vpop.f32.mrf.mxu1 }
 0x333   : > { %v2275_v43 = vadd.s32 168, %v5620_v25 }
 0x334   : > { %v2110_v60 = vpop.f32.mrf.mxu1 }
 0x335   : > { %v5667_v14 = vsel %vm2305_vm9, %v2110_v60, -inf  ;;  %vm2332_vm7 = vcmp.ge.s32.totalorder %v2275_v43, %v5703_v57  ;;  %vm2336_vm9 = vcmp.ge.s32.totalorder %v2277_v13, %v5703_v57 }
 0x336   : > { %2442 = vmax.xlane.f32.xlu0 %v5667_v14  ;;  %v2112_v42 = vpop.f32.mrf.mxu1 }
 0x338   : > { %v2116_v4 = vpop.f32.mrf.mxu1 }
 0x339   : > { %v5672_v54 = vsel %vm2307_vm10, %v2116_v4, -inf  ;;  %v2276_v4 = vadd.s32 176, %v5620_v25 }
 0x33a   : > { %2445 = vmax.xlane.f32.xlu1 %v5672_v54  ;;  %v2118_v6 = vpop.f32.mrf.mxu1 }
 0x33b   : > { %vm2334_vm8 = vcmp.ge.s32.totalorder %v2276_v4, %v5703_v57  ;;  %v2283_v4 = vadd.s32 232, %v5620_v25 }
 0x33c   : > { %v2122_v2 = vpop.f32.mrf.mxu1 }
 0x33d   : > { %v5677_v33 = vsel %vm2309_vm11, %v2122_v2, -inf }
 0x33e   : > { %2448 = vmax.xlane.f32.xlu0 %v5677_v33  ;;  %v2124_v1 = vpop.f32.mrf.mxu1 }
 0x340   : > { %v2128_v18 = vpop.f32.mrf.mxu1 }
 0x341   : > { %v5682_v46 = vsel %vm2311_vm12, %v2128_v18, -inf  ;;  %vm2342_vm12 = vcmp.ge.s32.totalorder %v2280_v48, %v5703_v57 }
 0x342   : > { %2451 = vmax.xlane.f32.xlu1 %v5682_v46  ;;  %v2130_v23 = vpop.f32.mrf.mxu1 }
 0x344   : > { %v2134_v15 = vpop.f32.mrf.mxu1 }
 0x345   : > { %v5687_v47 = vsel %vm2313_vm13, %v2134_v15, -inf }
 0x346   : > { %2454 = vmax.xlane.f32.xlu0 %v5687_v47  ;;  %v2136_v19 = vpop.f32.mrf.mxu1 }
 0x347   : > { %v2278_v19 = vadd.s32 192, %v5620_v25 }
 0x348   : > { %v2140_v50 = vpop.f32.mrf.mxu1 }
 0x349   : > { %v5692_v40 = vsel %vm2315_vm14, %v2140_v50, -inf  ;;  %vm2338_vm10 = vcmp.ge.s32.totalorder %v2278_v19, %v5703_v57 }
 0x34a   : > { %2457 = vmax.xlane.f32.xlu1 %v5692_v40  ;;  %v2142_v9 = vpop.f32.mrf.mxu1 }
 0x34c   : > { %v2146_v30 = vpop.f32.mrf.mxu1 }
 0x34d   : > { %v5697_v53 = vsel %vm2317_vm15, %v2146_v30, -inf  ;;  %v2279_v30 = vadd.s32 200, %v5620_v25  ;;  %vm2348_vm15 = vcmp.ge.s32.totalorder %v2283_v4, %v5703_v57 }
 0x34e   : > { %2460 = vmax.xlane.f32.xlu0 %v5697_v53  ;;  %v2148_v7 = vpop.f32.mrf.mxu1 }
 0x34f   : > { %vm2340_vm11 = vcmp.ge.s32.totalorder %v2279_v30, %v5703_v57 }
 0x350   : > { %v2152_v38 = vpop.f32.mrf.mxu1 }
 0x351   : > { %v5705_v17 = vsel %vm2319_vm1, %v2152_v38, -inf }
 0x352   : > { %2463 = vmax.xlane.f32.xlu1 %v5705_v17  ;;  %v2154_v41 = vpop.f32.mrf.mxu1 }
 0x354   : > { %v5708_v59 = vpop.f32.mrf.mxu1 }
 0x356   : > { %v2160_v0 = vpop.f32.mrf.mxu1 }
 0x357   : > { %v5712_v49 = vsel %vm2322_vm2, %v2160_v0, -inf }
 0x358   : > { %v5714_v24 = vpop.f32.mrf.mxu1  ;;  %v2465_v62 = vmax.f32 %v5708_v59, %v5712_v49 }
 0x35a   : > { %2466 = vmax.xlane.f32.xlu0 %v2465_v62  ;;  %v2166_v44 = vpop.f32.mrf.mxu1 }
 0x35b   : > { %v5720_v22 = vsel %vm2324_vm3, %v2166_v44, -inf }
 0x35c   : > { %v5722_v11 = vpop.f32.mrf.mxu1  ;;  %v2468_v31 = vmax.f32 %v5714_v24, %v5720_v22 }
 0x35e   : > { %2469 = vmax.xlane.f32.xlu1 %v2468_v31  ;;  %v2172_v35 = vpop.f32.mrf.mxu1  ;;  %v2281_v31 = vadd.s32 216, %v5620_v25 }
 0x35f   : > { %v5728_v37 = vsel %vm2326_vm4, %v2172_v35, -inf }
 0x360   : > { %v5730_v55 = vpop.f32.mrf.mxu1  ;;  %v2471_v29 = vmax.f32 %v5722_v11, %v5728_v37  ;;  %vm2344_vm13 = vcmp.ge.s32.totalorder %v2281_v31, %v5703_v57 }
 0x362   : > { %2472 = vmax.xlane.f32.xlu0 %v2471_v29  ;;  %v2178_v26 = vpop.f32.mrf.mxu1 }
 0x363   : > { %v5736_v12 = vsel %vm2328_vm5, %v2178_v26, -inf  ;;  %v2282_v26 = vadd.s32 224, %v5620_v25 }
 0x364   : > { %v5738_v28 = vpop.f32.mrf.mxu1  ;;  %v2474_v63 = vmax.f32 %v5730_v55, %v5736_v12 }
 0x365   : > { %vm2346_vm14 = vcmp.ge.s32.totalorder %v2282_v26, %v5703_v57 }
 0x366   : > { %2475 = vmax.xlane.f32.xlu1 %v2474_v63  ;;  %v2184_v61 = vpop.f32.mrf.mxu1 }
 0x367   : > { %v5744_v60 = vsel %vm2330_vm6, %v2184_v61, -inf }
 0x368   : > { %v5746_v42 = vpop.f32.mrf.mxu1  ;;  %v2477_v34 = vmax.f32 %v5738_v28, %v5744_v60 }
 0x36a   : > { %2478 = vmax.xlane.f32.xlu0 %v2477_v34  ;;  %v2190_v6 = vpop.f32.mrf.mxu1 }
 0x36b   : > { %v5752_v56 = vsel %vm2332_vm7, %v2190_v6, -inf }
 0x36c   : > { %v5754_v2 = vpop.f32.mrf.mxu1  ;;  %v2480_v1 = vmax.f32 %v5746_v42, %v5752_v56 }
 0x36e   : > { %2481 = vmax.xlane.f32.xlu1 %v2480_v1  ;;  %v2196_v18 = vpop.f32.mrf.mxu1 }
 0x36f   : > { %v5760_v23 = vsel %vm2334_vm8, %v2196_v18, -inf }
 0x370   : > { %v5762_v10 = vpop.f32.mrf.mxu1  ;;  %v2483_v15 = vmax.f32 %v5754_v2, %v5760_v23 }
 0x372   : > { %2484 = vmax.xlane.f32.xlu0 %v2483_v15  ;;  %v2202_v39 = vpop.f32.mrf.mxu1  ;;  %v2284_v15 = vadd.s32 240, %v5620_v25 }
 0x373   : > { %v5768_v50 = vsel %vm2336_vm9, %v2202_v39, -inf }
 0x374   : > { %v5770_v9 = vpop.f32.mrf.mxu1  ;;  %v2486_v5 = vmax.f32 %v5762_v10, %v5768_v50  ;;  %vm2350_vm1 = vcmp.ge.s32.totalorder %v2284_v15, %v5703_v57 }
 0x376   : > { %2487 = vmax.xlane.f32.xlu1 %v2486_v5  ;;  %v2208_v7 = vpop.f32.mrf.mxu1 }
 0x377   : > { %v5776_v38 = vsel %vm2338_vm10, %v2208_v7, -inf  ;;  %v2285_v7 = vadd.s32 248, %v5620_v25 }
 0x378   : > { %v5778_v8 = vpop.f32.mrf.mxu1  ;;  %v2489_v41 = vmax.f32 %v5770_v9, %v5776_v38 }
 0x379   : > { %vm2352_vm2 = vcmp.ge.s32.totalorder %v2285_v7, %v5703_v57 }
 0x37a   : > { %2490 = vmax.xlane.f32.xlu0 %v2489_v41  ;;  %v2214_v0 = vpop.f32.mrf.mxu1 }
 0x37b   : > { %v5784_v62 = vsel %vm2340_vm11, %v2214_v0, -inf }
 0x37c   : > { %v5786_v20 = vpop.f32.mrf.mxu1  ;;  %v2492_v44 = vmax.f32 %v5778_v8, %v5784_v62 }
 0x37e   : > { %2493 = vmax.xlane.f32.xlu1 %v2492_v44  ;;  %v2220_v16 = vpop.f32.mrf.mxu1 }
 0x37f   : > { %v5792_v35 = vsel %vm2342_vm12, %v2220_v16, -inf }
 0x380   : > { %v5794_v29 = vpop.f32.mrf.mxu1  ;;  %v2495_v3 = vmax.f32 %v5786_v20, %v5792_v35 }
 0x382   : > { %2496 = vmax.xlane.f32.xlu0 %v2495_v3  ;;  %v2226_v63 = vpop.f32.mrf.mxu1 }
 0x383   : > { %v5800_v43 = vsel %vm2344_vm13, %v2226_v63, -inf }
 0x384   : > { %v5802_v61 = vpop.f32.mrf.mxu1  ;;  %v2498_v34 = vmax.f32 %v5794_v29, %v5800_v43 }
 0x386   : > { %2499 = vmax.xlane.f32.xlu1 %v2498_v34  ;;  %v2232_v6 = vpop.f32.mrf.mxu1 }
 0x387   : > { %v5808_v1 = vsel %vm2346_vm14, %v2232_v6, -inf }
 0x388   : > { %v5810_v13 = vpop.f32.mrf.mxu1  ;;  %v2501_v18 = vmax.f32 %v5802_v61, %v5808_v1 }
 0x38a   : > { %2502 = vmax.xlane.f32.xlu0 %v2501_v18  ;;  %v2238_v19 = vpop.f32.mrf.mxu1 }
 0x38b   : > { %v5816_v39 = vsel %vm2348_vm15, %v2238_v19, -inf }
 0x38c   : > { %v5818_v5 = vpop.f32.mrf.mxu1  ;;  %v2504_v30 = vmax.f32 %v5810_v13, %v5816_v39 }
 0x38e   : > { %2505 = vmax.xlane.f32.xlu1 %v2504_v30  ;;  %v2244_v41 = vpop.f32.mrf.mxu1 }
 0x38f   : > { %v5824_v48 = vsel %vm2350_vm1, %v2244_v41, -inf }
 0x390   : > { %v5826_v0 = vpop.f32.mrf.mxu1  ;;  %v2507_v44 = vmax.f32 %v5818_v5, %v5824_v48 }
 0x392   : > { %2508 = vmax.xlane.f32.xlu0 %v2507_v44  ;;  %v2250_v31 = vpop.f32.mrf.mxu1 }
 0x393   : > { %v5831_v16 = vsel %vm2352_vm2, %v2250_v31, -inf }
 0x394   : > { %v2510_v3 = vmax.f32 %v5826_v0, %v5831_v16 }
 0x396   : > { %2511 = vmax.xlane.f32.xlu1 %v2510_v3 }
 0x39f   : > { %v2419_v25 = vpop.xlane.xlu0 %2418 }
 0x3a0   : > { %v2513_v26 = vsub.f32 %v5627_v45, %v2419_v25  ;;  %v2514_v63 = vsub.f32 -inf, %v2419_v25 }
 0x3a2   : > { %v2577_v34 = vmul.f32 1.442695, %v2513_v26  ;;  %v2579_v4 = vmul.f32 1.442695, %v2514_v63 }
 0x3a3   : > { %v2422_v6 = vpop.xlane.xlu0 %2421 }
 0x3a4   : > { %3936 = vpow2.f32 %v2577_v34  ;;  %v2515_v18 = vsub.f32 %v5632_v52, %v2422_v6  ;;  %v2516_v15 = vsub.f32 -inf, %v2422_v6 }
 0x3a5   : > { %3938 = vpow2.f32 %v2579_v4 }
 0x3a6   : > { %v2581_v57 = vmul.f32 1.442695, %v2515_v18  ;;  %v2583_v19 = vmul.f32 1.442695, %v2516_v15 }
 0x3a7   : > { %v2425_v30 = vpop.xlane.xlu1 %2424 }
 0x3a8   : > { %3940 = vpow2.f32 %v2581_v57  ;;  %v2517_v7 = vsub.f32 %v5637_v27, %v2425_v30  ;;  %v2518_v41 = vsub.f32 -inf, %v2425_v30 }
 0x3a9   : > { %3942 = vpow2.f32 %v2583_v19 }
 0x3aa   : > { %v2585_v44 = vmul.f32 1.442695, %v2517_v7  ;;  %v2587_v31 = vmul.f32 1.442695, %v2518_v41 }
 0x3ab   : > { %v2428_v45 = vpop.xlane.xlu1 %2427 }
 0x3ac   : > { %3944 = vpow2.f32 %v2585_v44  ;;  %v2519_v3 = vsub.f32 %v5642_v32, %v2428_v45  ;;  %v2520_v25 = vsub.f32 -inf, %v2428_v45 }
 0x3ad   : > { %3946 = vpow2.f32 %v2587_v31 }
 0x3ae   : > { %v2589_v26 = vmul.f32 1.442695, %v2519_v3  ;;  %v2591_v52 = vmul.f32 1.442695, %v2520_v25 }
 0x3af   : > { %v2431_v63 = vpop.xlane.xlu0 %2430 }
 0x3b0   : > { %3948 = vpow2.f32 %v2589_v26  ;;  %v2521_v34 = vsub.f32 %v5647_v51, %v2431_v63  ;;  %v2522_v4 = vsub.f32 -inf, %v2431_v63 }
 0x3b1   : > { %v3937_v6 = vpop.eup %3936  ;;  %3950 = vpow2.f32 %v2591_v52 }
 0x3b2   : > { %v3939_v27 = vpop.eup %3938  ;;  %v2593_v18 = vmul.f32 1.442695, %v2521_v34  ;;  %v2595_v15 = vmul.f32 1.442695, %v2522_v4 }
 0x3b3   : > { %2993 = vmatprep.mubr.f32.mxu0 %v3939_v27  ;;  %v2434_v57 = vpop.xlane.xlu1 %2433  ;;  %v2705_v19 = vadd.f32 %v3939_v27, %v3937_v6 }
 0x3b4   : > { %3952 = vpow2.f32 %v2593_v18  ;;  %2994 = vmatmul.mubr.f32.vlgmr.msra.gmra.mxu0 %v3937_v6  ;;  %v2523_v32 = vsub.f32 %v5652_v36, %v2434_v57  ;;  %v2524_v30 = vsub.f32 -inf, %v2434_v57 }
 0x3b5   : > { %v3941_v7 = vpop.eup %3940  ;;  %3954 = vpow2.f32 %v2595_v15  ;;  %2706 = vadd.xlane.f32.xlu0 %v2705_v19 }
 0x3b6   : > { %v3943_v41 = vpop.eup %3942  ;;  %v2597_v44 = vmul.f32 1.442695, %v2523_v32  ;;  %v2599_v51 = vmul.f32 1.442695, %v2524_v30 }
 0x3b7   : > { %2998 = vmatprep.mubr.f32.mxu0 %v3943_v41  ;;  %v2437_v31 = vpop.xlane.xlu0 %2436  ;;  %v2708_v45 = vadd.f32 %v3943_v41, %v3941_v7 }
 0x3b8   : > { %3956 = vpow2.f32 %v2597_v44  ;;  %2999 = vmatmul.mubr.f32.gmra.mxu0 %v3941_v7  ;;  %v2525_v3 = vsub.f32 %v5657_v21, %v2437_v31  ;;  %v2526_v25 = vsub.f32 -inf, %v2437_v31 }
 0x3b9   : > { %v3945_v26 = vpop.eup %3944  ;;  %3958 = vpow2.f32 %v2599_v51  ;;  %2709 = vadd.xlane.f32.xlu1 %v2708_v45 }
 0x3ba   : > { %v3947_v52 = vpop.eup %3946  ;;  %v2601_v36 = vmul.f32 1.442695, %v2525_v3  ;;  %v2603_v63 = vmul.f32 1.442695, %v2526_v25 }
 0x3bb   : > { %3003 = vmatprep.mubr.f32.mxu0 %v3947_v52  ;;  %v2440_v34 = vpop.xlane.xlu1 %2439  ;;  %v2711_v4 = vadd.f32 %v3947_v52, %v3945_v26 }
 0x3bc   : > { %3960 = vpow2.f32 %v2601_v36  ;;  %3004 = vmatmul.mubr.f32.gmra.mxu0 %v3945_v26  ;;  %v2527_v6 = vsub.f32 %v5662_v58, %v2440_v34  ;;  %v2528_v27 = vsub.f32 -inf, %v2440_v34 }
 0x3bd   : > { %v3949_v18 = vpop.eup %3948  ;;  %3962 = vpow2.f32 %v2603_v63  ;;  %2712 = vadd.xlane.f32.xlu0 %v2711_v4 }
 0x3be   : > { %v3951_v15 = vpop.eup %3950  ;;  %v2605_v21 = vmul.f32 1.442695, %v2527_v6  ;;  %v2607_v57 = vmul.f32 1.442695, %v2528_v27 }
 0x3bf   : > { %3008 = vmatprep.mubr.f32.mxu0 %v3951_v15  ;;  %v2443_v19 = vpop.xlane.xlu0 %2442  ;;  %v2714_v32 = vadd.f32 %v3951_v15, %v3949_v18 }
 0x3c0   : > { %3964 = vpow2.f32 %v2605_v21  ;;  %3009 = vmatmul.mubr.f32.gmra.mxu0 %v3949_v18  ;;  %v2529_v30 = vsub.f32 %v5667_v14, %v2443_v19  ;;  %v2530_v7 = vsub.f32 -inf, %v2443_v19 }
 0x3c1   : > { %v3953_v41 = vpop.eup %3952  ;;  %3966 = vpow2.f32 %v2607_v57  ;;  %2715 = vadd.xlane.f32.xlu1 %v2714_v32 }
 0x3c2   : > { %v3955_v44 = vpop.eup %3954  ;;  %v2609_v58 = vmul.f32 1.442695, %v2529_v30  ;;  %v2611_v51 = vmul.f32 1.442695, %v2530_v7 }
 0x3c3   : > { %3013 = vmatprep.mubr.f32.mxu0 %v3955_v44  ;;  %v2446_v31 = vpop.xlane.xlu1 %2445  ;;  %v2717_v45 = vadd.f32 %v3955_v44, %v3953_v41 }
 0x3c4   : > { %3968 = vpow2.f32 %v2609_v58  ;;  %3014 = vmatmul.mubr.f32.gmra.mxu0 %v3953_v41  ;;  %v2531_v3 = vsub.f32 %v5672_v54, %v2446_v31  ;;  %v2532_v25 = vsub.f32 -inf, %v2446_v31 }
 0x3c5   : > { %v3957_v26 = vpop.eup %3956  ;;  %3970 = vpow2.f32 %v2611_v51  ;;  %2718 = vadd.xlane.f32.xlu0 %v2717_v45 }
 0x3c6   : > { %v3959_v52 = vpop.eup %3958  ;;  %v2613_v14 = vmul.f32 1.442695, %v2531_v3  ;;  %v2615_v36 = vmul.f32 1.442695, %v2532_v25 }
 0x3c7   : > { %3018 = vmatprep.mubr.f32.mxu0 %v3959_v52  ;;  %v2449_v63 = vpop.xlane.xlu0 %2448  ;;  %v2720_v34 = vadd.f32 %v3959_v52, %v3957_v26 }
 0x3c8   : > { %3972 = vpow2.f32 %v2613_v14  ;;  %3019 = vmatmul.mubr.f32.gmra.mxu0 %v3957_v26  ;;  %v2533_v4 = vsub.f32 %v5677_v33, %v2449_v63  ;;  %v2534_v6 = vsub.f32 -inf, %v2449_v63 }
 0x3c9   : > { %v3961_v27 = vpop.eup %3960  ;;  %3974 = vpow2.f32 %v2615_v36  ;;  %2721 = vadd.xlane.f32.xlu1 %v2720_v34 }
 0x3ca   : > { %v3963_v18 = vpop.eup %3962  ;;  %v2617_v54 = vmul.f32 1.442695, %v2533_v4  ;;  %v2619_v15 = vmul.f32 1.442695, %v2534_v6 }
 0x3cb   : > { %3023 = vmatprep.mubr.f32.mxu0 %v3963_v18  ;;  %v2452_v21 = vpop.xlane.xlu1 %2451  ;;  %v2723_v57 = vadd.f32 %v3963_v18, %v3961_v27 }
 0x3cc   : > { %3976 = vpow2.f32 %v2617_v54  ;;  %3024 = vmatmul.mubr.f32.gmra.mxu0 %v3961_v27  ;;  %v2535_v19 = vsub.f32 %v5682_v46, %v2452_v21  ;;  %v2536_v32 = vsub.f32 -inf, %v2452_v21 }
 0x3cd   : > { %v3965_v30 = vpop.eup %3964  ;;  %3978 = vpow2.f32 %v2619_v15  ;;  %2724 = vadd.xlane.f32.xlu0 %v2723_v57 }
 0x3ce   : > { %v3967_v7 = vpop.eup %3966  ;;  %v2621_v33 = vmul.f32 1.442695, %v2535_v19  ;;  %v2623_v41 = vmul.f32 1.442695, %v2536_v32 }
 0x3cf   : > { %3028 = vmatprep.mubr.f32.mxu0 %v3967_v7  ;;  %v2455_v44 = vpop.xlane.xlu0 %2454  ;;  %v2726_v58 = vadd.f32 %v3967_v7, %v3965_v30 }
 0x3d0   : > { %3980 = vpow2.f32 %v2621_v33  ;;  %3029 = vmatmul.mubr.f32.gmra.mxu0 %v3965_v30  ;;  %v2537_v51 = vsub.f32 %v5687_v47, %v2455_v44  ;;  %v2538_v31 = vsub.f32 -inf, %v2455_v44 }
 0x3d1   : > { %v3969_v45 = vpop.eup %3968  ;;  %3982 = vpow2.f32 %v2623_v41  ;;  %2727 = vadd.xlane.f32.xlu1 %v2726_v58 }
 0x3d2   : > { %v3971_v3 = vpop.eup %3970  ;;  %v2625_v46 = vmul.f32 1.442695, %v2537_v51  ;;  %v2627_v25 = vmul.f32 1.442695, %v2538_v31 }
 0x3d3   : > { %3033 = vmatprep.mubr.f32.mxu0 %v3971_v3  ;;  %v2458_v26 = vpop.xlane.xlu1 %2457  ;;  %v2729_v52 = vadd.f32 %v3971_v3, %v3969_v45 }
 0x3d4   : > { %3984 = vpow2.f32 %v2625_v46  ;;  %3034 = vmatmul.mubr.f32.gmra.mxu0 %v3969_v45  ;;  %v2539_v14 = vsub.f32 %v5692_v40, %v2458_v26  ;;  %v2540_v36 = vsub.f32 -inf, %v2458_v26 }
 0x3d5   : > { %v3973_v63 = vpop.eup %3972  ;;  %3986 = vpow2.f32 %v2627_v25  ;;  %2730 = vadd.xlane.f32.xlu0 %v2729_v52 }
 0x3d6   : > { %v3975_v34 = vpop.eup %3974  ;;  %v2629_v47 = vmul.f32 1.442695, %v2539_v14  ;;  %v2631_v4 = vmul.f32 1.442695, %v2540_v36 }
 0x3d7   : > { %3038 = vmatprep.mubr.f32.mxu0 %v3975_v34  ;;  %v2461_v6 = vpop.xlane.xlu0 %2460  ;;  %v2732_v27 = vadd.f32 %v3975_v34, %v3973_v63 }
 0x3d8   : > { %3988 = vpow2.f32 %v2629_v47  ;;  %3039 = vmatmul.mubr.f32.gmra.mxu0 %v3973_v63  ;;  %v2541_v18 = vsub.f32 %v5697_v53, %v2461_v6  ;;  %v2542_v54 = vsub.f32 -inf, %v2461_v6 }
 0x3d9   : > { %v3977_v15 = vpop.eup %3976  ;;  %3990 = vpow2.f32 %v2631_v4  ;;  %2733 = vadd.xlane.f32.xlu1 %v2732_v27 }
 0x3da   : > { %v3979_v21 = vpop.eup %3978  ;;  %v2633_v40 = vmul.f32 1.442695, %v2541_v18  ;;  %v2635_v57 = vmul.f32 1.442695, %v2542_v54 }
 0x3db   : > { %3043 = vmatprep.mubr.f32.mxu0 %v3979_v21  ;;  %v2464_v19 = vpop.xlane.xlu1 %2463  ;;  %v2735_v32 = vadd.f32 %v3979_v21, %v3977_v15 }
 0x3dc   : > { %3992 = vpow2.f32 %v2633_v40  ;;  %3044 = vmatmul.mubr.f32.gmra.mxu0 %v3977_v15  ;;  %v2543_v30 = vsub.f32 %v5705_v17, %v2464_v19  ;;  %v2544_v7 = vsub.f32 -inf, %v2464_v19 }
 0x3dd   : > { %v3981_v33 = vpop.eup %3980  ;;  %3994 = vpow2.f32 %v2635_v57  ;;  %2736 = vadd.xlane.f32.xlu0 %v2735_v32 }
 0x3de   : > { %v3983_v41 = vpop.eup %3982  ;;  %v2637_v53 = vmul.f32 1.442695, %v2543_v30  ;;  %v2639_v44 = vmul.f32 1.442695, %v2544_v7 }
 0x3df   : > { %3048 = vmatprep.mubr.f32.mxu0 %v3983_v41  ;;  %v2738_v58 = vadd.f32 %v3983_v41, %v3981_v33 }
 0x3e0   : > { %3996 = vpow2.f32 %v2637_v53  ;;  %3049 = vmatmul.mubr.f32.gmra.mxu0 %v3981_v33 }
 0x3e1   : > { %v3985_v51 = vpop.eup %3984  ;;  %3998 = vpow2.f32 %v2639_v44  ;;  %2739 = vadd.xlane.f32.xlu1 %v2738_v58 }
 0x3e2   : > { %v3987_v31 = vpop.eup %3986 }
 0x3e3   : > { %3053 = vmatprep.mubr.f32.mxu0 %v3987_v31  ;;  %v2467_v45 = vpop.xlane.xlu0 %2466  ;;  %v2741_v3 = vadd.f32 %v3987_v31, %v3985_v51 }
 0x3e4   : > { %3054 = vmatmul.mubr.f32.gmra.mxu0 %v3985_v51  ;;  %v2545_v17 = vsub.f32 %v5708_v59, %v2467_v45  ;;  %v2546_v46 = vsub.f32 %v5712_v49, %v2467_v45 }
 0x3e5   : > { %v3989_v25 = vpop.eup %3988  ;;  %2742 = vadd.xlane.f32.xlu0 %v2741_v3 }
 0x3e6   : > { %v3991_v26 = vpop.eup %3990  ;;  %v2641_v52 = vmul.f32 1.442695, %v2545_v17  ;;  %v2643_v14 = vmul.f32 1.442695, %v2546_v46 }
 0x3e7   : > { %3058 = vmatprep.mubr.f32.mxu0 %v3991_v26  ;;  %v2470_v36 = vpop.xlane.xlu1 %2469  ;;  %v2744_v63 = vadd.f32 %v3991_v26, %v3989_v25 }
 0x3e8   : > { %4000 = vpow2.f32 %v2641_v52  ;;  %3059 = vmatmul.mubr.f32.gmra.mxu0 %v3989_v25  ;;  %v2547_v34 = vsub.f32 %v5714_v24, %v2470_v36  ;;  %v2548_v47 = vsub.f32 %v5720_v22, %v2470_v36 }
 0x3e9   : > { %v3993_v4 = vpop.eup %3992  ;;  %4002 = vpow2.f32 %v2643_v14  ;;  %2745 = vadd.xlane.f32.xlu1 %v2744_v63 }
 0x3ea   : > { %v3995_v59 = vpop.eup %3994  ;;  %v2645_v6 = vmul.f32 1.442695, %v2547_v34  ;;  %v2647_v49 = vmul.f32 1.442695, %v2548_v47 }
 0x3eb   : > { %3063 = vmatprep.mubr.f32.mxu0 %v3995_v59  ;;  %v2473_v27 = vpop.xlane.xlu0 %2472  ;;  %v2747_v18 = vadd.f32 %v3995_v59, %v3993_v4 }
 0x3ec   : > { %4004 = vpow2.f32 %v2645_v6  ;;  %3064 = vmatmul.mubr.f32.gmra.mxu0 %v3993_v4  ;;  %v2549_v54 = vsub.f32 %v5722_v11, %v2473_v27  ;;  %v2550_v15 = vsub.f32 %v5728_v37, %v2473_v27 }
 0x3ed   : > { %v3997_v21 = vpop.eup %3996  ;;  %4006 = vpow2.f32 %v2647_v49  ;;  %2748 = vadd.xlane.f32.xlu0 %v2747_v18 }
 0x3ee   : > { %v3999_v24 = vpop.eup %3998  ;;  %v2649_v22 = vmul.f32 1.442695, %v2549_v54  ;;  %v2651_v40 = vmul.f32 1.442695, %v2550_v15 }
 0x3ef   : > { %3068 = vmatprep.mubr.f32.mxu0 %v3999_v24  ;;  %v2476_v57 = vpop.xlane.xlu1 %2475  ;;  %v2750_v19 = vadd.f32 %v3999_v24, %v3997_v21 }
 0x3f0   : > { %4008 = vpow2.f32 %v2649_v22  ;;  %3069 = vmatmul.mubr.f32.gmra.mxu0 %v3997_v21  ;;  %v2551_v32 = vsub.f32 %v5730_v55, %v2476_v57  ;;  %v2552_v30 = vsub.f32 %v5736_v12, %v2476_v57 }
 0x3f1   : > { %4010 = vpow2.f32 %v2651_v40  ;;  %2751 = vadd.xlane.f32.xlu1 %v2750_v19 }
 0x3f2   : > { %v2653_v11 = vmul.f32 1.442695, %v2551_v32  ;;  %v2655_v7 = vmul.f32 1.442695, %v2552_v30 }
 0x3f3   : > { %v2479_v37 = vpop.xlane.xlu0 %2478 }
 0x3f4   : > { %4012 = vpow2.f32 %v2653_v11  ;;  %v2553_v33 = vsub.f32 %v5738_v28, %v2479_v37  ;;  %v2554_v41 = vsub.f32 %v5744_v60, %v2479_v37 }
 0x3f5   : > { %v4001_v53 = vpop.eup %4000  ;;  %4014 = vpow2.f32 %v2655_v7 }
 0x3f6   : > { %v4003_v44 = vpop.eup %4002  ;;  %v2657_v58 = vmul.f32 1.442695, %v2553_v33  ;;  %v2659_v51 = vmul.f32 1.442695, %v2554_v41 }
 0x3f7   : > { %3073 = vmatprep.mubr.f32.mxu0 %v4003_v44  ;;  %v2482_v31 = vpop.xlane.xlu1 %2481  ;;  %v2753_v55 = vadd.f32 %v4003_v44, %v4001_v53 }
 0x3f8   : > { %4016 = vpow2.f32 %v2657_v58  ;;  %3074 = vmatmul.mubr.f32.gmra.mxu0 %v4001_v53  ;;  %v2555_v12 = vsub.f32 %v5746_v42, %v2482_v31  ;;  %v2556_v45 = vsub.f32 %v5752_v56, %v2482_v31 }
 0x3f9   : > { %v4005_v3 = vpop.eup %4004  ;;  %4018 = vpow2.f32 %v2659_v51  ;;  %2754 = vadd.xlane.f32.xlu0 %v2753_v55 }
 0x3fa   : > { %v4007_v28 = vpop.eup %4006  ;;  %v2661_v17 = vmul.f32 1.442695, %v2555_v12  ;;  %v2663_v60 = vmul.f32 1.442695, %v2556_v45 }
 0x3fb   : > { %3078 = vmatprep.mubr.f32.mxu0 %v4007_v28  ;;  %v2485_v46 = vpop.xlane.xlu0 %2484  ;;  %v2756_v25 = vadd.f32 %v4007_v28, %v4005_v3 }
 0x3fc   : > { %4020 = vpow2.f32 %v2661_v17  ;;  %3079 = vmatmul.mubr.f32.gmra.mxu0 %v4005_v3  ;;  %v2557_v26 = vsub.f32 %v5754_v2, %v2485_v46  ;;  %v2558_v52 = vsub.f32 %v5760_v23, %v2485_v46 }
 0x3fd   : > { %v4009_v14 = vpop.eup %4008  ;;  %4022 = vpow2.f32 %v2663_v60  ;;  %2757 = vadd.xlane.f32.xlu1 %v2756_v25 }
 0x3fe   : > { %v4011_v42 = vpop.eup %4010  ;;  %v2665_v56 = vmul.f32 1.442695, %v2557_v26  ;;  %v2667_v36 = vmul.f32 1.442695, %v2558_v52 }
 0x3ff   : > { %3083 = vmatprep.mubr.f32.mxu0 %v4011_v42  ;;  %v2488_v63 = vpop.xlane.xlu1 %2487  ;;  %v2759_v34 = vadd.f32 %v4011_v42, %v4009_v14 }
 0x400   : > { %4024 = vpow2.f32 %v2665_v56  ;;  %3084 = vmatmul.mubr.f32.gmra.mxu0 %v4009_v14  ;;  %v2559_v47 = vsub.f32 %v5762_v10, %v2488_v63  ;;  %v2560_v4 = vsub.f32 %v5768_v50, %v2488_v63 }
 0x401   : > { %v4013_v59 = vpop.eup %4012  ;;  %4026 = vpow2.f32 %v2667_v36  ;;  %2760 = vadd.xlane.f32.xlu0 %v2759_v34 }
 0x402   : > { %v4015_v2 = vpop.eup %4014  ;;  %v2669_v23 = vmul.f32 1.442695, %v2559_v47  ;;  %v2671_v6 = vmul.f32 1.442695, %v2560_v4 }
 0x403   : > { %3088 = vmatprep.mubr.f32.mxu0 %v4015_v2  ;;  %v2491_v49 = vpop.xlane.xlu0 %2490  ;;  %v2762_v27 = vadd.f32 %v4015_v2, %v4013_v59 }
 0x404   : > { %4028 = vpow2.f32 %v2669_v23  ;;  %3089 = vmatmul.mubr.f32.gmra.mxu0 %v4013_v59  ;;  %v2561_v18 = vsub.f32 %v5770_v9, %v2491_v49  ;;  %v2562_v54 = vsub.f32 %v5776_v38, %v2491_v49 }
 0x405   : > { %v4017_v15 = vpop.eup %4016  ;;  %4030 = vpow2.f32 %v2671_v6  ;;  %2763 = vadd.xlane.f32.xlu1 %v2762_v27 }
 0x406   : > { %v4019_v10 = vpop.eup %4018  ;;  %v2673_v50 = vmul.f32 1.442695, %v2561_v18  ;;  %v2675_v21 = vmul.f32 1.442695, %v2562_v54 }
 0x407   : > { %3093 = vmatprep.mubr.f32.mxu0 %v4019_v10  ;;  %v2494_v24 = vpop.xlane.xlu1 %2493  ;;  %v2765_v22 = vadd.f32 %v4019_v10, %v4017_v15 }
 0x408   : > { %4032 = vpow2.f32 %v2673_v50  ;;  %3094 = vmatmul.mubr.f32.gmra.mxu0 %v4017_v15  ;;  %v2563_v40 = vsub.f32 %v5778_v8, %v2494_v24  ;;  %v2564_v57 = vsub.f32 %v5784_v62, %v2494_v24 }
 0x409   : > { %v4021_v19 = vpop.eup %4020  ;;  %4034 = vpow2.f32 %v2675_v21  ;;  %2766 = vadd.xlane.f32.xlu0 %v2765_v22 }
 0x40a   : > { %v4023_v9 = vpop.eup %4022  ;;  %v2677_v38 = vmul.f32 1.442695, %v2563_v40  ;;  %v2679_v32 = vmul.f32 1.442695, %v2564_v57 }
 0x40b   : > { %3098 = vmatprep.mubr.f32.mxu0 %v4023_v9  ;;  %v2497_v30 = vpop.xlane.xlu0 %2496  ;;  %v2768_v11 = vadd.f32 %v4023_v9, %v4021_v19 }
 0x40c   : > { %4036 = vpow2.f32 %v2677_v38  ;;  %3099 = vmatmul.mubr.f32.gmra.mxu0 %v4021_v19  ;;  %v2565_v7 = vsub.f32 %v5786_v20, %v2497_v30  ;;  %v2566_v37 = vsub.f32 %v5792_v35, %v2497_v30 }
 0x40d   : > { %v4025_v33 = vpop.eup %4024  ;;  %4038 = vpow2.f32 %v2679_v32  ;;  %2769 = vadd.xlane.f32.xlu1 %v2768_v11 }
 0x40e   : > { %v4027_v8 = vpop.eup %4026  ;;  %v2681_v62 = vmul.f32 1.442695, %v2565_v7  ;;  %v2683_v41 = vmul.f32 1.442695, %v2566_v37 }
 0x40f   : > { %3103 = vmatprep.mubr.f32.mxu0 %v4027_v8  ;;  %v2500_v53 = vpop.xlane.xlu1 %2499  ;;  %v2771_v44 = vadd.f32 %v4027_v8, %v4025_v33 }
 0x410   : > { %4040 = vpow2.f32 %v2681_v62  ;;  %3104 = vmatmul.mubr.f32.gmra.mxu0 %v4025_v33  ;;  %v2567_v58 = vsub.f32 %v5794_v29, %v2500_v53  ;;  %v2568_v51 = vsub.f32 %v5800_v43, %v2500_v53 }
 0x411   : > { %v4029_v31 = vpop.eup %4028  ;;  %4042 = vpow2.f32 %v2683_v41  ;;  %2772 = vadd.xlane.f32.xlu0 %v2771_v44 }
 0x412   : > { %v4031_v20 = vpop.eup %4030  ;;  %v2685_v35 = vmul.f32 1.442695, %v2567_v58  ;;  %v2687_v55 = vmul.f32 1.442695, %v2568_v51 }
 0x413   : > { %3108 = vmatprep.mubr.f32.mxu0 %v4031_v20  ;;  %v2503_v12 = vpop.xlane.xlu0 %2502  ;;  %v2774_v45 = vadd.f32 %v4031_v20, %v4029_v31 }
 0x414   : > { %4044 = vpow2.f32 %v2685_v35  ;;  %3109 = vmatmul.mubr.f32.gmra.mxu0 %v4029_v31  ;;  %v2569_v3 = vsub.f32 %v5802_v61, %v2503_v12  ;;  %v2570_v28 = vsub.f32 %v5808_v1, %v2503_v12 }
 0x415   : > { %v4033_v17 = vpop.eup %4032  ;;  %4046 = vpow2.f32 %v2687_v55  ;;  %2775 = vadd.xlane.f32.xlu1 %v2774_v45 }
 0x416   : > { %v4035_v29 = vpop.eup %4034  ;;  %v2689_v43 = vmul.f32 1.442695, %v2569_v3  ;;  %v2691_v60 = vmul.f32 1.442695, %v2570_v28 }
 0x417   : > { %3113 = vmatprep.mubr.f32.mxu0 %v4035_v29  ;;  %v2506_v46 = vpop.xlane.xlu1 %2505  ;;  %v2777_v25 = vadd.f32 %v4035_v29, %v4033_v17 }
 0x418   : > { %4048 = vpow2.f32 %v2689_v43  ;;  %3114 = vmatmul.mubr.f32.gmra.mxu0 %v4033_v17  ;;  %v2571_v26 = vsub.f32 %v5810_v13, %v2506_v46  ;;  %v2572_v52 = vsub.f32 %v5816_v39, %v2506_v46 }
 0x419   : > { %v4037_v14 = vpop.eup %4036  ;;  %4050 = vpow2.f32 %v2691_v60  ;;  %2778 = vadd.xlane.f32.xlu0 %v2777_v25 }
 0x41a   : > { %v4039_v61 = vpop.eup %4038  ;;  %v2693_v1 = vmul.f32 1.442695, %v2571_v26  ;;  %v2695_v42 = vmul.f32 1.442695, %v2572_v52 }
 0x41b   : > { %3118 = vmatprep.mubr.f32.mxu0 %v4039_v61  ;;  %v2509_v56 = vpop.xlane.xlu0 %2508  ;;  %v2780_v36 = vadd.f32 %v4039_v61, %v4037_v14 }
 0x41c   : > { %4052 = vpow2.f32 %v2693_v1  ;;  %3119 = vmatmul.mubr.f32.gmra.mxu0 %v4037_v14  ;;  %v2573_v63 = vsub.f32 %v5818_v5, %v2509_v56  ;;  %v2574_v34 = vsub.f32 %v5824_v48, %v2509_v56 }
 0x41d   : > { %v4041_v47 = vpop.eup %4040  ;;  %4054 = vpow2.f32 %v2695_v42  ;;  %2781 = vadd.xlane.f32.xlu1 %v2780_v36 }
 0x41e   : > { %v4043_v13 = vpop.eup %4042  ;;  %v2697_v39 = vmul.f32 1.442695, %v2573_v63  ;;  %v2699_v4 = vmul.f32 1.442695, %v2574_v34 }
 0x41f   : > { %3123 = vmatprep.mubr.f32.mxu0 %v4043_v13  ;;  %v2512_v59 = vpop.xlane.xlu1 %2511  ;;  %v2783_v2 = vadd.f32 %v4043_v13, %v4041_v47 }
 0x420   : > { %4056 = vpow2.f32 %v2697_v39  ;;  %3124 = vmatmul.mubr.f32.gmra.mxu0 %v4041_v47  ;;  %v2575_v23 = vsub.f32 %v5826_v0, %v2512_v59  ;;  %v2576_v6 = vsub.f32 %v5831_v16, %v2512_v59 }
 0x421   : > { %v4045_v49 = vpop.eup %4044  ;;  %4058 = vpow2.f32 %v2699_v4  ;;  %2784 = vadd.xlane.f32.xlu0 %v2783_v2 }
 0x422   : > { %v4047_v5 = vpop.eup %4046  ;;  %v2701_v48 = vmul.f32 1.442695, %v2575_v23  ;;  %v2703_v27 = vmul.f32 1.442695, %v2576_v6 }
 0x423   : > { %3128 = vmatprep.mubr.f32.mxu0 %v4047_v5  ;;  %v2786_v18 = vadd.f32 %v4047_v5, %v4045_v49 }
 0x424   : > { %4060 = vpow2.f32 %v2701_v48  ;;  %3129 = vmatmul.mubr.f32.gmra.mxu0 %v4045_v49 }
 0x425   : > { %v4049_v54 = vpop.eup %4048  ;;  %4062 = vpow2.f32 %v2703_v27  ;;  %2787 = vadd.xlane.f32.xlu1 %v2786_v18 }
 0x426   : > { %v4051_v15 = vpop.eup %4050 }
 0x427   : > { %3133 = vmatprep.mubr.f32.mxu0 %v4051_v15  ;;  %v2789_v10 = vadd.f32 %v4051_v15, %v4049_v54 }
 0x428   : > { %3134 = vmatmul.mubr.f32.gmra.mxu0 %v4049_v54 }
 0x429   : > { %v4053_v0 = vpop.eup %4052  ;;  %2790 = vadd.xlane.f32.xlu0 %v2789_v10 }
 0x42a   : > { %v4055_v16 = vpop.eup %4054 }
 0x42b   : > { %3138 = vmatprep.mubr.f32.mxu0 %v4055_v16  ;;  %v2792_v50 = vadd.f32 %v4055_v16, %v4053_v0 }
 0x42c   : > { %3139 = vmatmul.mubr.f32.gmra.mxu0 %v4053_v0 }
 0x42d   : > { %v4057_v21 = vpop.eup %4056  ;;  %2793 = vadd.xlane.f32.xlu1 %v2792_v50 }
 0x42e   : > { %v4059_v24 = vpop.eup %4058 }
 0x42f   : > { %3143 = vmatprep.mubr.f32.mxu0 %v4059_v24  ;;  %v2795_v22 = vadd.f32 %v4059_v24, %v4057_v21 }
 0x430   : > { %3144 = vmatmul.mubr.f32.gmra.mxu0 %v4057_v21 }
 0x431   : > { %v4061_v40 = vpop.eup %4060  ;;  %2796 = vadd.xlane.f32.xlu0 %v2795_v22 }
 0x432   : > { %v4063_v57 = vpop.eup %4062 }
 0x433   : > { %3148 = vmatprep.mubr.f32.mxu0 %v4063_v57  ;;  %v2798_v19 = vadd.f32 %v4063_v57, %v4061_v40 }
 0x434   : > { %3149 = vmatmul.mubr.f32.gmra.mxu0 %v4061_v40 }
 0x435   : > { %2799 = vadd.xlane.f32.xlu1 %v2798_v19 }
 0x43e   : > { %v2707_v9 = vpop.xlane.xlu0 %2706 }
 0x43f   : > { %4064 = vrcp.f32 %v2707_v9 }
 0x442   : > { %v2710_v38 = vpop.xlane.xlu1 %2709 }
 0x443   : > { %4066 = vrcp.f32 %v2710_v38 }
 0x446   : > { %v2713_v32 = vpop.xlane.xlu0 %2712 }
 0x447   : > { %4068 = vrcp.f32 %v2713_v32 }
 0x44a   : > { %v2716_v30 = vpop.xlane.xlu1 %2715 }
 0x44b   : > { %4070 = vrcp.f32 %v2716_v30 }
 0x44c   : > { %v4065_v11 = vpop.eup %4064 }
 0x44d   : > { %v2833_v37 = vmul.f32 %v4065_v11, %v2707_v9 }
 0x44e   : > { %v2719_v7 = vpop.xlane.xlu0 %2718 }
 0x44f   : > { %4072 = vrcp.f32 %v2719_v7  ;;  %v2865_v62 = vsub.f32 2.0, %v2833_v37 }
 0x450   : > { %v4067_v33 = vpop.eup %4066 }
 0x451   : > { %v2834_v41 = vmul.f32 %v4067_v33, %v2710_v38  ;;  %v2897_v31 = vmul.f32 %v4065_v11, %v2865_v62 }
 0x452   : > { %v2722_v8 = vpop.xlane.xlu1 %2721 }
 0x453   : > { %4074 = vrcp.f32 %v2722_v8  ;;  %v2866_v58 = vsub.f32 2.0, %v2834_v41 }
 0x454   : > { %v4069_v53 = vpop.eup %4068 }
 0x455   : > { %v2835_v51 = vmul.f32 %v4069_v53, %v2713_v32  ;;  %v2898_v17 = vmul.f32 %v4067_v33, %v2866_v58 }
 0x456   : > { %v2725_v44 = vpop.xlane.xlu0 %2724 }
 0x457   : > { %4076 = vrcp.f32 %v2725_v44  ;;  %v2867_v3 = vsub.f32 2.0, %v2835_v51 }
 0x458   : > { %v4071_v20 = vpop.eup %4070 }
 0x459   : > { %v2836_v28 = vmul.f32 %v4071_v20, %v2716_v30  ;;  %v2899_v14 = vmul.f32 %v4069_v53, %v2867_v3 }
 0x45a   : > { %v2728_v35 = vpop.xlane.xlu1 %2727 }
 0x45b   : > { %4078 = vrcp.f32 %v2728_v35  ;;  %v2868_v26 = vsub.f32 2.0, %v2836_v28 }
 0x45c   : > { %v4073_v29 = vpop.eup %4072 }
 0x45d   : > { %v2837_v52 = vmul.f32 %v4073_v29, %v2719_v7  ;;  %v2900_v47 = vmul.f32 %v4071_v20, %v2868_v26 }
 0x45e   : > { %v2731_v43 = vpop.xlane.xlu0 %2730 }
 0x45f   : > { %4080 = vrcp.f32 %v2731_v43  ;;  %v2869_v63 = vsub.f32 2.0, %v2837_v52 }
 0x460   : > { %v4075_v61 = vpop.eup %4074 }
 0x461   : > { %v2838_v34 = vmul.f32 %v4075_v61, %v2722_v8  ;;  %v2901_v49 = vmul.f32 %v4073_v29, %v2869_v63 }
 0x462   : > { %v2734_v1 = vpop.xlane.xlu1 %2733 }
 0x463   : > { %4082 = vrcp.f32 %v2734_v1  ;;  %v2870_v23 = vsub.f32 2.0, %v2838_v34 }
 0x464   : > { %v4077_v13 = vpop.eup %4076 }
 0x465   : > { %v2839_v6 = vmul.f32 %v4077_v13, %v2725_v44  ;;  %v2902_v0 = vmul.f32 %v4075_v61, %v2870_v23 }
 0x466   : > { %v2737_v39 = vpop.xlane.xlu0 %2736 }
 0x467   : > { %4084 = vrcp.f32 %v2737_v39  ;;  %v2871_v15 = vsub.f32 2.0, %v2839_v6 }
 0x468   : > { %v4079_v5 = vpop.eup %4078 }
 0x469   : > { %v2840_v10 = vmul.f32 %v4079_v5, %v2728_v35  ;;  %v2903_v19 = vmul.f32 %v4077_v13, %v2871_v15 }
 0x46a   : > { %v2740_v48 = vpop.xlane.xlu1 %2739 }
 0x46b   : > { %4086 = vrcp.f32 %v2740_v48  ;;  %v2872_v40 = vsub.f32 2.0, %v2840_v10 }
 0x46c   : > { %v4081_v16 = vpop.eup %4080 }
 0x46d   : > { %v2841_v57 = vmul.f32 %v4081_v16, %v2731_v43  ;;  %v2904_v33 = vmul.f32 %v4079_v5, %v2872_v40 }
 0x46e   : > { %v2743_v50 = vpop.xlane.xlu0 %2742 }
 0x46f   : > { %4088 = vrcp.f32 %v2743_v50  ;;  %v2873_v7 = vsub.f32 2.0, %v2841_v57 }
 0x470   : > { %v4083_v9 = vpop.eup %4082 }
 0x471   : > { %v2842_v37 = vmul.f32 %v4083_v9, %v2734_v1 }
 0x472   : > { %v2746_v38 = vpop.xlane.xlu1 %2745 }
 0x473   : > { %4090 = vrcp.f32 %v2746_v38  ;;  %v2874_v58 = vsub.f32 2.0, %v2842_v37 }
 0x474   : > { %v2995_v55 = vpop.f32.mrf.mxu0  ;;  %v4085_v8 = vpop.eup %4084 }
 0x475   : > { %v3154_v12 = vmul.f32 %v2995_v55, %v2897_v31  ;;  %v2843_v51 = vmul.f32 %v4085_v8, %v2737_v39  ;;  %v2905_v31 = vmul.f32 %v4081_v16, %v2873_v7 }
 0x476   : > { %v2997_v45 = vpop.f32.mrf.mxu0  ;;  %v2749_v62 = vpop.xlane.xlu0 %2748 }
 0x477   : > { %3186 = vst.msk [vmem:[%s5888_s7] sm:$0xff] %vm1803_vm0, %v3154_v12  ;;  %4092 = vrcp.f32 %v2749_v62  ;;  %v2875_v3 = vsub.f32 2.0, %v2843_v51 }
 0x478   : > { %v3000_v60 = vpop.f32.mrf.mxu0  ;;  %v4087_v20 = vpop.eup %4086 }
 0x479   : > { %v3155_v46 = vmul.f32 %v3000_v60, %v2898_v17  ;;  %v2844_v28 = vmul.f32 %v4087_v20, %v2740_v48  ;;  %v2906_v17 = vmul.f32 %v4083_v9, %v2874_v58  ;;  %v2907_v52 = vmul.f32 %v4085_v8, %v2875_v3 }
 0x47a   : > { %v3002_v25 = vpop.f32.mrf.mxu0  ;;  %v2752_v35 = vpop.xlane.xlu1 %2751 }
 0x47b   : > { %3187 = vst.msk [vmem:[%s5888_s7 + $0x8] sm:$0xff] %vm1803_vm0, %v3155_v46  ;;  %4094 = vrcp.f32 %v2752_v35  ;;  %v2876_v25 = vsub.f32 2.0, %v2844_v28 }
 0x47c   : > { %v3005_v42 = vpop.f32.mrf.mxu0  ;;  %v4089_v29 = vpop.eup %4088 }
 0x47d   : > { %v3156_v56 = vmul.f32 %v3005_v42, %v2899_v14  ;;  %v2845_v26 = vmul.f32 %v4089_v29, %v2743_v50  ;;  %v2908_v34 = vmul.f32 %v4087_v20, %v2876_v25 }
 0x47e   : > { %v3007_v36 = vpop.f32.mrf.mxu0 }
 0x47f   : > { %3188 = vst.msk [vmem:[%s5888_s7 + $0x10] sm:$0xff] %vm1803_vm0, %v3156_v56  ;;  %v2877_v36 = vsub.f32 2.0, %v2845_v26 }
 0x480   : > { %v3010_v4 = vpop.f32.mrf.mxu0  ;;  %v4091_v14 = vpop.eup %4090 }
 0x481   : > { %v3157_v59 = vmul.f32 %v3010_v4, %v2900_v47  ;;  %v2846_v63 = vmul.f32 %v4091_v14, %v2746_v38  ;;  %v2909_v6 = vmul.f32 %v4089_v29, %v2877_v36 }
 0x482   : > { %v3012_v2 = vpop.f32.mrf.mxu0  ;;  %v2755_v61 = vpop.xlane.xlu0 %2754 }
 0x483   : > { %3189 = vst.msk [vmem:[%s5888_s7 + $0x18] sm:$0xff] %vm1803_vm0, %v3157_v59  ;;  %4096 = vrcp.f32 %v2755_v61  ;;  %v2878_v2 = vsub.f32 2.0, %v2846_v63 }
 0x484   : > { %v3015_v27 = vpop.f32.mrf.mxu0  ;;  %v4093_v47 = vpop.eup %4092 }
 0x485   : > { %v3158_v18 = vmul.f32 %v3015_v27, %v2901_v49  ;;  %v2847_v23 = vmul.f32 %v4093_v47, %v2749_v62  ;;  %v2910_v10 = vmul.f32 %v4091_v14, %v2878_v2 }
 0x486   : > { %v3017_v54 = vpop.f32.mrf.mxu0  ;;  %v2758_v13 = vpop.xlane.xlu1 %2757 }
 0x487   : > { %3190 = vst.msk [vmem:[%s5888_s7 + $0x20] sm:$0xff] %vm1803_vm0, %v3158_v18  ;;  %4098 = vrcp.f32 %v2758_v13  ;;  %v2879_v54 = vsub.f32 2.0, %v2847_v23 }
 0x488   : > { %v3020_v21 = vpop.f32.mrf.mxu0  ;;  %v4095_v49 = vpop.eup %4094 }
 0x489   : > { %v3159_v24 = vmul.f32 %v3020_v21, %v2902_v0  ;;  %v2848_v15 = vmul.f32 %v4095_v49, %v2752_v35 }
 0x48a   : > { %v3022_v22 = vpop.f32.mrf.mxu0  ;;  %v2761_v5 = vpop.xlane.xlu0 %2760 }
 0x48b   : > { %3191 = vst.msk [vmem:[%s5888_s7 + $0x28] sm:$0xff] %vm1803_vm0, %v3159_v24  ;;  %4100 = vrcp.f32 %v2761_v5  ;;  %v2880_v24 = vsub.f32 2.0, %v2848_v15  ;;  %v2911_v22 = vmul.f32 %v4093_v47, %v2879_v54 }
 0x48c   : > { %v3025_v32 = vpop.f32.mrf.mxu0 }
 0x48d   : > { %v3160_v30 = vmul.f32 %v3025_v32, %v2903_v19 }
 0x48e   : > { %v3027_v11 = vpop.f32.mrf.mxu0  ;;  %v2764_v0 = vpop.xlane.xlu1 %2763 }
 0x48f   : > { %3192 = vst.msk [vmem:[%s5888_s7 + $0x30] sm:$0xff] %vm1803_vm0, %v3160_v30  ;;  %4102 = vrcp.f32 %v2764_v0  ;;  %v2912_v30 = vmul.f32 %v4095_v49, %v2880_v24 }
 0x490   : > { %v3030_v41 = vpop.f32.mrf.mxu0  ;;  %v4097_v40 = vpop.eup %4096 }
 0x491   : > { %v3161_v53 = vmul.f32 %v3030_v41, %v2904_v33  ;;  %v2849_v32 = vmul.f32 %v4097_v40, %v2755_v61 }
 0x492   : > { %v3032_v44 = vpop.f32.mrf.mxu0  ;;  %v2767_v57 = vpop.xlane.xlu0 %2766 }
 0x493   : > { %3193 = vst.msk [vmem:[%s5888_s7 + $0x38] sm:$0xff] %vm1803_vm0, %v3161_v53  ;;  %4104 = vrcp.f32 %v2767_v57  ;;  %v2881_v62 = vsub.f32 2.0, %v2849_v32 }
 0x494   : > { %v3035_v55 = vpop.f32.mrf.mxu0  ;;  %v4099_v11 = vpop.eup %4098 }
 0x495   : > { %v3162_v12 = vmul.f32 %v3035_v55, %v2905_v31  ;;  %v2850_v41 = vmul.f32 %v4099_v11, %v2758_v13  ;;  %v2913_v31 = vmul.f32 %v4097_v40, %v2881_v62 }
 0x496   : > { %v3037_v45 = vpop.f32.mrf.mxu0  ;;  %v2770_v7 = vpop.xlane.xlu1 %2769 }
 0x497   : > { %3194 = vst.msk [vmem:[%s5888_s7 + $0x40] sm:$0xff] %vm1803_vm0, %v3162_v12  ;;  %4106 = vrcp.f32 %v2770_v7  ;;  %v2882_v58 = vsub.f32 2.0, %v2850_v41 }
 0x498   : > { %v3040_v43 = vpop.f32.mrf.mxu0  ;;  %v4101_v53 = vpop.eup %4100 }
 0x499   : > { %v3163_v60 = vmul.f32 %v3040_v43, %v2906_v17  ;;  %v2851_v51 = vmul.f32 %v4101_v53, %v2761_v5  ;;  %v2914_v17 = vmul.f32 %v4099_v11, %v2882_v58 }
 0x49a   : > { %v3042_v46 = vpop.f32.mrf.mxu0  ;;  %v2773_v44 = vpop.xlane.xlu0 %2772 }
 0x49b   : > { %3195 = vst.msk [vmem:[%s5888_s7 + $0x48] sm:$0xff] %vm1803_vm0, %v3163_v60  ;;  %4108 = vrcp.f32 %v2773_v44  ;;  %v2883_v3 = vsub.f32 2.0, %v2851_v51 }
 0x49c   : > { %v3045_v1 = vpop.f32.mrf.mxu0  ;;  %v4103_v20 = vpop.eup %4102 }
 0x49d   : > { %v3164_v42 = vmul.f32 %v3045_v1, %v2907_v52  ;;  %v2852_v28 = vmul.f32 %v4103_v20, %v2764_v0  ;;  %v2915_v14 = vmul.f32 %v4101_v53, %v2883_v3 }
 0x49e   : > { %v3047_v56 = vpop.f32.mrf.mxu0  ;;  %v2776_v35 = vpop.xlane.xlu1 %2775 }
 0x49f   : > { %3196 = vst.msk [vmem:[%s5888_s7 + $0x50] sm:$0xff] %vm1803_vm0, %v3164_v42  ;;  %4110 = vrcp.f32 %v2776_v35  ;;  %v2884_v26 = vsub.f32 2.0, %v2852_v28 }
 0x4a0   : > { %v3050_v39 = vpop.f32.mrf.mxu0  ;;  %v4105_v29 = vpop.eup %4104 }
 0x4a1   : > { %v3165_v4 = vmul.f32 %v3050_v39, %v2908_v34  ;;  %v2853_v52 = vmul.f32 %v4105_v29, %v2767_v57  ;;  %v2916_v47 = vmul.f32 %v4103_v20, %v2884_v26 }
 0x4a2   : > { %v3052_v59 = vpop.f32.mrf.mxu0  ;;  %v2779_v43 = vpop.xlane.xlu0 %2778 }
 0x4a3   : > { %3197 = vst.msk [vmem:[%s5888_s7 + $0x58] sm:$0xff] %vm1803_vm0, %v3165_v4  ;;  %4112 = vrcp.f32 %v2779_v43  ;;  %v2885_v63 = vsub.f32 2.0, %v2853_v52 }
 0x4a4   : > { %v3055_v48 = vpop.f32.mrf.mxu0  ;;  %v4107_v61 = vpop.eup %4106 }
 0x4a5   : > { %v3166_v27 = vmul.f32 %v3055_v48, %v2909_v6  ;;  %v2854_v34 = vmul.f32 %v4107_v61, %v2770_v7  ;;  %v2917_v49 = vmul.f32 %v4105_v29, %v2885_v63 }
 0x4a6   : > { %v3057_v18 = vpop.f32.mrf.mxu0  ;;  %v2782_v1 = vpop.xlane.xlu1 %2781 }
 0x4a7   : > { %3198 = vst.msk [vmem:[%s5888_s7 + $0x60] sm:$0xff] %vm1803_vm0, %v3166_v27  ;;  %4114 = vrcp.f32 %v2782_v1  ;;  %v2886_v23 = vsub.f32 2.0, %v2854_v34 }
 0x4a8   : > { %v3060_v16 = vpop.f32.mrf.mxu0  ;;  %v4109_v13 = vpop.eup %4108 }
 0x4a9   : > { %v3167_v50 = vmul.f32 %v3060_v16, %v2910_v10  ;;  %v2855_v6 = vmul.f32 %v4109_v13, %v2773_v44  ;;  %v2918_v0 = vmul.f32 %v4107_v61, %v2886_v23 }
 0x4aa   : > { %v3062_v21 = vpop.f32.mrf.mxu0  ;;  %v2785_v39 = vpop.xlane.xlu0 %2784 }
 0x4ab   : > { %3199 = vst.msk [vmem:[%s5888_s7 + $0x68] sm:$0xff] %vm1803_vm0, %v3167_v50  ;;  %4116 = vrcp.f32 %v2785_v39  ;;  %v2887_v15 = vsub.f32 2.0, %v2855_v6 }
 0x4ac   : > { %v3065_v19 = vpop.f32.mrf.mxu0  ;;  %v4111_v5 = vpop.eup %4110 }
 0x4ad   : > { %v3168_v9 = vmul.f32 %v3065_v19, %v2911_v22  ;;  %v2856_v10 = vmul.f32 %v4111_v5, %v2776_v35  ;;  %v2919_v19 = vmul.f32 %v4109_v13, %v2887_v15 }
 0x4ae   : > { %v3067_v38 = vpop.f32.mrf.mxu0  ;;  %v2788_v48 = vpop.xlane.xlu1 %2787 }
 0x4af   : > { %3200 = vst.msk [vmem:[%s5888_s7 + $0x70] sm:$0xff] %vm1803_vm0, %v3168_v9  ;;  %4118 = vrcp.f32 %v2788_v48  ;;  %v2888_v40 = vsub.f32 2.0, %v2856_v10 }
 0x4b0   : > { %v3070_v37 = vpop.f32.mrf.mxu0  ;;  %v4113_v16 = vpop.eup %4112 }
 0x4b1   : > { %v3169_v33 = vmul.f32 %v3070_v37, %v2912_v30  ;;  %v2857_v57 = vmul.f32 %v4113_v16, %v2779_v43 }
 0x4b2   : > { %v3072_v8 = vpop.f32.mrf.mxu0  ;;  %v2791_v50 = vpop.xlane.xlu0 %2790 }
 0x4b3   : > { %3201 = vst.msk [vmem:[%s5888_s7 + $0x78] sm:$0xff] %vm1803_vm0, %v3169_v33  ;;  %4120 = vrcp.f32 %v2791_v50  ;;  %v2889_v7 = vsub.f32 2.0, %v2857_v57  ;;  %v2920_v33 = vmul.f32 %v4111_v5, %v2888_v40 }
 0x4b4   : > { %v4115_v9 = vpop.eup %4114 }
 0x4b5   : > { %v2858_v37 = vmul.f32 %v4115_v9, %v2782_v1 }
 0x4b6   : > { %v2794_v38 = vpop.xlane.xlu1 %2793 }
 0x4b7   : > { %4122 = vrcp.f32 %v2794_v38  ;;  %v2890_v58 = vsub.f32 2.0, %v2858_v37 }
 0x4b8   : > { %v3075_v55 = vpop.f32.mrf.mxu0  ;;  %v4117_v8 = vpop.eup %4116 }
 0x4b9   : > { %v3170_v12 = vmul.f32 %v3075_v55, %v2913_v31  ;;  %v2859_v51 = vmul.f32 %v4117_v8, %v2785_v39  ;;  %v2921_v31 = vmul.f32 %v4113_v16, %v2889_v7 }
 0x4ba   : > { %v3077_v45 = vpop.f32.mrf.mxu0  ;;  %v2797_v62 = vpop.xlane.xlu0 %2796 }
 0x4bb   : > { %3202 = vst.msk [vmem:[%s5888_s7 + $0x80] sm:$0xff] %vm1803_vm0, %v3170_v12  ;;  %4124 = vrcp.f32 %v2797_v62  ;;  %v2891_v3 = vsub.f32 2.0, %v2859_v51 }
 0x4bc   : > { %v3080_v60 = vpop.f32.mrf.mxu0  ;;  %v4119_v20 = vpop.eup %4118 }
 0x4bd   : > { %v3171_v46 = vmul.f32 %v3080_v60, %v2914_v17  ;;  %v2860_v28 = vmul.f32 %v4119_v20, %v2788_v48  ;;  %v2922_v17 = vmul.f32 %v4115_v9, %v2890_v58  ;;  %v2923_v52 = vmul.f32 %v4117_v8, %v2891_v3 }
 0x4be   : > { %v3082_v25 = vpop.f32.mrf.mxu0  ;;  %v2800_v35 = vpop.xlane.xlu1 %2799 }
 0x4bf   : > { %3203 = vst.msk [vmem:[%s5888_s7 + $0x88] sm:$0xff] %vm1803_vm0, %v3171_v46  ;;  %4126 = vrcp.f32 %v2800_v35  ;;  %v2892_v25 = vsub.f32 2.0, %v2860_v28 }
 0x4c0   : > { %v3085_v42 = vpop.f32.mrf.mxu0  ;;  %v4121_v29 = vpop.eup %4120 }
 0x4c1   : > { %v3172_v56 = vmul.f32 %v3085_v42, %v2915_v14  ;;  %v2861_v26 = vmul.f32 %v4121_v29, %v2791_v50  ;;  %v2924_v63 = vmul.f32 %v4119_v20, %v2892_v25 }
 0x4c2   : > { %v3087_v36 = vpop.f32.mrf.mxu0 }
 0x4c3   : > { %3204 = vst.msk [vmem:[%s5888_s7 + $0x90] sm:$0xff] %vm1803_vm0, %v3172_v56  ;;  %v2893_v56 = vsub.f32 2.0, %v2861_v26 }
 0x4c4   : > { %v3090_v4 = vpop.f32.mrf.mxu0  ;;  %v4123_v14 = vpop.eup %4122 }
 0x4c5   : > { %v3173_v59 = vmul.f32 %v3090_v4, %v2916_v47  ;;  %v2862_v36 = vmul.f32 %v4123_v14, %v2794_v38 }
 0x4c6   : > { %v3092_v2 = vpop.f32.mrf.mxu0 }
 0x4c7   : > { %3205 = vst.msk [vmem:[%s5888_s7 + $0x98] sm:$0xff] %vm1803_vm0, %v3173_v59  ;;  %v2894_v4 = vsub.f32 2.0, %v2862_v36  ;;  %v2925_v2 = vmul.f32 %v4121_v29, %v2893_v56 }
 0x4c8   : > { %v3095_v27 = vpop.f32.mrf.mxu0  ;;  %v4125_v34 = vpop.eup %4124 }
 0x4c9   : > { %v3174_v18 = vmul.f32 %v3095_v27, %v2917_v49  ;;  %v2863_v59 = vmul.f32 %v4125_v34, %v2797_v62 }
 0x4ca   : > { %v3097_v54 = vpop.f32.mrf.mxu0 }
 0x4cb   : > { %3206 = vst.msk [vmem:[%s5888_s7 + $0xa0] sm:$0xff] %vm1803_vm0, %v3174_v18  ;;  %v2895_v48 = vsub.f32 2.0, %v2863_v59  ;;  %v2926_v18 = vmul.f32 %v4123_v14, %v2894_v4 }
 0x4cc   : > { %v3100_v21 = vpop.f32.mrf.mxu0  ;;  %v4127_v23 = vpop.eup %4126 }
 0x4cd   : > { %v3175_v24 = vmul.f32 %v3100_v21, %v2918_v0  ;;  %v2864_v27 = vmul.f32 %v4127_v23, %v2800_v35  ;;  %v2927_v16 = vmul.f32 %v4125_v34, %v2895_v48 }
 0x4ce   : > { %v3102_v22 = vpop.f32.mrf.mxu0 }
 0x4cf   : > { %3207 = vst.msk [vmem:[%s5888_s7 + $0xa8] sm:$0xff] %vm1803_vm0, %v3175_v24  ;;  %v2896_v0 = vsub.f32 2.0, %v2864_v27 }
 0x4d0   : > { %v3105_v32 = vpop.f32.mrf.mxu0 }
 0x4d1   : > { %v3176_v30 = vmul.f32 %v3105_v32, %v2919_v19  ;;  %v2928_v22 = vmul.f32 %v4127_v23, %v2896_v0 }
 0x4d2   : > { %v3107_v11 = vpop.f32.mrf.mxu0 }
 0x4d3   : > { %3208 = vst.msk [vmem:[%s5888_s7 + $0xb0] sm:$0xff] %vm1803_vm0, %v3176_v30 }
 0x4d4   : > { %v3110_v41 = vpop.f32.mrf.mxu0 }
 0x4d5   : > { %v3177_v53 = vmul.f32 %v3110_v41, %v2920_v33 }
 0x4d6   : > { %v3112_v44 = vpop.f32.mrf.mxu0 }
 0x4d7   : > { %3209 = vst.msk [vmem:[%s5888_s7 + $0xb8] sm:$0xff] %vm1803_vm0, %v3177_v53 }
 0x4d8   : > { %v3115_v55 = vpop.f32.mrf.mxu0 }
 0x4d9   : > { %v3178_v12 = vmul.f32 %v3115_v55, %v2921_v31 }
 0x4da   : > { %v3117_v45 = vpop.f32.mrf.mxu0 }
 0x4db   : > { %3210 = vst.msk [vmem:[%s5888_s7 + $0xc0] sm:$0xff] %vm1803_vm0, %v3178_v12 }
 0x4dc   : > { %v3120_v43 = vpop.f32.mrf.mxu0 }
 0x4dd   : > { %v3179_v60 = vmul.f32 %v3120_v43, %v2922_v17 }
 0x4de   : > { %v3122_v46 = vpop.f32.mrf.mxu0 }
 0x4df   : > { %3211 = vst.msk [vmem:[%s5888_s7 + $0xc8] sm:$0xff] %vm1803_vm0, %v3179_v60 }
 0x4e0   : > { %v3125_v61 = vpop.f32.mrf.mxu0 }
 0x4e1   : > { %v3180_v1 = vmul.f32 %v3125_v61, %v2923_v52 }
 0x4e2   : > { %v3127_v42 = vpop.f32.mrf.mxu0 }
 0x4e3   : > { %3212 = vst.msk [vmem:[%s5888_s7 + $0xd0] sm:$0xff] %vm1803_vm0, %v3180_v1 }
 0x4e4   : > { %v3130_v47 = vpop.f32.mrf.mxu0 }
 0x4e5   : > { %v3181_v13 = vmul.f32 %v3130_v47, %v2924_v63 }
 0x4e6   : > { %v3132_v39 = vpop.f32.mrf.mxu0 }
 0x4e7   : > { %3213 = vst.msk [vmem:[%s5888_s7 + $0xd8] sm:$0xff] %vm1803_vm0, %v3181_v13 }
 0x4e8   : > { %v3135_v6 = vpop.f32.mrf.mxu0 }
 0x4e9   : > { %v3182_v49 = vmul.f32 %v3135_v6, %v2925_v2 }
 0x4ea   : > { %v3137_v5 = vpop.f32.mrf.mxu0 }
 0x4eb   : > { %3214 = vst.msk [vmem:[%s5888_s7 + $0xe0] sm:$0xff] %vm1803_vm0, %v3182_v49 }
 0x4ec   : > { %v3140_v54 = vpop.f32.mrf.mxu0 }
 0x4ed   : > { %v3183_v15 = vmul.f32 %v3140_v54, %v2926_v18 }
 0x4ee   : > { %v3142_v10 = vpop.f32.mrf.mxu0 }
 0x4ef   : > { %3215 = vst.msk [vmem:[%s5888_s7 + $0xe8] sm:$0xff] %vm1803_vm0, %v3183_v15 }
 0x4f0   : > { %v3145_v50 = vpop.f32.mrf.mxu0 }
 0x4f1   : > { %v3184_v21 = vmul.f32 %v3145_v50, %v2927_v16 }
 0x4f2   : > { %v3147_v24 = vpop.f32.mrf.mxu0 }
 0x4f3   : > { %3216 = vst.msk [vmem:[%s5888_s7 + $0xf0] sm:$0xff] %vm1803_vm0, %v3184_v21 }
 0x4f4   : > { %v3150_v40 = vpop.f32.mrf.mxu0 }
 0x4f5   : > { %v3185_v57 = vmul.f32 %v3150_v40, %v2928_v22 }
 0x4f6   : > { %v3152_v19 = vpop.f32.mrf.mxu0 }
 0x4f7   : > { %3217 = vst.msk [vmem:[%s5888_s7 + $0xf8] sm:$0xff] %vm1803_vm0, %v3185_v57 }
 0x4f8 PF: > { %s19_s20 = sadd.s32 1, %s4308_s20   ;;  %s6279_s15 = smov %s4292_s16 }
 0x4f9   : > { %p16_p4 = scmp.ge.s32.totalorder %s19_s20, 4   ;;  %s6280_s16 = smov %s4296_s17 }
 0x4fa   : > { %s6281_s17 = smov %s4448_s5  ;;  %s6282_s18 = smov %s4304_s19 }
 0x4fb   : > { %s6283_s19 = smov %s6285_s26  ;;  %18 = sbr.rel (!%p16_p4) target bundleno = 6 (0x6), region = 88 }
 0x500   :  { %3248 = vsyncpa [#allocation3], 1 }
 0x501   :  { %3250 = vsyncpa [#allocation3 + $0x1], 1 }
 0x502   :  { %3251 = vsyncpa [#allocation5], 1 }
 0x503   :  { %3252 = vsyncpa [#allocation8], 1 }

</bundles_post_ra>
